<compile_context>
chip_gen: v6e
topology: v6e:2x2x1
jax: 0.10.0
libtpu: 0.0.40
codegen_flags: <defaults>
</compile_context>

<pallas_src>
import jax
import jax.numpy as jnp
from jax.experimental import pallas as pl
from jax.experimental.pallas import tpu as pltpu

EPS = 1e-5


def _make_kernel(N, H, W, C):
    """Fused BasicBlock kernel specialized for static (N, H, W, C)."""
    NH, WC = N * H, W * C
    inv_m = 1.0 / float(N * H * W)          # BN sample count per channel

    def wsum_bcast(v):
        # Sum over the W lane-groups of each channel AND rebroadcast, via a
        # circular lane roll-and-add tree (XLU + VPU only; no MXU, no projector).
        if W & (W - 1) == 0:                              # power of two: log2(W) steps
            s = C
            for _ in range(W.bit_length() - 1):
                v = v + pltpu.roll(v, shift=s, axis=1)
                s *= 2
            return v
        acc = v                                           # generic fallback: W-1 rolls
        for j in range(1, W):
            acc = acc + pltpu.roll(v, shift=j * C, axis=1)
        return acc

    def kernel(x_ref, w1_ref, w2_ref, g1_ref, be1_ref, g2_ref, be2_ref,
               mup_ref, mdn_ref, out_ref):
        # x_ref   : (N*H, W*C)   f32  rows = (n,h), lanes = (w,c)   (lane-dense)
        # w*_ref  : (W*C, 3*W*C) bf16 banded conv weights, 3 dy taps concatenated
        # g*/be*  : (1, W*C)     f32  BN gamma/beta pre-tiled over w
        # m*_ref  : (N*H, 1)     f32  boundary masks for the dy = 0 / 2 row shifts
        # out_ref : (N*H, W*C)   f32
        x = x_ref[...]                                    # f32 identity / residual
        m_up = mup_ref[...]
        m_dn = mdn_ref[...]

        def conv3x3_bn(inp_bf16, w_ref, gamma, beta):
            # One wide bf16 MXU matmul for all three dy taps (K = WC, N = 3*WC).
            # The slices below sit at W*C-multiples of 128 lanes -> tile aligned.
            y = jnp.dot(inp_bf16, w_ref[...], preferred_element_type=jnp.float32)
            y0 = y[:, 0:WC]
            y1 = y[:, WC:2 * WC]
            y2 = y[:, 2 * WC:3 * WC]
            # dy row shifts: XLU sublane rolls + VPU boundary masks
            # out[h] = y0[h-1] + y1[h] + y2[h+1], zero-padded at image edges.
            acc = (y1
                   + pltpu.roll(y0, shift=1, axis=0) * m_up
                   + pltpu.roll(y2, shift=NH - 1, axis=0) * m_dn)
            # Training-mode BatchNorm (batch mean / biased variance), two-pass.
            # Per-channel stats: lane roll-tree (over w groups) + sublane reduce.
            mean = jnp.sum(wsum_bcast(acc), axis=0, keepdims=True) * inv_m
            d = acc - mean
            var = jnp.sum(wsum_bcast(d * d), axis=0, keepdims=True) * inv_m
            scale = gamma * jax.lax.rsqrt(var + EPS)
            return d * scale + beta

        # stage 1: conv1 -> bn1 -> relu   (conv bias cancelled by BN mean subtraction)
        h1 = jnp.maximum(
            conv3x3_bn(x.astype(jnp.bfloat16), w1_ref, g1_ref[...], be1_ref[...]),
            0.0)
        # stage 2: conv2 -> bn2 -> +identity -> relu
        o = conv3x3_bn(h1.astype(jnp.bfloat16), w2_ref, g2_ref[...], be2_ref[...])
        out_ref[...] = jnp.maximum(o + x, 0.0)

    return kernel


def _band_weights_cat(w_hwio, W):
    """(3,3,Cin,Cout) HWIO conv weight -> single (W*Cin, 3*W*Cout) operand.

    Column block dy holds the block-banded matrix
        B_dy[wi*Cin+ci, wo*Cout+co] = w[dy, dx, ci, co]   with wi = wo + dx - 1,
    truncated at the W edges (implements the zero padding along W).
    """
    kh, kw, cin, cout = w_hwio.shape
    wi = jnp.arange(W)[:, None]
    wo = jnp.arange(W)[None, :]
    blocks = []
    for dy in range(kh):
        b_dy = jnp.zeros((W * cin, W * cout), w_hwio.dtype)
        for dx in range(kw):
            sel = (wi == wo + dx - 1).astype(w_hwio.dtype)      # (W, W) dx shift matrix
            b_dy = b_dy + jnp.kron(sel, w_hwio[dy, dx])
        blocks.append(b_dy)
    return jnp.concatenate(blocks, axis=1)                      # (W*Cin, 3*W*Cout)


def basic_block_lane_dense(x2, params, *, N, H, W, C):
    """Fused BasicBlock on lane-dense activations: (N*H, W*C) -> (N*H, W*C).

    Chained BasicBlocks should call this directly so activations stay in the
    lane-dense layout between blocks (no per-block NCHW transposes).
    """
    NH, WC = N * H, W * C

    # Conv weights as a single banded bf16 operand per stage (biases omitted:
    # a per-channel bias before training-mode BN is cancelled by the mean).
    w1 = _band_weights_cat(params["w1"], W).astype(jnp.bfloat16)
    w2 = _band_weights_cat(params["w2"], W).astype(jnp.bfloat16)

    # BN affine params pre-tiled over w so the kernel stays in the WC-lane space.
    g1 = jnp.tile(params["g1"], W).reshape(1, WC).astype(jnp.float32)
    be1 = jnp.tile(params["be1"], W).reshape(1, WC).astype(jnp.float32)
    g2 = jnp.tile(params["g2"], W).reshape(1, WC).astype(jnp.float32)
    be2 = jnp.tile(params["be2"], W).reshape(1, WC).astype(jnp.float32)

    # Boundary masks for the dy = 0 / 2 rolls (zero rows that crossed an image edge).
    r = jnp.arange(NH)
    m_up = ((r % H) != 0).astype(jnp.float32).reshape(NH, 1)
    m_dn = ((r % H) != (H - 1)).astype(jnp.float32).reshape(NH, 1)

    # Scoped-VMEM budget sized to the actual resident buffers (+2x headroom).
    weight_bytes = 2 * (WC * 3 * WC * 2)                        # two bf16 banded weights
    act_bytes = 8 * (NH * WC * 4) + 2 * (NH * 3 * WC * 4)       # f32 activations / temps
    vmem_limit = int(max(8 * 1024 * 1024,
                         min(2 * (weight_bytes + act_bytes), 64 * 1024 * 1024)))

    vmem = pl.BlockSpec(memory_space=pltpu.MemorySpace.VMEM)
    return pl.pallas_call(
        _make_kernel(N, H, W, C),
        out_shape=jax.ShapeDtypeStruct((NH, WC), jnp.float32),
        in_specs=[vmem] * 9,
        out_specs=vmem,
        compiler_params=pltpu.CompilerParams(vmem_limit_bytes=vmem_limit),
    )(x2, w1, w2, g1, be1, g2, be2, m_up, m_dn)


def basic_block_forward(x_nchw, params):
    """BasicBlock forward, PyTorch NCHW in / NCHW out (single-block demo entry)."""
    N, C, H, W = x_nchw.shape
    x2 = jnp.transpose(x_nchw, (0, 2, 3, 1)).astype(jnp.float32).reshape(N * H, W * C)
    out2 = basic_block_lane_dense(x2, params, N=N, H=H, W=W, C=C)
    return jnp.transpose(out2.reshape(N, H, W, C), (0, 3, 1, 2))


# -------- pure-JAX reference (correctness check only; includes the conv bias to
#          demonstrate it is exactly cancelled by training-mode BN) -------------
def _ref_stage(x, w, b, g, be, res):
    y = jax.lax.conv_general_dilated(
        x, w, window_strides=(1, 1), padding="SAME",
        dimension_numbers=("NHWC", "HWIO", "NHWC")) + b
    m = jnp.mean(y, axis=(0, 1, 2), keepdims=True)
    v = jnp.mean((y - m) ** 2, axis=(0, 1, 2), keepdims=True)
    y = (y - m) * jax.lax.rsqrt(v + EPS) * g + be
    return jnp.maximum(y + res, 0.0)


def basic_block_reference(x_nchw, params):
    x = jnp.transpose(x_nchw, (0, 2, 3, 1)).astype(jnp.float32)
    h = _ref_stage(x, params["w1"], params["b1"], params["g1"], params["be1"],
                   jnp.zeros_like(x))
    o = _ref_stage(h, params["w2"], params["b2"], params["g2"], params["be2"], x)
    return jnp.transpose(o, (0, 3, 1, 2))


if __name__ == "__main__":
    num_filters = 64          # module default
    N, C, H, W = 2, num_filters, 8, 8

    key = jax.random.PRNGKey(0)
    k_x, k_w1, k_b1, k_w2, k_b2 = jax.random.split(key, 5)

    x = jax.random.normal(k_x, (N, C, H, W), jnp.float32)

    # Deterministic synthetic parameters (PyTorch BN init: gamma=1, beta=0).
    scale = 1.0 / (3.0 * jnp.sqrt(float(C)))
    params = {
        "w1": jax.random.normal(k_w1, (3, 3, C, C), jnp.float32) * scale,  # HWIO
        "b1": jax.random.normal(k_b1, (C,), jnp.float32) * 0.1,
        "g1": jnp.ones((C,), jnp.float32),
        "be1": jnp.zeros((C,), jnp.float32),
        "w2": jax.random.normal(k_w2, (3, 3, C, C), jnp.float32) * scale,
        "b2": jax.random.normal(k_b2, (C,), jnp.float32) * 0.1,
        "g2": jnp.ones((C,), jnp.float32),
        "be2": jnp.zeros((C,), jnp.float32),
    }

    out = jax.block_until_ready(jax.jit(basic_block_forward)(x, params))
    ref = jax.block_until_ready(basic_block_reference(x, params))

    assert out.shape == (N, C, H, W)
    max_err = float(jnp.max(jnp.abs(out - ref)))
    # bf16 matmul operands -> tolerance looser than pure-f32.
    assert jnp.allclose(out, ref, atol=5e-2, rtol=5e-2), f"max abs err = {max_err}"

    print("KERNEL_OK")
</pallas_src>

<mosaic_0001>
module attributes {stable_mosaic.version = 11 : i64} {
  func.func @kernel(%arg0: memref<16x512xf32, #tpu.memory_space<vmem>>, %arg1: memref<512x1536xbf16, #tpu.memory_space<vmem>>, %arg2: memref<512x1536xbf16, #tpu.memory_space<vmem>>, %arg3: memref<1x512xf32, #tpu.memory_space<vmem>>, %arg4: memref<1x512xf32, #tpu.memory_space<vmem>>, %arg5: memref<1x512xf32, #tpu.memory_space<vmem>>, %arg6: memref<1x512xf32, #tpu.memory_space<vmem>>, %arg7: memref<16x1xf32, #tpu.memory_space<vmem>>, %arg8: memref<16x1xf32, #tpu.memory_space<vmem>>, %arg9: memref<16x512xf32, #tpu.memory_space<vmem>>) attributes {dimension_semantics = [], scalar_prefetch = 0 : i64, scratch_operands = 0 : i64, tpu.core_type = #tpu.core_type<tc>} {
    %c0 = arith.constant 0 : index
    %c0_0 = arith.constant 0 : index
    %0 = vector.load %arg0[%c0, %c0_0] : memref<16x512xf32, #tpu.memory_space<vmem>>, vector<16x512xf32>
    %c0_1 = arith.constant 0 : index
    %c0_2 = arith.constant 0 : index
    %1 = vector.load %arg7[%c0_1, %c0_2] : memref<16x1xf32, #tpu.memory_space<vmem>>, vector<16x1xf32>
    %c0_3 = arith.constant 0 : index
    %c0_4 = arith.constant 0 : index
    %2 = vector.load %arg8[%c0_3, %c0_4] : memref<16x1xf32, #tpu.memory_space<vmem>>, vector<16x1xf32>
    %3 = arith.truncf %0 : vector<16x512xf32> to vector<16x512xbf16>
    %c0_5 = arith.constant 0 : index
    %c0_6 = arith.constant 0 : index
    %4 = vector.load %arg3[%c0_5, %c0_6] : memref<1x512xf32, #tpu.memory_space<vmem>>, vector<1x512xf32>
    %c0_7 = arith.constant 0 : index
    %c0_8 = arith.constant 0 : index
    %5 = vector.load %arg4[%c0_7, %c0_8] : memref<1x512xf32, #tpu.memory_space<vmem>>, vector<1x512xf32>
    %c0_9 = arith.constant 0 : index
    %c0_10 = arith.constant 0 : index
    %6 = vector.load %arg1[%c0_9, %c0_10] : memref<512x1536xbf16, #tpu.memory_space<vmem>>, vector<512x1536xbf16>
    %cst = arith.constant dense<0.000000e+00> : vector<16x1536xf32>
    %7 = tpu.matmul %3, %6, %cst {dimension_numbers = #tpu.dot_dimension_numbers<[1], [0], [0], [1], [0, 0, 1, 1], [], []>} : vector<16x512xbf16>, vector<512x1536xbf16>, vector<16x1536xf32> -> vector<16x1536xf32>
    %8 = vector.extract_strided_slice %7 {offsets = [0, 0], sizes = [16, 512], strides = [1, 1]} : vector<16x1536xf32> to vector<16x512xf32>
    %9 = vector.extract_strided_slice %7 {offsets = [0, 512], sizes = [16, 512], strides = [1, 1]} : vector<16x1536xf32> to vector<16x512xf32>
    %10 = vector.extract_strided_slice %7 {offsets = [0, 1024], sizes = [16, 512], strides = [1, 1]} : vector<16x1536xf32> to vector<16x512xf32>
    %c1_i32 = arith.constant 1 : i32
    %11 = tpu.dynamic_rotate %8 by %c1_i32 dim 0 : vector<16x512xf32>, i32 -> vector<16x512xf32>
    %12 = vector.broadcast %1 : vector<16x1xf32> to vector<16x512xf32>
    %13 = arith.mulf %11, %12 : vector<16x512xf32>
    %14 = arith.addf %9, %13 : vector<16x512xf32>
    %c15_i32 = arith.constant 15 : i32
    %15 = tpu.dynamic_rotate %10 by %c15_i32 dim 0 : vector<16x512xf32>, i32 -> vector<16x512xf32>
    %16 = vector.broadcast %2 : vector<16x1xf32> to vector<16x512xf32>
    %17 = arith.mulf %15, %16 : vector<16x512xf32>
    %18 = arith.addf %14, %17 : vector<16x512xf32>
    %c64_i32 = arith.constant 64 : i32
    %19 = tpu.dynamic_rotate %18 by %c64_i32 dim 1 : vector<16x512xf32>, i32 -> vector<16x512xf32>
    %20 = arith.addf %18, %19 : vector<16x512xf32>
    %c128_i32 = arith.constant 128 : i32
    %21 = tpu.dynamic_rotate %20 by %c128_i32 dim 1 : vector<16x512xf32>, i32 -> vector<16x512xf32>
    %22 = arith.addf %20, %21 : vector<16x512xf32>
    %c256_i32 = arith.constant 256 : i32
    %23 = tpu.dynamic_rotate %22 by %c256_i32 dim 1 : vector<16x512xf32>, i32 -> vector<16x512xf32>
    %24 = arith.addf %22, %23 : vector<16x512xf32>
    %cst_11 = arith.constant dense<0.000000e+00> : vector<512xf32>
    %25 = vector.multi_reduction <add>, %24, %cst_11 [0] : vector<16x512xf32> to vector<512xf32>
    %26 = vector.shape_cast %25 : vector<512xf32> to vector<1x512xf32>
    %cst_12 = arith.constant 7.812500e-03 : f32
    %27 = vector.broadcast %cst_12 : f32 to vector<1x512xf32>
    %28 = arith.mulf %26, %27 : vector<1x512xf32>
    %29 = vector.broadcast %28 : vector<1x512xf32> to vector<16x512xf32>
    %30 = arith.subf %18, %29 : vector<16x512xf32>
    %31 = arith.mulf %30, %30 : vector<16x512xf32>
    %c64_i32_13 = arith.constant 64 : i32
    %32 = tpu.dynamic_rotate %31 by %c64_i32_13 dim 1 : vector<16x512xf32>, i32 -> vector<16x512xf32>
    %33 = arith.addf %31, %32 : vector<16x512xf32>
    %c128_i32_14 = arith.constant 128 : i32
    %34 = tpu.dynamic_rotate %33 by %c128_i32_14 dim 1 : vector<16x512xf32>, i32 -> vector<16x512xf32>
    %35 = arith.addf %33, %34 : vector<16x512xf32>
    %c256_i32_15 = arith.constant 256 : i32
    %36 = tpu.dynamic_rotate %35 by %c256_i32_15 dim 1 : vector<16x512xf32>, i32 -> vector<16x512xf32>
    %37 = arith.addf %35, %36 : vector<16x512xf32>
    %cst_16 = arith.constant dense<0.000000e+00> : vector<512xf32>
    %38 = vector.multi_reduction <add>, %37, %cst_16 [0] : vector<16x512xf32> to vector<512xf32>
    %39 = vector.shape_cast %38 : vector<512xf32> to vector<1x512xf32>
    %cst_17 = arith.constant 7.812500e-03 : f32
    %40 = vector.broadcast %cst_17 : f32 to vector<1x512xf32>
    %41 = arith.mulf %39, %40 : vector<1x512xf32>
    %cst_18 = arith.constant 9.99999974E-6 : f32
    %42 = vector.broadcast %cst_18 : f32 to vector<1x512xf32>
    %43 = arith.addf %41, %42 : vector<1x512xf32>
    %44 = math.rsqrt %43 : vector<1x512xf32>
    %45 = arith.mulf %4, %44 : vector<1x512xf32>
    %46 = vector.broadcast %45 : vector<1x512xf32> to vector<16x512xf32>
    %47 = arith.mulf %30, %46 : vector<16x512xf32>
    %48 = vector.broadcast %5 : vector<1x512xf32> to vector<16x512xf32>
    %49 = arith.addf %47, %48 : vector<16x512xf32>
    %cst_19 = arith.constant 0.000000e+00 : f32
    %50 = vector.broadcast %cst_19 : f32 to vector<16x512xf32>
    %51 = arith.maximumf %49, %50 : vector<16x512xf32>
    %52 = arith.truncf %51 : vector<16x512xf32> to vector<16x512xbf16>
    %c0_20 = arith.constant 0 : index
    %c0_21 = arith.constant 0 : index
    %53 = vector.load %arg5[%c0_20, %c0_21] : memref<1x512xf32, #tpu.memory_space<vmem>>, vector<1x512xf32>
    %c0_22 = arith.constant 0 : index
    %c0_23 = arith.constant 0 : index
    %54 = vector.load %arg6[%c0_22, %c0_23] : memref<1x512xf32, #tpu.memory_space<vmem>>, vector<1x512xf32>
    %c0_24 = arith.constant 0 : index
    %c0_25 = arith.constant 0 : index
    %55 = vector.load %arg2[%c0_24, %c0_25] : memref<512x1536xbf16, #tpu.memory_space<vmem>>, vector<512x1536xbf16>
    %cst_26 = arith.constant dense<0.000000e+00> : vector<16x1536xf32>
    %56 = tpu.matmul %52, %55, %cst_26 {dimension_numbers = #tpu.dot_dimension_numbers<[1], [0], [0], [1], [0, 0, 1, 1], [], []>} : vector<16x512xbf16>, vector<512x1536xbf16>, vector<16x1536xf32> -> vector<16x1536xf32>
    %57 = vector.extract_strided_slice %56 {offsets = [0, 0], sizes = [16, 512], strides = [1, 1]} : vector<16x1536xf32> to vector<16x512xf32>
    %58 = vector.extract_strided_slice %56 {offsets = [0, 512], sizes = [16, 512], strides = [1, 1]} : vector<16x1536xf32> to vector<16x512xf32>
    %59 = vector.extract_strided_slice %56 {offsets = [0, 1024], sizes = [16, 512], strides = [1, 1]} : vector<16x1536xf32> to vector<16x512xf32>
    %c1_i32_27 = arith.constant 1 : i32
    %60 = tpu.dynamic_rotate %57 by %c1_i32_27 dim 0 : vector<16x512xf32>, i32 -> vector<16x512xf32>
    %61 = vector.broadcast %1 : vector<16x1xf32> to vector<16x512xf32>
    %62 = arith.mulf %60, %61 : vector<16x512xf32>
    %63 = arith.addf %58, %62 : vector<16x512xf32>
    %c15_i32_28 = arith.constant 15 : i32
    %64 = tpu.dynamic_rotate %59 by %c15_i32_28 dim 0 : vector<16x512xf32>, i32 -> vector<16x512xf32>
    %65 = vector.broadcast %2 : vector<16x1xf32> to vector<16x512xf32>
    %66 = arith.mulf %64, %65 : vector<16x512xf32>
    %67 = arith.addf %63, %66 : vector<16x512xf32>
    %c64_i32_29 = arith.constant 64 : i32
    %68 = tpu.dynamic_rotate %67 by %c64_i32_29 dim 1 : vector<16x512xf32>, i32 -> vector<16x512xf32>
    %69 = arith.addf %67, %68 : vector<16x512xf32>
    %c128_i32_30 = arith.constant 128 : i32
    %70 = tpu.dynamic_rotate %69 by %c128_i32_30 dim 1 : vector<16x512xf32>, i32 -> vector<16x512xf32>
    %71 = arith.addf %69, %70 : vector<16x512xf32>
    %c256_i32_31 = arith.constant 256 : i32
    %72 = tpu.dynamic_rotate %71 by %c256_i32_31 dim 1 : vector<16x512xf32>, i32 -> vector<16x512xf32>
    %73 = arith.addf %71, %72 : vector<16x512xf32>
    %cst_32 = arith.constant dense<0.000000e+00> : vector<512xf32>
    %74 = vector.multi_reduction <add>, %73, %cst_32 [0] : vector<16x512xf32> to vector<512xf32>
    %75 = vector.shape_cast %74 : vector<512xf32> to vector<1x512xf32>
    %cst_33 = arith.constant 7.812500e-03 : f32
    %76 = vector.broadcast %cst_33 : f32 to vector<1x512xf32>
    %77 = arith.mulf %75, %76 : vector<1x512xf32>
    %78 = vector.broadcast %77 : vector<1x512xf32> to vector<16x512xf32>
    %79 = arith.subf %67, %78 : vector<16x512xf32>
    %80 = arith.mulf %79, %79 : vector<16x512xf32>
    %c64_i32_34 = arith.constant 64 : i32
    %81 = tpu.dynamic_rotate %80 by %c64_i32_34 dim 1 : vector<16x512xf32>, i32 -> vector<16x512xf32>
    %82 = arith.addf %80, %81 : vector<16x512xf32>
    %c128_i32_35 = arith.constant 128 : i32
    %83 = tpu.dynamic_rotate %82 by %c128_i32_35 dim 1 : vector<16x512xf32>, i32 -> vector<16x512xf32>
    %84 = arith.addf %82, %83 : vector<16x512xf32>
    %c256_i32_36 = arith.constant 256 : i32
    %85 = tpu.dynamic_rotate %84 by %c256_i32_36 dim 1 : vector<16x512xf32>, i32 -> vector<16x512xf32>
    %86 = arith.addf %84, %85 : vector<16x512xf32>
    %cst_37 = arith.constant dense<0.000000e+00> : vector<512xf32>
    %87 = vector.multi_reduction <add>, %86, %cst_37 [0] : vector<16x512xf32> to vector<512xf32>
    %88 = vector.shape_cast %87 : vector<512xf32> to vector<1x512xf32>
    %cst_38 = arith.constant 7.812500e-03 : f32
    %89 = vector.broadcast %cst_38 : f32 to vector<1x512xf32>
    %90 = arith.mulf %88, %89 : vector<1x512xf32>
    %cst_39 = arith.constant 9.99999974E-6 : f32
    %91 = vector.broadcast %cst_39 : f32 to vector<1x512xf32>
    %92 = arith.addf %90, %91 : vector<1x512xf32>
    %93 = math.rsqrt %92 : vector<1x512xf32>
    %94 = arith.mulf %53, %93 : vector<1x512xf32>
    %95 = vector.broadcast %94 : vector<1x512xf32> to vector<16x512xf32>
    %96 = arith.mulf %79, %95 : vector<16x512xf32>
    %97 = vector.broadcast %54 : vector<1x512xf32> to vector<16x512xf32>
    %98 = arith.addf %96, %97 : vector<16x512xf32>
    %99 = arith.addf %98, %0 : vector<16x512xf32>
    %cst_40 = arith.constant 0.000000e+00 : f32
    %100 = vector.broadcast %cst_40 : f32 to vector<16x512xf32>
    %101 = arith.maximumf %99, %100 : vector<16x512xf32>
    %c0_41 = arith.constant 0 : index
    %c0_42 = arith.constant 0 : index
    %102 = vector.load %arg9[%c0_41, %c0_42] : memref<16x512xf32, #tpu.memory_space<vmem>>, vector<16x512xf32>
    tpu.vector_store %arg9[%c0_41, %c0_42], %101 {strides = array<i32>} : memref<16x512xf32, #tpu.memory_space<vmem>>, vector<16x512xf32>,
    return
  }
}

</mosaic_0001>

<bundles_post_ra>
// kernel: tile.23
= control target key start
LH: loop header
LB: loop body
LE: loop exit
PB: predicated region body
PF: predicated region fallthrough
CT: control target
= control target key end

     0   :  { %s22_s0 = inlined_call_operand.vmem [shape: f32[64], index: 0, kind: input, shape index: {}]   ;;  %s23_s1 = inlined_call_operand.vmem [shape: f32[8,64], index: 1, kind: output, shape index: {}]  }
   0x1   :  { %v4_v0 = vld [vmem:[%s22_s0] ss:$0 sm:$0xff] }
   0x2   :  { %5 = vst [vmem:[%s23_s1] sm:$0xff] %v4_v0 }

// kernel: tile.24
= control target key start
LH: loop header
LB: loop body
LE: loop exit
PB: predicated region body
PF: predicated region fallthrough
CT: control target
= control target key end

     0   :  { %vm3_vm0 = vcmask 523264   ;;  %s46_s8 = smov 64   ;;  %vm9_vm1 = vcmask 1048064   ;;  %s75_s0 = inlined_call_operand.vmem [shape: f32[8,64], index: 0, kind: input, shape index: {}]   ;;  %s76_s1 = inlined_call_operand.vmem [shape: f32[1,512], index: 1, kind: output, shape index: {}]  }
   0x1   :  { %v41_v0 = vld [vmem:[%s75_s0 + $0x1] ss:$2 sm:$0xf]   ;;  %v2_v1 = vld [vmem:[%s75_s0] ss:$2 sm:$0xf]  }
   0x2   :  { %7 = vrot.lane.b32.xlu0 %v41_v0, %s46_s8  ;;  %4 = vst.msk [vmem:[#allocation0] ss:$8 sm:$0xf] %vm3_vm0, %v2_v1  }
  0x74   :  { %v8_v2 = vpop.permute.xlu0 %7  }
  0x75   :  { %10 = vst.msk [vmem:[#allocation0] ss:$8 sm:$0xf] %vm9_vm1, %v8_v2  }
  0x7c   :  { %v15_v3 = vld [vmem:[#allocation0] sm:$0x1]  ;;  %v20_v4 = vld [vmem:[#allocation0 + $0x8] sm:$0x1]  ;;  %v26_v5 = vld [vmem:[#allocation0 + $0x10] sm:$0x1] }
  0x7d   :  { %18 = vst [vmem:[%s76_s1] sm:$0x1] %v15_v3  ;;  %42 = vst [vmem:[%s76_s1 + $0x1] sm:$0x1] %v20_v4  ;;  %v33_v6 = vld [vmem:[#allocation0 + $0x18] sm:$0x1] }
  0x7e   :  { %43 = vst [vmem:[%s76_s1 + $0x2] sm:$0x1] %v26_v5  ;;  %44 = vst [vmem:[%s76_s1 + $0x3] sm:$0x1] %v33_v6 }

// kernel: basic_block_forward.1
= control target key start
LH: loop header
LB: loop body
LE: loop exit
PB: predicated region body
PF: predicated region fallthrough
CT: control target
= control target key end

     0   :  { %v8264_v14 = vmov 0   ;;  %s11316_s1 = inlined_call_operand.vmem [shape: bf16[512,1536], index: 1, kind: input, shape index: {}]   ;;  %s11317_s0 = inlined_call_operand.vmem [shape: f32[16,512], index: 0, kind: input, shape index: {}]   ;;  %s11318_s7 = inlined_call_operand.vmem [shape: f32[16,1], index: 7, kind: input, shape index: {}]   ;;  %s11319_s8 = inlined_call_operand.vmem [shape: f32[16,1], index: 8, kind: input, shape index: {}]   ;;  %s11320_s2 = inlined_call_operand.vmem [shape: bf16[512,1536], index: 2, kind: input, shape index: {}]   ;;  %s11321_s3 = inlined_call_operand.vmem [shape: f32[1,512], index: 3, kind: input, shape index: {}]   ;;  %s11322_s4 = inlined_call_operand.vmem [shape: f32[1,512], index: 4, kind: input, shape index: {}]   ;;  %s11323_s5 = inlined_call_operand.vmem [shape: f32[1,512], index: 5, kind: input, shape index: {}]   ;;  %s11324_s6 = inlined_call_operand.vmem [shape: f32[1,512], index: 6, kind: input, shape index: {}]   ;;  %s11325_s9 = inlined_call_operand.vmem [shape: f32[16,512], index: 9, kind: output, shape index: {}]  }
   0x1   :  { %v7096_v0 = vld [vmem:[%s11316_s1 + $0x2a4] ss:$48 sps:$4 sm:$0xff]   ;;  %v7100_v2 = vld [vmem:[%s11316_s1 + $0x2a0] ss:$48 sps:$4 sm:$0xff]   ;;  %7094 = vset.pattern.permute.xlu0 %v8264_v14  ;;  %7095 = vset.pattern.permute.xlu1 %v8264_v14  ;;  %v33_v47 = vld [vmem:[%s11317_s0 + $0x8] sm:$0xff] }
   0x2   :  { %v7098_v1 = vld [vmem:[%s11316_s1 + $0x8a4] ss:$48 sps:$4 sm:$0xff]   ;;  %2354 = vmatprep.subr.bf16.mxu0 %v7096_v0  ;;  %v7101_v3 = vld [vmem:[%s11316_s1 + $0x8a0] ss:$48 sps:$4 sm:$0xff]   ;;  %v37_v48 = vld [vmem:[%s11317_s0 + $0x28] sm:$0xff] }
   0x3   :  { %2397 = vmatprep.subr.bf16.mxu1 %v7098_v1  ;;  %v7102_v4 = vld [vmem:[%s11316_s1 + $0x244] ss:$48 sps:$4 sm:$0xff]   ;;  %2355 = vmatpush1.bf16.msra.mxu0 %v7100_v2  ;;  %v7106_v6 = vld [vmem:[%s11316_s1 + $0x240] ss:$48 sps:$4 sm:$0xff]   ;;  %v35_v49 = vld [vmem:[%s11317_s0 + $0x18] sm:$0xff]  ;;  %v8476_v54 = vpack.c.bf16 %v37_v48, %v33_v47 }
   0x4   :  { %2398 = vmatpush1.bf16.msra.mxu1 %v7101_v3  ;;  %v7104_v5 = vld [vmem:[%s11316_s1 + $0x844] ss:$48 sps:$4 sm:$0xff]   ;;  %2356 = vmatprep.subr.bf16.mxu0 %v7102_v4  ;;  %v7107_v7 = vld [vmem:[%s11316_s1 + $0x840] ss:$48 sps:$4 sm:$0xff]   ;;  %v39_v50 = vld [vmem:[%s11317_s0 + $0x38] sm:$0xff] }
   0x5   :  { %2399 = vmatprep.subr.bf16.mxu1 %v7104_v5  ;;  %v7108_v8 = vld [vmem:[%s11316_s1 + $0x1e4] ss:$48 sps:$4 sm:$0xff]   ;;  %v7112_v10 = vld [vmem:[%s11316_s1 + $0x1e0] ss:$48 sps:$4 sm:$0xff]   ;;  %v8478_v55 = vpack.c.bf16 %v39_v50, %v35_v49  ;;  %2386 = vmatprep.mubr.bf16.mxu0 %v8476_v54  ;;  %v7240_v47 = vld [vmem:[%s11316_s1 + $0x5a8] ss:$48 sps:$4 sm:$0xff]  }
   0x6   :  { %v7110_v9 = vld [vmem:[%s11316_s1 + $0x7e4] ss:$48 sps:$4 sm:$0xff]   ;;  %v7113_v11 = vld [vmem:[%s11316_s1 + $0x7e0] ss:$48 sps:$4 sm:$0xff]   ;;  %v7243_v48 = vld [vmem:[%s11316_s1 + $0xba8] ss:$48 sps:$4 sm:$0xff]  }
   0x7   :  { %2357 = vmatpush1.bf16.msra.mxu0 %v7106_v6  ;;  %v7114_v12 = vld [vmem:[%s11316_s1 + $0x184] ss:$48 sps:$4 sm:$0xff]   ;;  %v7118_v15 = vld [vmem:[%s11316_s1 + $0x180] ss:$48 sps:$4 sm:$0xff]   ;;  %2429 = vmatprep.mubr.bf16.mxu1 %v8478_v55  ;;  %v7248_v50 = vld [vmem:[%s11316_s1 + $0x54c] ss:$48 sps:$4 sm:$0xff]  }
   0x8   :  { %2400 = vmatpush1.bf16.msra.mxu1 %v7107_v7  ;;  %2358 = vmatprep.subr.bf16.mxu0 %v7108_v8  ;;  %v7116_v13 = vld [vmem:[%s11316_s1 + $0x784] ss:$48 sps:$4 sm:$0xff]   ;;  %v7119_v16 = vld [vmem:[%s11316_s1 + $0x780] ss:$48 sps:$4 sm:$0xff]  }
   0x9   :  { %2401 = vmatprep.subr.bf16.mxu1 %v7110_v9  ;;  %v7120_v17 = vld [vmem:[%s11316_s1 + $0x124] ss:$48 sps:$4 sm:$0xff]   ;;  %v7124_v19 = vld [vmem:[%s11316_s1 + $0x120] ss:$48 sps:$4 sm:$0xff]  }
   0xa   :  { %v7122_v18 = vld [vmem:[%s11316_s1 + $0x724] ss:$48 sps:$4 sm:$0xff]   ;;  %v7125_v20 = vld [vmem:[%s11316_s1 + $0x720] ss:$48 sps:$4 sm:$0xff]  }
   0xb   :  { %2359 = vmatpush1.bf16.msra.mxu0 %v7112_v10  ;;  %v7126_v21 = vld [vmem:[%s11316_s1 + $0xc4] ss:$48 sps:$4 sm:$0xff]   ;;  %v7130_v23 = vld [vmem:[%s11316_s1 + $0xc0] ss:$48 sps:$4 sm:$0xff]  }
   0xc   :  { %2402 = vmatpush1.bf16.msra.mxu1 %v7113_v11  ;;  %2360 = vmatprep.subr.bf16.mxu0 %v7114_v12  ;;  %v7128_v22 = vld [vmem:[%s11316_s1 + $0x6c4] ss:$48 sps:$4 sm:$0xff]   ;;  %v7131_v24 = vld [vmem:[%s11316_s1 + $0x6c0] ss:$48 sps:$4 sm:$0xff]   ;;  %v7194_v11 = vld [vmem:[%s11316_s1 + $0x2ac] ss:$48 sps:$4 sm:$0xff]  }
   0xd   :  { %2403 = vmatprep.subr.bf16.mxu1 %v7116_v13  ;;  %v7132_v25 = vld [vmem:[%s11316_s1 + $0x64] ss:$48 sps:$4 sm:$0xff]   ;;  %v7136_v27 = vld [vmem:[%s11316_s1 + $0x60] ss:$48 sps:$4 sm:$0xff]   ;;  %v7197_v12 = vld [vmem:[%s11316_s1 + $0x8ac] ss:$48 sps:$4 sm:$0xff]  }
   0xe   :  { %v7134_v26 = vld [vmem:[%s11316_s1 + $0x664] ss:$48 sps:$4 sm:$0xff]   ;;  %v7137_v28 = vld [vmem:[%s11316_s1 + $0x660] ss:$48 sps:$4 sm:$0xff]  }
   0xf   :  { %2361 = vmatpush1.bf16.msra.mxu0 %v7118_v15  ;;  %v7138_v29 = vld [vmem:[%s11316_s1 + $0x4] ss:$48 sps:$4 sm:$0xff]   ;;  %v7142_v31 = vld [vmem:[%s11316_s1] ss:$48 sps:$4 sm:$0xff]   ;;  %v7192_v15 = vld [vmem:[%s11316_s1 + $0x2a8] ss:$48 sps:$4 sm:$0xff]  }
  0x10   :  { %2404 = vmatpush1.bf16.msra.mxu1 %v7119_v16  ;;  %2362 = vmatprep.subr.bf16.mxu0 %v7120_v17  ;;  %v7140_v30 = vld [vmem:[%s11316_s1 + $0x604] ss:$48 sps:$4 sm:$0xff]   ;;  %v7143_v32 = vld [vmem:[%s11316_s1 + $0x600] ss:$48 sps:$4 sm:$0xff]   ;;  %v7195_v16 = vld [vmem:[%s11316_s1 + $0x8a8] ss:$48 sps:$4 sm:$0xff]  }
  0x11   :  { %2405 = vmatprep.subr.bf16.mxu1 %v7122_v18  ;;  %v7144_v33 = vld [vmem:[%s11316_s1 + $0x5a4] ss:$48 sps:$4 sm:$0xff]   ;;  %v7148_v35 = vld [vmem:[%s11316_s1 + $0x5a0] ss:$48 sps:$4 sm:$0xff]   ;;  %v7200_v17 = vld [vmem:[%s11316_s1 + $0x24c] ss:$48 sps:$4 sm:$0xff]  }
  0x12   :  { %v7146_v34 = vld [vmem:[%s11316_s1 + $0xba4] ss:$48 sps:$4 sm:$0xff]   ;;  %v7149_v36 = vld [vmem:[%s11316_s1 + $0xba0] ss:$48 sps:$4 sm:$0xff]   ;;  %v7203_v18 = vld [vmem:[%s11316_s1 + $0x84c] ss:$48 sps:$4 sm:$0xff]  }
  0x13   :  { %2363 = vmatpush1.bf16.msra.mxu0 %v7124_v19  ;;  %v7150_v37 = vld [vmem:[%s11316_s1 + $0x544] ss:$48 sps:$4 sm:$0xff]   ;;  %v7154_v39 = vld [vmem:[%s11316_s1 + $0x540] ss:$48 sps:$4 sm:$0xff]   ;;  %v7198_v19 = vld [vmem:[%s11316_s1 + $0x248] ss:$48 sps:$4 sm:$0xff]  }
  0x14   :  { %2406 = vmatpush1.bf16.msra.mxu1 %v7125_v20  ;;  %2364 = vmatprep.subr.bf16.mxu0 %v7126_v21  ;;  %v7152_v38 = vld [vmem:[%s11316_s1 + $0xb44] ss:$48 sps:$4 sm:$0xff]   ;;  %v7155_v40 = vld [vmem:[%s11316_s1 + $0xb40] ss:$48 sps:$4 sm:$0xff]   ;;  %v7201_v20 = vld [vmem:[%s11316_s1 + $0x848] ss:$48 sps:$4 sm:$0xff]  }
  0x15   :  { %2407 = vmatprep.subr.bf16.mxu1 %v7128_v22  ;;  %v7156_v41 = vld [vmem:[%s11316_s1 + $0x4e4] ss:$48 sps:$4 sm:$0xff]   ;;  %v7160_v43 = vld [vmem:[%s11316_s1 + $0x4e0] ss:$48 sps:$4 sm:$0xff]   ;;  %v7206_v21 = vld [vmem:[%s11316_s1 + $0x1ec] ss:$48 sps:$4 sm:$0xff]  }
  0x16   :  { %v7158_v42 = vld [vmem:[%s11316_s1 + $0xae4] ss:$48 sps:$4 sm:$0xff]   ;;  %v7161_v44 = vld [vmem:[%s11316_s1 + $0xae0] ss:$48 sps:$4 sm:$0xff]   ;;  %v7209_v22 = vld [vmem:[%s11316_s1 + $0x7ec] ss:$48 sps:$4 sm:$0xff]  }
  0x17   :  { %2365 = vmatpush1.bf16.msra.mxu0 %v7130_v23  ;;  %v7162_v45 = vld [vmem:[%s11316_s1 + $0x484] ss:$48 sps:$4 sm:$0xff]   ;;  %v7166_v51 = vld [vmem:[%s11316_s1 + $0x480] ss:$48 sps:$4 sm:$0xff]   ;;  %v7204_v23 = vld [vmem:[%s11316_s1 + $0x1e8] ss:$48 sps:$4 sm:$0xff]  }
  0x18   :  { %2408 = vmatpush1.bf16.msra.mxu1 %v7131_v24  ;;  %2366 = vmatprep.subr.bf16.mxu0 %v7132_v25  ;;  %v7164_v46 = vld [vmem:[%s11316_s1 + $0xa84] ss:$48 sps:$4 sm:$0xff]   ;;  %v7167_v52 = vld [vmem:[%s11316_s1 + $0xa80] ss:$48 sps:$4 sm:$0xff]   ;;  %v7207_v24 = vld [vmem:[%s11316_s1 + $0x7e8] ss:$48 sps:$4 sm:$0xff]  }
  0x19   :  { %2409 = vmatprep.subr.bf16.mxu1 %v7134_v26  ;;  %v7168_v53 = vld [vmem:[%s11316_s1 + $0x424] ss:$48 sps:$4 sm:$0xff]   ;;  %v7172_v57 = vld [vmem:[%s11316_s1 + $0x420] ss:$48 sps:$4 sm:$0xff]   ;;  %v7212_v25 = vld [vmem:[%s11316_s1 + $0x18c] ss:$48 sps:$4 sm:$0xff]  }
  0x1a   :  { %v7170_v56 = vld [vmem:[%s11316_s1 + $0xa24] ss:$48 sps:$4 sm:$0xff]   ;;  %v7173_v58 = vld [vmem:[%s11316_s1 + $0xa20] ss:$48 sps:$4 sm:$0xff]   ;;  %v7215_v26 = vld [vmem:[%s11316_s1 + $0x78c] ss:$48 sps:$4 sm:$0xff]  }
  0x1b   :  { %2367 = vmatpush1.bf16.msra.mxu0 %v7136_v27  ;;  %v7174_v59 = vld [vmem:[%s11316_s1 + $0x3c4] ss:$48 sps:$4 sm:$0xff]   ;;  %v7178_v61 = vld [vmem:[%s11316_s1 + $0x3c0] ss:$48 sps:$4 sm:$0xff]   ;;  %v7210_v27 = vld [vmem:[%s11316_s1 + $0x188] ss:$48 sps:$4 sm:$0xff]  }
  0x1c   :  { %2410 = vmatpush1.bf16.msra.mxu1 %v7137_v28  ;;  %2368 = vmatprep.subr.bf16.mxu0 %v7138_v29  ;;  %v7176_v60 = vld [vmem:[%s11316_s1 + $0x9c4] ss:$48 sps:$4 sm:$0xff]   ;;  %v7179_v62 = vld [vmem:[%s11316_s1 + $0x9c0] ss:$48 sps:$4 sm:$0xff]   ;;  %v7213_v28 = vld [vmem:[%s11316_s1 + $0x788] ss:$48 sps:$4 sm:$0xff]  }
  0x1d   :  { %2411 = vmatprep.subr.bf16.mxu1 %v7140_v30  ;;  %v7180_v63 = vld [vmem:[%s11316_s1 + $0x364] ss:$48 sps:$4 sm:$0xff]   ;;  %v7184_v1 = vld [vmem:[%s11316_s1 + $0x360] ss:$48 sps:$4 sm:$0xff]   ;;  %v7218_v29 = vld [vmem:[%s11316_s1 + $0x12c] ss:$48 sps:$4 sm:$0xff]  }
  0x1e   :  { %v7182_v0 = vld [vmem:[%s11316_s1 + $0x964] ss:$48 sps:$4 sm:$0xff]   ;;  %v7185_v2 = vld [vmem:[%s11316_s1 + $0x960] ss:$48 sps:$4 sm:$0xff]   ;;  %v7221_v30 = vld [vmem:[%s11316_s1 + $0x72c] ss:$48 sps:$4 sm:$0xff]  }
  0x1f   :  { %2369 = vmatpush1.bf16.msra.mxu0 %v7142_v31  ;;  %v7186_v3 = vld [vmem:[%s11316_s1 + $0x304] ss:$48 sps:$4 sm:$0xff]   ;;  %v7190_v5 = vld [vmem:[%s11316_s1 + $0x300] ss:$48 sps:$4 sm:$0xff]   ;;  %v7216_v31 = vld [vmem:[%s11316_s1 + $0x128] ss:$48 sps:$4 sm:$0xff]  }
  0x20   :  { %2412 = vmatpush1.bf16.msra.mxu1 %v7143_v32  ;;  %2370 = vmatprep.subr.bf16.mxu0 %v7144_v33  ;;  %v7188_v4 = vld [vmem:[%s11316_s1 + $0x904] ss:$48 sps:$4 sm:$0xff]   ;;  %v7191_v6 = vld [vmem:[%s11316_s1 + $0x900] ss:$48 sps:$4 sm:$0xff]   ;;  %v7219_v32 = vld [vmem:[%s11316_s1 + $0x728] ss:$48 sps:$4 sm:$0xff]  }
  0x21   :  { %2413 = vmatprep.subr.bf16.mxu1 %v7146_v34  ;;  %v32_v7 = vld [vmem:[%s11317_s0] sm:$0xff]  ;;  %v34_v9 = vld [vmem:[%s11317_s0 + $0x10] sm:$0xff]  ;;  %v7224_v33 = vld [vmem:[%s11316_s1 + $0xcc] ss:$48 sps:$4 sm:$0xff]  }
  0x22   :  { %v36_v8 = vld [vmem:[%s11317_s0 + $0x20] sm:$0xff]  ;;  %v38_v10 = vld [vmem:[%s11317_s0 + $0x30] sm:$0xff]  ;;  %v7227_v34 = vld [vmem:[%s11316_s1 + $0x6cc] ss:$48 sps:$4 sm:$0xff]  }
  0x23   :  { %2371 = vmatpush2.bf16.msra.mxu0 %v7148_v35  ;;  %v8545_v13 = vpack.c.bf16 %v36_v8, %v32_v7  ;;  %v8547_v14 = vpack.c.bf16 %v38_v10, %v34_v9  ;;  %v7222_v35 = vld [vmem:[%s11316_s1 + $0xc8] ss:$48 sps:$4 sm:$0xff]   ;;  %v40_v49 = vld [vmem:[%s11318_s7] sm:$0xff]  ;;  %v7278_v9 = vld [vmem:[%s11316_s1 + $0x36c] ss:$48 sps:$4 sm:$0xff]  }
  0x24   :  { %2414 = vmatpush2.bf16.msra.mxu1 %v7149_v36  ;;  %2372 = vmatprep.subr.bf16.mxu0 %v7150_v37  ;;  %v7225_v36 = vld [vmem:[%s11316_s1 + $0x6c8] ss:$48 sps:$4 sm:$0xff]   ;;  %v7230_v37 = vld [vmem:[%s11316_s1 + $0x6c] ss:$48 sps:$4 sm:$0xff]  }
  0x25   :  { %2415 = vmatprep.subr.bf16.mxu1 %v7152_v38  ;;  %v7233_v38 = vld [vmem:[%s11316_s1 + $0x66c] ss:$48 sps:$4 sm:$0xff]   ;;  %2891 = vperm.xlu0 %7094, %v40_v49   ;;  %v7270_v7 = vld [vmem:[%s11316_s1 + $0x3c8] ss:$48 sps:$4 sm:$0xff]   ;;  %v7330_v49 = vld [vmem:[%s11316_s1 + $0x10] ss:$48 sps:$4 sm:$0xff]  }
  0x26   :  { %v7273_v8 = vld [vmem:[%s11316_s1 + $0x9c8] ss:$48 sps:$4 sm:$0xff]   ;;  %v7281_v10 = vld [vmem:[%s11316_s1 + $0x96c] ss:$48 sps:$4 sm:$0xff]  }
  0x27   :  { %2373 = vmatpush2.bf16.msra.mxu0 %v7154_v39  ;;  %v7228_v39 = vld [vmem:[%s11316_s1 + $0x68] ss:$48 sps:$4 sm:$0xff]  }
  0x28   :  { %2416 = vmatpush2.bf16.msra.mxu1 %v7155_v40  ;;  %2374 = vmatprep.subr.bf16.mxu0 %v7156_v41  ;;  %v7231_v40 = vld [vmem:[%s11316_s1 + $0x668] ss:$48 sps:$4 sm:$0xff]   ;;  %v7236_v41 = vld [vmem:[%s11316_s1 + $0xc] ss:$48 sps:$4 sm:$0xff]  }
  0x29   :  { %2417 = vmatprep.subr.bf16.mxu1 %v7158_v42  ;;  %v7239_v42 = vld [vmem:[%s11316_s1 + $0x60c] ss:$48 sps:$4 sm:$0xff]  }
  0x2b   :  { %2375 = vmatpush2.bf16.msra.mxu0 %v7160_v43  ;;  %v7234_v43 = vld [vmem:[%s11316_s1 + $0x8] ss:$48 sps:$4 sm:$0xff]  }
  0x2c   :  { %2418 = vmatpush2.bf16.msra.mxu1 %v7161_v44  ;;  %2376 = vmatprep.subr.bf16.mxu0 %v7162_v45  ;;  %v7237_v44 = vld [vmem:[%s11316_s1 + $0x608] ss:$48 sps:$4 sm:$0xff]   ;;  %v7242_v45 = vld [vmem:[%s11316_s1 + $0x5ac] ss:$48 sps:$4 sm:$0xff]  }
  0x2d   :  { %2419 = vmatprep.subr.bf16.mxu1 %v7164_v46  ;;  %v7245_v46 = vld [vmem:[%s11316_s1 + $0xbac] ss:$48 sps:$4 sm:$0xff]  }
  0x2f   :  { %2377 = vmatpush2.bf16.msra.mxu0 %v7166_v51  ;;  %v7251_v51 = vld [vmem:[%s11316_s1 + $0xb4c] ss:$48 sps:$4 sm:$0xff]  }
  0x30   :  { %2420 = vmatpush2.bf16.msra.mxu1 %v7167_v52  ;;  %2378 = vmatprep.subr.bf16.mxu0 %v7168_v53  ;;  %v41_v52 = vld [vmem:[%s11318_s7 + $0x8] sm:$0xff] }
  0x31   :  { %2421 = vmatprep.subr.bf16.mxu1 %v7170_v56  ;;  %v7246_v53 = vld [vmem:[%s11316_s1 + $0x548] ss:$48 sps:$4 sm:$0xff]   ;;  %2896 = vperm.xlu0 %7094, %v41_v52   ;;  %v7341_v52 = vld [vmem:[%s11316_s1 + $0xbb4] ss:$48 sps:$4 sm:$0xff]  }
  0x32   :  { %v7249_v56 = vld [vmem:[%s11316_s1 + $0xb48] ss:$48 sps:$4 sm:$0xff]  }
  0x33   :  { %2379 = vmatpush2.bf16.msra.mxu0 %v7172_v57  ;;  %v7254_v57 = vld [vmem:[%s11316_s1 + $0x4ec] ss:$48 sps:$4 sm:$0xff]  }
  0x34   :  { %2422 = vmatpush2.bf16.msra.mxu1 %v7173_v58  ;;  %2380 = vmatprep.subr.bf16.mxu0 %v7174_v59  ;;  %v7257_v58 = vld [vmem:[%s11316_s1 + $0xaec] ss:$48 sps:$4 sm:$0xff]   ;;  %v7252_v59 = vld [vmem:[%s11316_s1 + $0x4e8] ss:$48 sps:$4 sm:$0xff]  }
  0x35   :  { %2423 = vmatprep.subr.bf16.mxu1 %v7176_v60  ;;  %v7255_v60 = vld [vmem:[%s11316_s1 + $0xae8] ss:$48 sps:$4 sm:$0xff]  }
  0x37   :  { %2381 = vmatpush2.bf16.msra.mxu0 %v7178_v61  ;;  %v7260_v61 = vld [vmem:[%s11316_s1 + $0x48c] ss:$48 sps:$4 sm:$0xff]  }
  0x38   :  { %2424 = vmatpush2.bf16.msra.mxu1 %v7179_v62  ;;  %2382 = vmatprep.subr.bf16.mxu0 %v7180_v63  ;;  %v7263_v62 = vld [vmem:[%s11316_s1 + $0xa8c] ss:$48 sps:$4 sm:$0xff]   ;;  %v7258_v63 = vld [vmem:[%s11316_s1 + $0x488] ss:$48 sps:$4 sm:$0xff]  }
  0x39   :  { %2425 = vmatprep.subr.bf16.mxu1 %v7182_v0  ;;  %v7261_v0 = vld [vmem:[%s11316_s1 + $0xa88] ss:$48 sps:$4 sm:$0xff]  }
  0x3b   :  { %2383 = vmatpush2.bf16.msra.mxu0 %v7184_v1  ;;  %v7266_v1 = vld [vmem:[%s11316_s1 + $0x42c] ss:$48 sps:$4 sm:$0xff]  }
  0x3c   :  { %2426 = vmatpush2.bf16.msra.mxu1 %v7185_v2  ;;  %2384 = vmatprep.subr.bf16.mxu0 %v7186_v3  ;;  %v7269_v2 = vld [vmem:[%s11316_s1 + $0xa2c] ss:$48 sps:$4 sm:$0xff]   ;;  %v7264_v3 = vld [vmem:[%s11316_s1 + $0x428] ss:$48 sps:$4 sm:$0xff]  }
  0x3d   :  { %2427 = vmatprep.subr.bf16.mxu1 %v7188_v4  ;;  %v7267_v4 = vld [vmem:[%s11316_s1 + $0xa28] ss:$48 sps:$4 sm:$0xff]  }
  0x3f   :  { %2385 = vmatpush2.bf16.msra.mxu0 %v7190_v5  ;;  %v7272_v5 = vld [vmem:[%s11316_s1 + $0x3cc] ss:$48 sps:$4 sm:$0xff]  }
  0x40   :  { %2428 = vmatpush2.bf16.msra.mxu1 %v7191_v6  ;;  %2440 = vmatprep.subr.bf16.mxu0 %v7194_v11  ;;  %v7275_v6 = vld [vmem:[%s11316_s1 + $0x9cc] ss:$48 sps:$4 sm:$0xff]   ;;  %v7276_v11 = vld [vmem:[%s11316_s1 + $0x368] ss:$48 sps:$4 sm:$0xff]  }
  0x41   :  { %2483 = vmatprep.subr.bf16.mxu1 %v7197_v12  ;;  %v7279_v12 = vld [vmem:[%s11316_s1 + $0x968] ss:$48 sps:$4 sm:$0xff]  }
  0x42   :  { %2387 = vmatmul.mubr.bf16.vlgmr.msra.gmra.mxu0 %v8545_v13 }
  0x43   :  { %2430 = vmatmul.mubr.bf16.vlgmr.msra.gmra.mxu1 %v8547_v14  ;;  %2441 = vmatpush1.bf16.msra.mxu0 %v7192_v15  ;;  %v7284_v15 = vld [vmem:[%s11316_s1 + $0x30c] ss:$48 sps:$4 sm:$0xff]  }
  0x44   :  { %2484 = vmatpush1.bf16.msra.mxu1 %v7195_v16  ;;  %2442 = vmatprep.subr.bf16.mxu0 %v7200_v17  ;;  %v7287_v16 = vld [vmem:[%s11316_s1 + $0x90c] ss:$48 sps:$4 sm:$0xff]   ;;  %v7282_v17 = vld [vmem:[%s11316_s1 + $0x308] ss:$48 sps:$4 sm:$0xff]  }
  0x45   :  { %2485 = vmatprep.subr.bf16.mxu1 %v7203_v18  ;;  %2472 = vmatprep.mubr.bf16.mxu0 %v8476_v54  ;;  %v7285_v18 = vld [vmem:[%s11316_s1 + $0x908] ss:$48 sps:$4 sm:$0xff]  }
  0x46   :  { %2515 = vmatprep.mubr.bf16.mxu1 %v8478_v55 }
  0x47   :  { %2443 = vmatpush1.bf16.msra.mxu0 %v7198_v19  ;;  %v7290_v19 = vld [vmem:[%s11316_s1 + $0x2b4] ss:$48 sps:$4 sm:$0xff]  }
  0x48   :  { %2486 = vmatpush1.bf16.msra.mxu1 %v7201_v20  ;;  %2444 = vmatprep.subr.bf16.mxu0 %v7206_v21  ;;  %v7293_v20 = vld [vmem:[%s11316_s1 + $0x8b4] ss:$48 sps:$4 sm:$0xff]   ;;  %v7288_v21 = vld [vmem:[%s11316_s1 + $0x2b0] ss:$48 sps:$4 sm:$0xff]  }
  0x49   :  { %2487 = vmatprep.subr.bf16.mxu1 %v7209_v22  ;;  %v7291_v22 = vld [vmem:[%s11316_s1 + $0x8b0] ss:$48 sps:$4 sm:$0xff]  }
  0x4b   :  { %2445 = vmatpush1.bf16.msra.mxu0 %v7204_v23  ;;  %v7296_v23 = vld [vmem:[%s11316_s1 + $0x254] ss:$48 sps:$4 sm:$0xff]  }
  0x4c   :  { %2488 = vmatpush1.bf16.msra.mxu1 %v7207_v24  ;;  %2446 = vmatprep.subr.bf16.mxu0 %v7212_v25  ;;  %v7299_v24 = vld [vmem:[%s11316_s1 + $0x854] ss:$48 sps:$4 sm:$0xff]   ;;  %v7294_v25 = vld [vmem:[%s11316_s1 + $0x250] ss:$48 sps:$4 sm:$0xff]  }
  0x4d   :  { %2489 = vmatprep.subr.bf16.mxu1 %v7215_v26  ;;  %v7297_v26 = vld [vmem:[%s11316_s1 + $0x850] ss:$48 sps:$4 sm:$0xff]  }
  0x4f   :  { %2447 = vmatpush1.bf16.msra.mxu0 %v7210_v27  ;;  %v7302_v27 = vld [vmem:[%s11316_s1 + $0x1f4] ss:$48 sps:$4 sm:$0xff]  }
  0x50   :  { %2490 = vmatpush1.bf16.msra.mxu1 %v7213_v28  ;;  %2448 = vmatprep.subr.bf16.mxu0 %v7218_v29  ;;  %v7305_v28 = vld [vmem:[%s11316_s1 + $0x7f4] ss:$48 sps:$4 sm:$0xff]   ;;  %v7300_v29 = vld [vmem:[%s11316_s1 + $0x1f0] ss:$48 sps:$4 sm:$0xff]  }
  0x51   :  { %2491 = vmatprep.subr.bf16.mxu1 %v7221_v30  ;;  %v7303_v30 = vld [vmem:[%s11316_s1 + $0x7f0] ss:$48 sps:$4 sm:$0xff]  }
  0x53   :  { %2449 = vmatpush1.bf16.msra.mxu0 %v7216_v31  ;;  %v7308_v31 = vld [vmem:[%s11316_s1 + $0x194] ss:$48 sps:$4 sm:$0xff]  }
  0x54   :  { %2492 = vmatpush1.bf16.msra.mxu1 %v7219_v32  ;;  %2450 = vmatprep.subr.bf16.mxu0 %v7224_v33  ;;  %v7311_v32 = vld [vmem:[%s11316_s1 + $0x794] ss:$48 sps:$4 sm:$0xff]   ;;  %v7306_v33 = vld [vmem:[%s11316_s1 + $0x190] ss:$48 sps:$4 sm:$0xff]  }
  0x55   :  { %2493 = vmatprep.subr.bf16.mxu1 %v7227_v34  ;;  %v7309_v34 = vld [vmem:[%s11316_s1 + $0x790] ss:$48 sps:$4 sm:$0xff]  }
  0x57   :  { %2451 = vmatpush1.bf16.msra.mxu0 %v7222_v35  ;;  %v7314_v35 = vld [vmem:[%s11316_s1 + $0x134] ss:$48 sps:$4 sm:$0xff]  }
  0x58   :  { %2494 = vmatpush1.bf16.msra.mxu1 %v7225_v36  ;;  %2452 = vmatprep.subr.bf16.mxu0 %v7230_v37  ;;  %v7317_v36 = vld [vmem:[%s11316_s1 + $0x734] ss:$48 sps:$4 sm:$0xff]   ;;  %v7312_v37 = vld [vmem:[%s11316_s1 + $0x130] ss:$48 sps:$4 sm:$0xff]  }
  0x59   :  { %2495 = vmatprep.subr.bf16.mxu1 %v7233_v38  ;;  %v7315_v38 = vld [vmem:[%s11316_s1 + $0x730] ss:$48 sps:$4 sm:$0xff]  }
  0x5b   :  { %2453 = vmatpush1.bf16.msra.mxu0 %v7228_v39  ;;  %v7320_v39 = vld [vmem:[%s11316_s1 + $0xd4] ss:$48 sps:$4 sm:$0xff]  }
  0x5c   :  { %2496 = vmatpush1.bf16.msra.mxu1 %v7231_v40  ;;  %2454 = vmatprep.subr.bf16.mxu0 %v7236_v41  ;;  %v7323_v40 = vld [vmem:[%s11316_s1 + $0x6d4] ss:$48 sps:$4 sm:$0xff]   ;;  %v7318_v41 = vld [vmem:[%s11316_s1 + $0xd0] ss:$48 sps:$4 sm:$0xff]  }
  0x5d   :  { %2497 = vmatprep.subr.bf16.mxu1 %v7239_v42  ;;  %v7321_v42 = vld [vmem:[%s11316_s1 + $0x6d0] ss:$48 sps:$4 sm:$0xff]  }
  0x5f   :  { %2455 = vmatpush1.bf16.msra.mxu0 %v7234_v43  ;;  %v7326_v43 = vld [vmem:[%s11316_s1 + $0x74] ss:$48 sps:$4 sm:$0xff]  }
  0x60   :  { %2498 = vmatpush1.bf16.msra.mxu1 %v7237_v44  ;;  %2456 = vmatprep.subr.bf16.mxu0 %v7242_v45  ;;  %v7329_v44 = vld [vmem:[%s11316_s1 + $0x674] ss:$48 sps:$4 sm:$0xff]   ;;  %v7324_v45 = vld [vmem:[%s11316_s1 + $0x70] ss:$48 sps:$4 sm:$0xff]  }
  0x61   :  { %2499 = vmatprep.subr.bf16.mxu1 %v7245_v46  ;;  %v7327_v46 = vld [vmem:[%s11316_s1 + $0x670] ss:$48 sps:$4 sm:$0xff]  }
  0x63   :  { %2457 = vmatpush2.bf16.msra.mxu0 %v7240_v47  ;;  %v7332_v47 = vld [vmem:[%s11316_s1 + $0x14] ss:$48 sps:$4 sm:$0xff]  }
  0x64   :  { %2500 = vmatpush2.bf16.msra.mxu1 %v7243_v48  ;;  %2458 = vmatprep.subr.bf16.mxu0 %v7248_v50  ;;  %v7335_v48 = vld [vmem:[%s11316_s1 + $0x614] ss:$48 sps:$4 sm:$0xff]   ;;  %v7333_v50 = vld [vmem:[%s11316_s1 + $0x610] ss:$48 sps:$4 sm:$0xff]  }
  0x65   :  { %2501 = vmatprep.subr.bf16.mxu1 %v7251_v51  ;;  %v7338_v51 = vld [vmem:[%s11316_s1 + $0x5b4] ss:$48 sps:$4 sm:$0xff]  }
  0x67   :  { %2459 = vmatpush2.bf16.msra.mxu0 %v7246_v53  ;;  %v7336_v53 = vld [vmem:[%s11316_s1 + $0x5b0] ss:$48 sps:$4 sm:$0xff]  }
  0x68   :  { %2502 = vmatpush2.bf16.msra.mxu1 %v7249_v56  ;;  %2460 = vmatprep.subr.bf16.mxu0 %v7254_v57  ;;  %v7339_v56 = vld [vmem:[%s11316_s1 + $0xbb0] ss:$48 sps:$4 sm:$0xff]   ;;  %v7344_v57 = vld [vmem:[%s11316_s1 + $0x554] ss:$48 sps:$4 sm:$0xff]  }
  0x69   :  { %2503 = vmatprep.subr.bf16.mxu1 %v7257_v58  ;;  %v7347_v58 = vld [vmem:[%s11316_s1 + $0xb54] ss:$48 sps:$4 sm:$0xff]  }
  0x6b   :  { %2461 = vmatpush2.bf16.msra.mxu0 %v7252_v59  ;;  %v7342_v59 = vld [vmem:[%s11316_s1 + $0x550] ss:$48 sps:$4 sm:$0xff]  }
  0x6c   :  { %2504 = vmatpush2.bf16.msra.mxu1 %v7255_v60  ;;  %2462 = vmatprep.subr.bf16.mxu0 %v7260_v61  ;;  %v7345_v60 = vld [vmem:[%s11316_s1 + $0xb50] ss:$48 sps:$4 sm:$0xff]   ;;  %v7350_v61 = vld [vmem:[%s11316_s1 + $0x4f4] ss:$48 sps:$4 sm:$0xff]  }
  0x6d   :  { %2505 = vmatprep.subr.bf16.mxu1 %v7263_v62  ;;  %v7353_v62 = vld [vmem:[%s11316_s1 + $0xaf4] ss:$48 sps:$4 sm:$0xff]  }
  0x6f   :  { %2463 = vmatpush2.bf16.msra.mxu0 %v7258_v63  ;;  %v7348_v63 = vld [vmem:[%s11316_s1 + $0x4f0] ss:$48 sps:$4 sm:$0xff]  }
  0x70   :  { %2506 = vmatpush2.bf16.msra.mxu1 %v7261_v0  ;;  %2464 = vmatprep.subr.bf16.mxu0 %v7266_v1  ;;  %v7351_v0 = vld [vmem:[%s11316_s1 + $0xaf0] ss:$48 sps:$4 sm:$0xff]   ;;  %v7356_v1 = vld [vmem:[%s11316_s1 + $0x494] ss:$48 sps:$4 sm:$0xff]  }
  0x71   :  { %2507 = vmatprep.subr.bf16.mxu1 %v7269_v2  ;;  %v7359_v2 = vld [vmem:[%s11316_s1 + $0xa94] ss:$48 sps:$4 sm:$0xff]  }
  0x73   :  { %2465 = vmatpush2.bf16.msra.mxu0 %v7264_v3  ;;  %v7354_v3 = vld [vmem:[%s11316_s1 + $0x490] ss:$48 sps:$4 sm:$0xff]  }
  0x74   :  { %2508 = vmatpush2.bf16.msra.mxu1 %v7267_v4  ;;  %2466 = vmatprep.subr.bf16.mxu0 %v7272_v5  ;;  %v7357_v4 = vld [vmem:[%s11316_s1 + $0xa90] ss:$48 sps:$4 sm:$0xff]   ;;  %v7362_v5 = vld [vmem:[%s11316_s1 + $0x434] ss:$48 sps:$4 sm:$0xff]  }
  0x75   :  { %2509 = vmatprep.subr.bf16.mxu1 %v7275_v6  ;;  %v7365_v6 = vld [vmem:[%s11316_s1 + $0xa34] ss:$48 sps:$4 sm:$0xff]  }
  0x77   :  { %2467 = vmatpush2.bf16.msra.mxu0 %v7270_v7  ;;  %v7360_v7 = vld [vmem:[%s11316_s1 + $0x430] ss:$48 sps:$4 sm:$0xff]  }
  0x78   :  { %2510 = vmatpush2.bf16.msra.mxu1 %v7273_v8  ;;  %2468 = vmatprep.subr.bf16.mxu0 %v7278_v9  ;;  %v7363_v8 = vld [vmem:[%s11316_s1 + $0xa30] ss:$48 sps:$4 sm:$0xff]   ;;  %v7368_v9 = vld [vmem:[%s11316_s1 + $0x3d4] ss:$48 sps:$4 sm:$0xff]  }
  0x79   :  { %2511 = vmatprep.subr.bf16.mxu1 %v7281_v10  ;;  %v7371_v10 = vld [vmem:[%s11316_s1 + $0x9d4] ss:$48 sps:$4 sm:$0xff]  }
  0x7b   :  { %2469 = vmatpush2.bf16.msra.mxu0 %v7276_v11  ;;  %v7366_v11 = vld [vmem:[%s11316_s1 + $0x3d0] ss:$48 sps:$4 sm:$0xff]  }
  0x7c   :  { %2512 = vmatpush2.bf16.msra.mxu1 %v7279_v12  ;;  %2470 = vmatprep.subr.bf16.mxu0 %v7284_v15  ;;  %v7369_v12 = vld [vmem:[%s11316_s1 + $0x9d0] ss:$48 sps:$4 sm:$0xff]   ;;  %v7374_v15 = vld [vmem:[%s11316_s1 + $0x374] ss:$48 sps:$4 sm:$0xff]  }
  0x7d   :  { %2513 = vmatprep.subr.bf16.mxu1 %v7287_v16  ;;  %v7377_v16 = vld [vmem:[%s11316_s1 + $0x974] ss:$48 sps:$4 sm:$0xff]  }
  0x7f   :  { %2471 = vmatpush2.bf16.msra.mxu0 %v7282_v17  ;;  %v7372_v17 = vld [vmem:[%s11316_s1 + $0x370] ss:$48 sps:$4 sm:$0xff]  }
  0x80   :  { %2514 = vmatpush2.bf16.msra.mxu1 %v7285_v18  ;;  %2526 = vmatprep.subr.bf16.mxu0 %v7290_v19  ;;  %v7375_v18 = vld [vmem:[%s11316_s1 + $0x970] ss:$48 sps:$4 sm:$0xff]   ;;  %v7380_v19 = vld [vmem:[%s11316_s1 + $0x314] ss:$48 sps:$4 sm:$0xff]  }
  0x81   :  { %2569 = vmatprep.subr.bf16.mxu1 %v7293_v20  ;;  %v7383_v20 = vld [vmem:[%s11316_s1 + $0x914] ss:$48 sps:$4 sm:$0xff]  }
  0x82   :  { %2473 = vmatmul.mubr.bf16.vlgmr.msra.gmra.mxu0 %v8545_v13 }
  0x83   :  { %2516 = vmatmul.mubr.bf16.vlgmr.msra.gmra.mxu1 %v8547_v14  ;;  %2527 = vmatpush1.bf16.msra.mxu0 %v7288_v21  ;;  %v7378_v21 = vld [vmem:[%s11316_s1 + $0x310] ss:$48 sps:$4 sm:$0xff]  }
  0x84   :  { %2570 = vmatpush1.bf16.msra.mxu1 %v7291_v22  ;;  %2528 = vmatprep.subr.bf16.mxu0 %v7296_v23  ;;  %v7381_v22 = vld [vmem:[%s11316_s1 + $0x910] ss:$48 sps:$4 sm:$0xff]   ;;  %v7386_v23 = vld [vmem:[%s11316_s1 + $0x2bc] ss:$48 sps:$4 sm:$0xff]  }
  0x85   :  { %2571 = vmatprep.subr.bf16.mxu1 %v7299_v24  ;;  %2558 = vmatprep.mubr.bf16.mxu0 %v8476_v54  ;;  %v7389_v24 = vld [vmem:[%s11316_s1 + $0x8bc] ss:$48 sps:$4 sm:$0xff]  }
  0x86   :  { %2601 = vmatprep.mubr.bf16.mxu1 %v8478_v55 }
  0x87   :  { %2529 = vmatpush1.bf16.msra.mxu0 %v7294_v25  ;;  %v7384_v25 = vld [vmem:[%s11316_s1 + $0x2b8] ss:$48 sps:$4 sm:$0xff]  }
  0x88   :  { %2572 = vmatpush1.bf16.msra.mxu1 %v7297_v26  ;;  %2530 = vmatprep.subr.bf16.mxu0 %v7302_v27  ;;  %v7387_v26 = vld [vmem:[%s11316_s1 + $0x8b8] ss:$48 sps:$4 sm:$0xff]   ;;  %v7392_v27 = vld [vmem:[%s11316_s1 + $0x25c] ss:$48 sps:$4 sm:$0xff]  }
  0x89   :  { %2573 = vmatprep.subr.bf16.mxu1 %v7305_v28  ;;  %v7395_v28 = vld [vmem:[%s11316_s1 + $0x85c] ss:$48 sps:$4 sm:$0xff]  }
  0x8b   :  { %2531 = vmatpush1.bf16.msra.mxu0 %v7300_v29  ;;  %v7390_v29 = vld [vmem:[%s11316_s1 + $0x258] ss:$48 sps:$4 sm:$0xff]  }
  0x8c   :  { %2574 = vmatpush1.bf16.msra.mxu1 %v7303_v30  ;;  %2532 = vmatprep.subr.bf16.mxu0 %v7308_v31  ;;  %v7393_v30 = vld [vmem:[%s11316_s1 + $0x858] ss:$48 sps:$4 sm:$0xff]   ;;  %v7398_v31 = vld [vmem:[%s11316_s1 + $0x1fc] ss:$48 sps:$4 sm:$0xff]  }
  0x8d   :  { %2575 = vmatprep.subr.bf16.mxu1 %v7311_v32  ;;  %v7401_v32 = vld [vmem:[%s11316_s1 + $0x7fc] ss:$48 sps:$4 sm:$0xff]  }
  0x8f   :  { %2533 = vmatpush1.bf16.msra.mxu0 %v7306_v33  ;;  %v7396_v33 = vld [vmem:[%s11316_s1 + $0x1f8] ss:$48 sps:$4 sm:$0xff]  }
  0x90   :  { %2576 = vmatpush1.bf16.msra.mxu1 %v7309_v34  ;;  %2534 = vmatprep.subr.bf16.mxu0 %v7314_v35  ;;  %v7399_v34 = vld [vmem:[%s11316_s1 + $0x7f8] ss:$48 sps:$4 sm:$0xff]   ;;  %v7404_v35 = vld [vmem:[%s11316_s1 + $0x19c] ss:$48 sps:$4 sm:$0xff]  }
  0x91   :  { %2577 = vmatprep.subr.bf16.mxu1 %v7317_v36  ;;  %v7407_v36 = vld [vmem:[%s11316_s1 + $0x79c] ss:$48 sps:$4 sm:$0xff]  }
  0x93   :  { %2535 = vmatpush1.bf16.msra.mxu0 %v7312_v37  ;;  %v7402_v37 = vld [vmem:[%s11316_s1 + $0x198] ss:$48 sps:$4 sm:$0xff]  }
  0x94   :  { %2578 = vmatpush1.bf16.msra.mxu1 %v7315_v38  ;;  %2536 = vmatprep.subr.bf16.mxu0 %v7320_v39  ;;  %v7405_v38 = vld [vmem:[%s11316_s1 + $0x798] ss:$48 sps:$4 sm:$0xff]   ;;  %v7410_v39 = vld [vmem:[%s11316_s1 + $0x13c] ss:$48 sps:$4 sm:$0xff]  }
  0x95   :  { %2579 = vmatprep.subr.bf16.mxu1 %v7323_v40  ;;  %v7413_v40 = vld [vmem:[%s11316_s1 + $0x73c] ss:$48 sps:$4 sm:$0xff]  }
  0x97   :  { %2537 = vmatpush1.bf16.msra.mxu0 %v7318_v41  ;;  %v7408_v41 = vld [vmem:[%s11316_s1 + $0x138] ss:$48 sps:$4 sm:$0xff]  }
  0x98   :  { %2580 = vmatpush1.bf16.msra.mxu1 %v7321_v42  ;;  %2538 = vmatprep.subr.bf16.mxu0 %v7326_v43  ;;  %v7411_v42 = vld [vmem:[%s11316_s1 + $0x738] ss:$48 sps:$4 sm:$0xff]   ;;  %v7416_v43 = vld [vmem:[%s11316_s1 + $0xdc] ss:$48 sps:$4 sm:$0xff]  }
  0x99   :  { %2581 = vmatprep.subr.bf16.mxu1 %v7329_v44  ;;  %v7419_v44 = vld [vmem:[%s11316_s1 + $0x6dc] ss:$48 sps:$4 sm:$0xff]  }
  0x9b   :  { %2539 = vmatpush1.bf16.msra.mxu0 %v7324_v45  ;;  %v7414_v45 = vld [vmem:[%s11316_s1 + $0xd8] ss:$48 sps:$4 sm:$0xff]  }
  0x9c   :  { %2582 = vmatpush1.bf16.msra.mxu1 %v7327_v46  ;;  %2540 = vmatprep.subr.bf16.mxu0 %v7332_v47  ;;  %v7417_v46 = vld [vmem:[%s11316_s1 + $0x6d8] ss:$48 sps:$4 sm:$0xff]   ;;  %v7422_v47 = vld [vmem:[%s11316_s1 + $0x7c] ss:$48 sps:$4 sm:$0xff]  }
  0x9d   :  { %2583 = vmatprep.subr.bf16.mxu1 %v7335_v48  ;;  %v7425_v48 = vld [vmem:[%s11316_s1 + $0x67c] ss:$48 sps:$4 sm:$0xff]  }
  0x9f   :  { %2541 = vmatpush1.bf16.msra.mxu0 %v7330_v49  ;;  %v7420_v49 = vld [vmem:[%s11316_s1 + $0x78] ss:$48 sps:$4 sm:$0xff]  }
  0xa0   :  { %2584 = vmatpush1.bf16.msra.mxu1 %v7333_v50  ;;  %2542 = vmatprep.subr.bf16.mxu0 %v7338_v51  ;;  %v7423_v50 = vld [vmem:[%s11316_s1 + $0x678] ss:$48 sps:$4 sm:$0xff]   ;;  %v7428_v51 = vld [vmem:[%s11316_s1 + $0x1c] ss:$48 sps:$4 sm:$0xff]  }
  0xa1   :  { %2585 = vmatprep.subr.bf16.mxu1 %v7341_v52  ;;  %v7431_v52 = vld [vmem:[%s11316_s1 + $0x61c] ss:$48 sps:$4 sm:$0xff]  }
  0xa3   :  { %2543 = vmatpush2.bf16.msra.mxu0 %v7336_v53  ;;  %v7426_v53 = vld [vmem:[%s11316_s1 + $0x18] ss:$48 sps:$4 sm:$0xff]  }
  0xa4   :  { %2586 = vmatpush2.bf16.msra.mxu1 %v7339_v56  ;;  %2544 = vmatprep.subr.bf16.mxu0 %v7344_v57  ;;  %v7429_v56 = vld [vmem:[%s11316_s1 + $0x618] ss:$48 sps:$4 sm:$0xff]   ;;  %v7434_v57 = vld [vmem:[%s11316_s1 + $0x5bc] ss:$48 sps:$4 sm:$0xff]  }
  0xa5   :  { %2587 = vmatprep.subr.bf16.mxu1 %v7347_v58  ;;  %v7437_v58 = vld [vmem:[%s11316_s1 + $0xbbc] ss:$48 sps:$4 sm:$0xff]  }
  0xa7   :  { %2545 = vmatpush2.bf16.msra.mxu0 %v7342_v59  ;;  %v7432_v59 = vld [vmem:[%s11316_s1 + $0x5b8] ss:$48 sps:$4 sm:$0xff]  }
  0xa8   :  { %2588 = vmatpush2.bf16.msra.mxu1 %v7345_v60  ;;  %2546 = vmatprep.subr.bf16.mxu0 %v7350_v61  ;;  %v7435_v60 = vld [vmem:[%s11316_s1 + $0xbb8] ss:$48 sps:$4 sm:$0xff]   ;;  %v7440_v61 = vld [vmem:[%s11316_s1 + $0x55c] ss:$48 sps:$4 sm:$0xff]  }
  0xa9   :  { %2589 = vmatprep.subr.bf16.mxu1 %v7353_v62  ;;  %v7443_v62 = vld [vmem:[%s11316_s1 + $0xb5c] ss:$48 sps:$4 sm:$0xff]  }
  0xab   :  { %2547 = vmatpush2.bf16.msra.mxu0 %v7348_v63  ;;  %v7438_v63 = vld [vmem:[%s11316_s1 + $0x558] ss:$48 sps:$4 sm:$0xff]  }
  0xac   :  { %2590 = vmatpush2.bf16.msra.mxu1 %v7351_v0  ;;  %2548 = vmatprep.subr.bf16.mxu0 %v7356_v1  ;;  %v7441_v0 = vld [vmem:[%s11316_s1 + $0xb58] ss:$48 sps:$4 sm:$0xff]   ;;  %v7446_v1 = vld [vmem:[%s11316_s1 + $0x4fc] ss:$48 sps:$4 sm:$0xff]  }
  0xad   :  { %2591 = vmatprep.subr.bf16.mxu1 %v7359_v2  ;;  %v7449_v2 = vld [vmem:[%s11316_s1 + $0xafc] ss:$48 sps:$4 sm:$0xff]  }
  0xaf   :  { %2549 = vmatpush2.bf16.msra.mxu0 %v7354_v3  ;;  %v7444_v3 = vld [vmem:[%s11316_s1 + $0x4f8] ss:$48 sps:$4 sm:$0xff]  }
  0xb0   :  { %2592 = vmatpush2.bf16.msra.mxu1 %v7357_v4  ;;  %2550 = vmatprep.subr.bf16.mxu0 %v7362_v5  ;;  %v7447_v4 = vld [vmem:[%s11316_s1 + $0xaf8] ss:$48 sps:$4 sm:$0xff]   ;;  %v7452_v5 = vld [vmem:[%s11316_s1 + $0x49c] ss:$48 sps:$4 sm:$0xff]  }
  0xb1   :  { %2593 = vmatprep.subr.bf16.mxu1 %v7365_v6  ;;  %v7455_v6 = vld [vmem:[%s11316_s1 + $0xa9c] ss:$48 sps:$4 sm:$0xff]  }
  0xb3   :  { %2551 = vmatpush2.bf16.msra.mxu0 %v7360_v7  ;;  %v7450_v7 = vld [vmem:[%s11316_s1 + $0x498] ss:$48 sps:$4 sm:$0xff]  }
  0xb4   :  { %2594 = vmatpush2.bf16.msra.mxu1 %v7363_v8  ;;  %2552 = vmatprep.subr.bf16.mxu0 %v7368_v9  ;;  %v7453_v8 = vld [vmem:[%s11316_s1 + $0xa98] ss:$48 sps:$4 sm:$0xff]   ;;  %v7458_v9 = vld [vmem:[%s11316_s1 + $0x43c] ss:$48 sps:$4 sm:$0xff]  }
  0xb5   :  { %2595 = vmatprep.subr.bf16.mxu1 %v7371_v10  ;;  %v7461_v10 = vld [vmem:[%s11316_s1 + $0xa3c] ss:$48 sps:$4 sm:$0xff]  }
  0xb7   :  { %2553 = vmatpush2.bf16.msra.mxu0 %v7366_v11  ;;  %v7456_v11 = vld [vmem:[%s11316_s1 + $0x438] ss:$48 sps:$4 sm:$0xff]  }
  0xb8   :  { %2596 = vmatpush2.bf16.msra.mxu1 %v7369_v12  ;;  %2554 = vmatprep.subr.bf16.mxu0 %v7374_v15  ;;  %v7459_v12 = vld [vmem:[%s11316_s1 + $0xa38] ss:$48 sps:$4 sm:$0xff]   ;;  %v7464_v15 = vld [vmem:[%s11316_s1 + $0x3dc] ss:$48 sps:$4 sm:$0xff]  }
  0xb9   :  { %2597 = vmatprep.subr.bf16.mxu1 %v7377_v16  ;;  %v7467_v16 = vld [vmem:[%s11316_s1 + $0x9dc] ss:$48 sps:$4 sm:$0xff]  }
  0xbb   :  { %2555 = vmatpush2.bf16.msra.mxu0 %v7372_v17  ;;  %v7462_v17 = vld [vmem:[%s11316_s1 + $0x3d8] ss:$48 sps:$4 sm:$0xff]  }
  0xbc   :  { %2598 = vmatpush2.bf16.msra.mxu1 %v7375_v18  ;;  %2556 = vmatprep.subr.bf16.mxu0 %v7380_v19  ;;  %v7465_v18 = vld [vmem:[%s11316_s1 + $0x9d8] ss:$48 sps:$4 sm:$0xff]   ;;  %v7470_v19 = vld [vmem:[%s11316_s1 + $0x37c] ss:$48 sps:$4 sm:$0xff]  }
  0xbd   :  { %2599 = vmatprep.subr.bf16.mxu1 %v7383_v20  ;;  %v7473_v20 = vld [vmem:[%s11316_s1 + $0x97c] ss:$48 sps:$4 sm:$0xff]  }
  0xbf   :  { %2557 = vmatpush2.bf16.msra.mxu0 %v7378_v21  ;;  %v7468_v21 = vld [vmem:[%s11316_s1 + $0x378] ss:$48 sps:$4 sm:$0xff]  }
  0xc0   :  { %2600 = vmatpush2.bf16.msra.mxu1 %v7381_v22  ;;  %2612 = vmatprep.subr.bf16.mxu0 %v7386_v23  ;;  %v7471_v22 = vld [vmem:[%s11316_s1 + $0x978] ss:$48 sps:$4 sm:$0xff]   ;;  %v7476_v23 = vld [vmem:[%s11316_s1 + $0x31c] ss:$48 sps:$4 sm:$0xff]  }
  0xc1   :  { %2655 = vmatprep.subr.bf16.mxu1 %v7389_v24  ;;  %v7479_v24 = vld [vmem:[%s11316_s1 + $0x91c] ss:$48 sps:$4 sm:$0xff]  }
  0xc2   :  { %2559 = vmatmul.mubr.bf16.vlgmr.msra.gmra.mxu0 %v8545_v13 }
  0xc3   :  { %2602 = vmatmul.mubr.bf16.vlgmr.msra.gmra.mxu1 %v8547_v14  ;;  %2613 = vmatpush1.bf16.msra.mxu0 %v7384_v25  ;;  %v7474_v25 = vld [vmem:[%s11316_s1 + $0x318] ss:$48 sps:$4 sm:$0xff]  }
  0xc4   :  { %2656 = vmatpush1.bf16.msra.mxu1 %v7387_v26  ;;  %2614 = vmatprep.subr.bf16.mxu0 %v7392_v27  ;;  %v7477_v26 = vld [vmem:[%s11316_s1 + $0x918] ss:$48 sps:$4 sm:$0xff]   ;;  %v7482_v27 = vld [vmem:[%s11316_s1 + $0x2c4] ss:$48 sps:$4 sm:$0xff]  }
  0xc5   :  { %2657 = vmatprep.subr.bf16.mxu1 %v7395_v28  ;;  %2644 = vmatprep.mubr.bf16.mxu0 %v8476_v54  ;;  %v7485_v28 = vld [vmem:[%s11316_s1 + $0x8c4] ss:$48 sps:$4 sm:$0xff]  }
  0xc6   :  { %2687 = vmatprep.mubr.bf16.mxu1 %v8478_v55 }
  0xc7   :  { %2615 = vmatpush1.bf16.msra.mxu0 %v7390_v29  ;;  %v7480_v29 = vld [vmem:[%s11316_s1 + $0x2c0] ss:$48 sps:$4 sm:$0xff]  }
  0xc8   :  { %2658 = vmatpush1.bf16.msra.mxu1 %v7393_v30  ;;  %2616 = vmatprep.subr.bf16.mxu0 %v7398_v31  ;;  %v7483_v30 = vld [vmem:[%s11316_s1 + $0x8c0] ss:$48 sps:$4 sm:$0xff]   ;;  %v7488_v31 = vld [vmem:[%s11316_s1 + $0x264] ss:$48 sps:$4 sm:$0xff]  }
  0xc9   :  { %2659 = vmatprep.subr.bf16.mxu1 %v7401_v32  ;;  %v7491_v32 = vld [vmem:[%s11316_s1 + $0x864] ss:$48 sps:$4 sm:$0xff]  }
  0xcb   :  { %2617 = vmatpush1.bf16.msra.mxu0 %v7396_v33  ;;  %v7486_v33 = vld [vmem:[%s11316_s1 + $0x260] ss:$48 sps:$4 sm:$0xff]  }
  0xcc   :  { %2660 = vmatpush1.bf16.msra.mxu1 %v7399_v34  ;;  %2618 = vmatprep.subr.bf16.mxu0 %v7404_v35  ;;  %v7489_v34 = vld [vmem:[%s11316_s1 + $0x860] ss:$48 sps:$4 sm:$0xff]   ;;  %v7494_v35 = vld [vmem:[%s11316_s1 + $0x204] ss:$48 sps:$4 sm:$0xff]  }
  0xcd   :  { %2661 = vmatprep.subr.bf16.mxu1 %v7407_v36  ;;  %v7497_v36 = vld [vmem:[%s11316_s1 + $0x804] ss:$48 sps:$4 sm:$0xff]  }
  0xcf   :  { %2619 = vmatpush1.bf16.msra.mxu0 %v7402_v37  ;;  %v7492_v37 = vld [vmem:[%s11316_s1 + $0x200] ss:$48 sps:$4 sm:$0xff]  }
  0xd0   :  { %2662 = vmatpush1.bf16.msra.mxu1 %v7405_v38  ;;  %2620 = vmatprep.subr.bf16.mxu0 %v7410_v39  ;;  %v7495_v38 = vld [vmem:[%s11316_s1 + $0x800] ss:$48 sps:$4 sm:$0xff]   ;;  %v7500_v39 = vld [vmem:[%s11316_s1 + $0x1a4] ss:$48 sps:$4 sm:$0xff]  }
  0xd1   :  { %2663 = vmatprep.subr.bf16.mxu1 %v7413_v40  ;;  %v7503_v40 = vld [vmem:[%s11316_s1 + $0x7a4] ss:$48 sps:$4 sm:$0xff]  }
  0xd3   :  { %2621 = vmatpush1.bf16.msra.mxu0 %v7408_v41  ;;  %v7498_v41 = vld [vmem:[%s11316_s1 + $0x1a0] ss:$48 sps:$4 sm:$0xff]  }
  0xd4   :  { %2664 = vmatpush1.bf16.msra.mxu1 %v7411_v42  ;;  %2622 = vmatprep.subr.bf16.mxu0 %v7416_v43  ;;  %v7501_v42 = vld [vmem:[%s11316_s1 + $0x7a0] ss:$48 sps:$4 sm:$0xff]  }
  0xd5   :  { %2665 = vmatprep.subr.bf16.mxu1 %v7419_v44  ;;  %v42_v43 = vld [vmem:[%s11319_s8] sm:$0xff] }
  0xd6   :  { %v7506_v44 = vld [vmem:[%s11316_s1 + $0x144] ss:$48 sps:$4 sm:$0xff]   ;;  %2934 = vperm.xlu1 %7095, %v42_v43  }
  0xd7   :  { %2623 = vmatpush1.bf16.msra.mxu0 %v7414_v45  ;;  %v7509_v45 = vld [vmem:[%s11316_s1 + $0x744] ss:$48 sps:$4 sm:$0xff]  }
  0xd8   :  { %2666 = vmatpush1.bf16.msra.mxu1 %v7417_v46  ;;  %2624 = vmatprep.subr.bf16.mxu0 %v7422_v47  ;;  %v43_v46 = vld [vmem:[%s11319_s8 + $0x8] sm:$0xff]  ;;  %v7504_v47 = vld [vmem:[%s11316_s1 + $0x140] ss:$48 sps:$4 sm:$0xff]  }
  0xd9   :  { %2667 = vmatprep.subr.bf16.mxu1 %v7425_v48  ;;  %v7507_v48 = vld [vmem:[%s11316_s1 + $0x740] ss:$48 sps:$4 sm:$0xff]  }
  0xda   :  { %2939 = vperm.xlu1 %7095, %v43_v46   ;;  %v7587_v46 = vld [vmem:[%s11316_s1 + $0x86c] ss:$48 sps:$4 sm:$0xff]  }
  0xdb   :  { %2625 = vmatpush1.bf16.msra.mxu0 %v7420_v49  ;;  %v7512_v49 = vld [vmem:[%s11316_s1 + $0xe4] ss:$48 sps:$4 sm:$0xff]  }
  0xdc   :  { %2668 = vmatpush1.bf16.msra.mxu1 %v7423_v50  ;;  %2626 = vmatprep.subr.bf16.mxu0 %v7428_v51  ;;  %v7515_v50 = vld [vmem:[%s11316_s1 + $0x6e4] ss:$48 sps:$4 sm:$0xff]   ;;  %v7510_v51 = vld [vmem:[%s11316_s1 + $0xe0] ss:$48 sps:$4 sm:$0xff]  }
  0xdd   :  { %2669 = vmatprep.subr.bf16.mxu1 %v7431_v52  ;;  %v7513_v52 = vld [vmem:[%s11316_s1 + $0x6e0] ss:$48 sps:$4 sm:$0xff]  }
  0xdf   :  { %2627 = vmatpush1.bf16.msra.mxu0 %v7426_v53  ;;  %v7518_v53 = vld [vmem:[%s11316_s1 + $0x84] ss:$48 sps:$4 sm:$0xff]  }
  0xe0   :  { %2670 = vmatpush1.bf16.msra.mxu1 %v7429_v56  ;;  %2628 = vmatprep.subr.bf16.mxu0 %v7434_v57  ;;  %v7521_v56 = vld [vmem:[%s11316_s1 + $0x684] ss:$48 sps:$4 sm:$0xff]   ;;  %v7516_v57 = vld [vmem:[%s11316_s1 + $0x80] ss:$48 sps:$4 sm:$0xff]  }
  0xe1   :  { %2671 = vmatprep.subr.bf16.mxu1 %v7437_v58  ;;  %v7519_v58 = vld [vmem:[%s11316_s1 + $0x680] ss:$48 sps:$4 sm:$0xff]  }
  0xe3   :  { %2629 = vmatpush2.bf16.msra.mxu0 %v7432_v59  ;;  %v7524_v59 = vld [vmem:[%s11316_s1 + $0x24] ss:$48 sps:$4 sm:$0xff]  }
  0xe4   :  { %2672 = vmatpush2.bf16.msra.mxu1 %v7435_v60  ;;  %2630 = vmatprep.subr.bf16.mxu0 %v7440_v61  ;;  %v7527_v60 = vld [vmem:[%s11316_s1 + $0x624] ss:$48 sps:$4 sm:$0xff]   ;;  %v7522_v61 = vld [vmem:[%s11316_s1 + $0x20] ss:$48 sps:$4 sm:$0xff]  }
  0xe5   :  { %2673 = vmatprep.subr.bf16.mxu1 %v7443_v62  ;;  %v7525_v62 = vld [vmem:[%s11316_s1 + $0x620] ss:$48 sps:$4 sm:$0xff]  }
  0xe7   :  { %2631 = vmatpush2.bf16.msra.mxu0 %v7438_v63  ;;  %v7530_v63 = vld [vmem:[%s11316_s1 + $0x5c4] ss:$48 sps:$4 sm:$0xff]  }
  0xe8   :  { %2674 = vmatpush2.bf16.msra.mxu1 %v7441_v0  ;;  %2632 = vmatprep.subr.bf16.mxu0 %v7446_v1  ;;  %v7533_v0 = vld [vmem:[%s11316_s1 + $0xbc4] ss:$48 sps:$4 sm:$0xff]   ;;  %v7528_v1 = vld [vmem:[%s11316_s1 + $0x5c0] ss:$48 sps:$4 sm:$0xff]  }
  0xe9   :  { %2675 = vmatprep.subr.bf16.mxu1 %v7449_v2  ;;  %v7531_v2 = vld [vmem:[%s11316_s1 + $0xbc0] ss:$48 sps:$4 sm:$0xff]  }
  0xeb   :  { %2633 = vmatpush2.bf16.msra.mxu0 %v7444_v3  ;;  %v7536_v3 = vld [vmem:[%s11316_s1 + $0x564] ss:$48 sps:$4 sm:$0xff]  }
  0xec   :  { %2676 = vmatpush2.bf16.msra.mxu1 %v7447_v4  ;;  %2634 = vmatprep.subr.bf16.mxu0 %v7452_v5  ;;  %v7539_v4 = vld [vmem:[%s11316_s1 + $0xb64] ss:$48 sps:$4 sm:$0xff]   ;;  %v7534_v5 = vld [vmem:[%s11316_s1 + $0x560] ss:$48 sps:$4 sm:$0xff]  }
  0xed   :  { %2677 = vmatprep.subr.bf16.mxu1 %v7455_v6  ;;  %v7537_v6 = vld [vmem:[%s11316_s1 + $0xb60] ss:$48 sps:$4 sm:$0xff]  }
  0xef   :  { %2635 = vmatpush2.bf16.msra.mxu0 %v7450_v7  ;;  %v7542_v7 = vld [vmem:[%s11316_s1 + $0x504] ss:$48 sps:$4 sm:$0xff]  }
  0xf0   :  { %2678 = vmatpush2.bf16.msra.mxu1 %v7453_v8  ;;  %2636 = vmatprep.subr.bf16.mxu0 %v7458_v9  ;;  %v7545_v8 = vld [vmem:[%s11316_s1 + $0xb04] ss:$48 sps:$4 sm:$0xff]   ;;  %v7540_v9 = vld [vmem:[%s11316_s1 + $0x500] ss:$48 sps:$4 sm:$0xff]  }
  0xf1   :  { %2679 = vmatprep.subr.bf16.mxu1 %v7461_v10  ;;  %v7543_v10 = vld [vmem:[%s11316_s1 + $0xb00] ss:$48 sps:$4 sm:$0xff]  }
  0xf3   :  { %2637 = vmatpush2.bf16.msra.mxu0 %v7456_v11  ;;  %v7548_v11 = vld [vmem:[%s11316_s1 + $0x4a4] ss:$48 sps:$4 sm:$0xff]  }
  0xf4   :  { %2680 = vmatpush2.bf16.msra.mxu1 %v7459_v12  ;;  %2638 = vmatprep.subr.bf16.mxu0 %v7464_v15  ;;  %v7551_v12 = vld [vmem:[%s11316_s1 + $0xaa4] ss:$48 sps:$4 sm:$0xff]   ;;  %v7546_v15 = vld [vmem:[%s11316_s1 + $0x4a0] ss:$48 sps:$4 sm:$0xff]  }
  0xf5   :  { %2681 = vmatprep.subr.bf16.mxu1 %v7467_v16  ;;  %v7549_v16 = vld [vmem:[%s11316_s1 + $0xaa0] ss:$48 sps:$4 sm:$0xff]  }
  0xf7   :  { %2639 = vmatpush2.bf16.msra.mxu0 %v7462_v17  ;;  %v7554_v17 = vld [vmem:[%s11316_s1 + $0x444] ss:$48 sps:$4 sm:$0xff]  }
  0xf8   :  { %2682 = vmatpush2.bf16.msra.mxu1 %v7465_v18  ;;  %2640 = vmatprep.subr.bf16.mxu0 %v7470_v19  ;;  %v7557_v18 = vld [vmem:[%s11316_s1 + $0xa44] ss:$48 sps:$4 sm:$0xff]   ;;  %v7552_v19 = vld [vmem:[%s11316_s1 + $0x440] ss:$48 sps:$4 sm:$0xff]  }
  0xf9   :  { %2683 = vmatprep.subr.bf16.mxu1 %v7473_v20  ;;  %v7555_v20 = vld [vmem:[%s11316_s1 + $0xa40] ss:$48 sps:$4 sm:$0xff]  }
  0xfb   :  { %2641 = vmatpush2.bf16.msra.mxu0 %v7468_v21  ;;  %v7560_v21 = vld [vmem:[%s11316_s1 + $0x3e4] ss:$48 sps:$4 sm:$0xff]  }
  0xfc   :  { %2684 = vmatpush2.bf16.msra.mxu1 %v7471_v22  ;;  %2642 = vmatprep.subr.bf16.mxu0 %v7476_v23  ;;  %v7563_v22 = vld [vmem:[%s11316_s1 + $0x9e4] ss:$48 sps:$4 sm:$0xff]   ;;  %v7558_v23 = vld [vmem:[%s11316_s1 + $0x3e0] ss:$48 sps:$4 sm:$0xff]  }
  0xfd   :  { %2685 = vmatprep.subr.bf16.mxu1 %v7479_v24  ;;  %v7561_v24 = vld [vmem:[%s11316_s1 + $0x9e0] ss:$48 sps:$4 sm:$0xff]  }
  0xff   :  { %2643 = vmatpush2.bf16.msra.mxu0 %v7474_v25 }
 0x100   :  { %2686 = vmatpush2.bf16.msra.mxu1 %v7477_v26  ;;  %2698 = vmatprep.subr.bf16.mxu0 %v7482_v27  ;;  %v7566_v27 = vld [vmem:[%s11316_s1 + $0x384] ss:$48 sps:$4 sm:$0xff]  }
 0x101   :  { %2741 = vmatprep.subr.bf16.mxu1 %v7485_v28  ;;  %v7569_v28 = vld [vmem:[%s11316_s1 + $0x984] ss:$48 sps:$4 sm:$0xff]  }
 0x102   :  { %2645 = vmatmul.mubr.bf16.vlgmr.msra.gmra.mxu0 %v8545_v13  ;;  %v9315_v25 = vpop.f32.mrf.mxu0 }
 0x103   :  { %2688 = vmatmul.mubr.bf16.vlgmr.msra.gmra.mxu1 %v8547_v14  ;;  %2699 = vmatpush1.bf16.msra.mxu0 %v7480_v29  ;;  %v9317_v26 = vpop.f32.mrf.mxu1  ;;  %v7564_v29 = vld [vmem:[%s11316_s1 + $0x380] ss:$48 sps:$4 sm:$0xff]  }
 0x104   :  { %2742 = vmatpush1.bf16.msra.mxu1 %v7483_v30  ;;  %2700 = vmatprep.subr.bf16.mxu0 %v7488_v31  ;;  %v7567_v30 = vld [vmem:[%s11316_s1 + $0x980] ss:$48 sps:$4 sm:$0xff]   ;;  %v9331_v31 = vpop.f32.mrf.mxu0 }
 0x105   :  { %2743 = vmatprep.subr.bf16.mxu1 %v7491_v32  ;;  %2730 = vmatprep.mubr.bf16.mxu0 %v8476_v54  ;;  %v9333_v32 = vpop.f32.mrf.mxu1 }
 0x106   :  { %2773 = vmatprep.mubr.bf16.mxu1 %v8478_v55 }
 0x107   :  { %2701 = vmatpush1.bf16.msra.mxu0 %v7486_v33  ;;  %v7572_v33 = vld [vmem:[%s11316_s1 + $0x324] ss:$48 sps:$4 sm:$0xff]  }
 0x108   :  { %2744 = vmatpush1.bf16.msra.mxu1 %v7489_v34  ;;  %2702 = vmatprep.subr.bf16.mxu0 %v7494_v35  ;;  %v7575_v34 = vld [vmem:[%s11316_s1 + $0x924] ss:$48 sps:$4 sm:$0xff]   ;;  %v7570_v35 = vld [vmem:[%s11316_s1 + $0x320] ss:$48 sps:$4 sm:$0xff]  }
 0x109   :  { %2745 = vmatprep.subr.bf16.mxu1 %v7497_v36  ;;  %v7573_v36 = vld [vmem:[%s11316_s1 + $0x920] ss:$48 sps:$4 sm:$0xff]  }
 0x10b   :  { %2703 = vmatpush1.bf16.msra.mxu0 %v7492_v37  ;;  %v9347_v37 = vpop.f32.mrf.mxu0 }
 0x10c   :  { %2746 = vmatpush1.bf16.msra.mxu1 %v7495_v38  ;;  %2704 = vmatprep.subr.bf16.mxu0 %v7500_v39  ;;  %v9349_v38 = vpop.f32.mrf.mxu1  ;;  %v7578_v39 = vld [vmem:[%s11316_s1 + $0x2cc] ss:$48 sps:$4 sm:$0xff]  }
 0x10d   :  { %2747 = vmatprep.subr.bf16.mxu1 %v7503_v40  ;;  %v7581_v40 = vld [vmem:[%s11316_s1 + $0x8cc] ss:$48 sps:$4 sm:$0xff]   ;;  %v9363_v43 = vpop.f32.mrf.mxu0 }
 0x10f   :  { %2705 = vmatpush1.bf16.msra.mxu0 %v7498_v41  ;;  %v7576_v41 = vld [vmem:[%s11316_s1 + $0x2c8] ss:$48 sps:$4 sm:$0xff]  }
 0x110   :  { %2748 = vmatpush1.bf16.msra.mxu1 %v7501_v42  ;;  %2706 = vmatprep.subr.bf16.mxu0 %v7506_v44  ;;  %v7579_v42 = vld [vmem:[%s11316_s1 + $0x8c8] ss:$48 sps:$4 sm:$0xff]   ;;  %v9365_v44 = vpop.f32.mrf.mxu1 }
 0x111   :  { %2749 = vmatprep.subr.bf16.mxu1 %v7509_v45  ;;  %v7584_v45 = vld [vmem:[%s11316_s1 + $0x26c] ss:$48 sps:$4 sm:$0xff]  }
 0x113   :  { %2707 = vmatpush1.bf16.msra.mxu0 %v7504_v47 }
 0x114   :  { %2750 = vmatpush1.bf16.msra.mxu1 %v7507_v48  ;;  %2708 = vmatprep.subr.bf16.mxu0 %v7512_v49  ;;  %v2878_v49 = vlaneseq }
 0x115   :  { %2751 = vmatprep.subr.bf16.mxu1 %v7515_v50 }
 0x117   :  { %2709 = vmatpush1.bf16.msra.mxu0 %v7510_v51  ;;  %v7582_v51 = vld [vmem:[%s11316_s1 + $0x268] ss:$48 sps:$4 sm:$0xff]  }
 0x118   :  { %2752 = vmatpush1.bf16.msra.mxu1 %v7513_v52  ;;  %2710 = vmatprep.subr.bf16.mxu0 %v7518_v53  ;;  %v7585_v52 = vld [vmem:[%s11316_s1 + $0x868] ss:$48 sps:$4 sm:$0xff]  }
 0x119   :  { %2753 = vmatprep.subr.bf16.mxu1 %v7521_v56 }
 0x11b   :  { %2711 = vmatpush1.bf16.msra.mxu0 %v7516_v57  ;;  %v7590_v57 = vld [vmem:[%s11316_s1 + $0x20c] ss:$48 sps:$4 sm:$0xff]  }
 0x11c   :  { %2754 = vmatpush1.bf16.msra.mxu1 %v7519_v58  ;;  %2712 = vmatprep.subr.bf16.mxu0 %v7524_v59  ;;  %v7593_v58 = vld [vmem:[%s11316_s1 + $0x80c] ss:$48 sps:$4 sm:$0xff]  }
 0x11d   :  { %2755 = vmatprep.subr.bf16.mxu1 %v7527_v60 }
 0x11f   :  { %2713 = vmatpush1.bf16.msra.mxu0 %v7522_v61 }
 0x120   :  { %2756 = vmatpush1.bf16.msra.mxu1 %v7525_v62  ;;  %2714 = vmatprep.subr.bf16.mxu0 %v7530_v63  ;;  %v9390_v62 = vshrl.u32 %v2878_v49, 7 }
 0x121   :  { %2757 = vmatprep.subr.bf16.mxu1 %v7533_v0  ;;  %v7588_v0 = vld [vmem:[%s11316_s1 + $0x208] ss:$48 sps:$4 sm:$0xff]  }
 0x122   :  { %vm2880_vm0 = vcmp.lt.s32.totalorder %v9390_v62, 1  ;;  %vm2923_vm1 = vcmp.lt.s32.totalorder %v9390_v62, 7 }
 0x123   :  { %2715 = vmatpush2.bf16.msra.mxu0 %v7528_v1  ;;  %v7591_v1 = vld [vmem:[%s11316_s1 + $0x808] ss:$48 sps:$4 sm:$0xff]  }
 0x124   :  { %2758 = vmatpush2.bf16.msra.mxu1 %v7531_v2  ;;  %2716 = vmatprep.subr.bf16.mxu0 %v7536_v3  ;;  %v7599_v3 = vld [vmem:[%s11316_s1 + $0x7ac] ss:$48 sps:$4 sm:$0xff]  }
 0x125   :  { %2759 = vmatprep.subr.bf16.mxu1 %v7539_v4 }
 0x127   :  { %2717 = vmatpush2.bf16.msra.mxu0 %v7534_v5 }
 0x128   :  { %2760 = vmatpush2.bf16.msra.mxu1 %v7537_v6  ;;  %2718 = vmatprep.subr.bf16.mxu0 %v7542_v7 }
 0x129   :  { %2761 = vmatprep.subr.bf16.mxu1 %v7545_v8 }
 0x12b   :  { %2719 = vmatpush2.bf16.msra.mxu0 %v7540_v9  ;;  %v7594_v9 = vld [vmem:[%s11316_s1 + $0x1a8] ss:$48 sps:$4 sm:$0xff]  }
 0x12c   :  { %2762 = vmatpush2.bf16.msra.mxu1 %v7543_v10  ;;  %2720 = vmatprep.subr.bf16.mxu0 %v7548_v11  ;;  %v7597_v10 = vld [vmem:[%s11316_s1 + $0x7a8] ss:$48 sps:$4 sm:$0xff]  }
 0x12d   :  { %2763 = vmatprep.subr.bf16.mxu1 %v7551_v12 }
 0x12f   :  { %2721 = vmatpush2.bf16.msra.mxu0 %v7546_v15  ;;  %v7602_v15 = vld [vmem:[%s11316_s1 + $0x14c] ss:$48 sps:$4 sm:$0xff]  }
 0x130   :  { %2764 = vmatpush2.bf16.msra.mxu1 %v7549_v16  ;;  %2722 = vmatprep.subr.bf16.mxu0 %v7554_v17  ;;  %v7605_v16 = vld [vmem:[%s11316_s1 + $0x74c] ss:$48 sps:$4 sm:$0xff]  }
 0x131   :  { %2765 = vmatprep.subr.bf16.mxu1 %v7557_v18 }
 0x133   :  { %2723 = vmatpush2.bf16.msra.mxu0 %v7552_v19  ;;  %v7600_v19 = vld [vmem:[%s11316_s1 + $0x148] ss:$48 sps:$4 sm:$0xff]  }
 0x134   :  { %2766 = vmatpush2.bf16.msra.mxu1 %v7555_v20  ;;  %2724 = vmatprep.subr.bf16.mxu0 %v7560_v21  ;;  %v7603_v20 = vld [vmem:[%s11316_s1 + $0x748] ss:$48 sps:$4 sm:$0xff]   ;;  %v7608_v21 = vld [vmem:[%s11316_s1 + $0xec] ss:$48 sps:$4 sm:$0xff]  }
 0x135   :  { %2767 = vmatprep.subr.bf16.mxu1 %v7563_v22  ;;  %v7611_v22 = vld [vmem:[%s11316_s1 + $0x6ec] ss:$48 sps:$4 sm:$0xff]  }
 0x137   :  { %2725 = vmatpush2.bf16.msra.mxu0 %v7558_v23  ;;  %v7606_v23 = vld [vmem:[%s11316_s1 + $0xe8] ss:$48 sps:$4 sm:$0xff]  }
 0x138   :  { %2768 = vmatpush2.bf16.msra.mxu1 %v7561_v24  ;;  %2726 = vmatprep.subr.bf16.mxu0 %v7566_v27  ;;  %v7609_v24 = vld [vmem:[%s11316_s1 + $0x6e8] ss:$48 sps:$4 sm:$0xff]   ;;  %v7614_v27 = vld [vmem:[%s11316_s1 + $0x8c] ss:$48 sps:$4 sm:$0xff]  }
 0x139   :  { %2769 = vmatprep.subr.bf16.mxu1 %v7569_v28  ;;  %v7617_v28 = vld [vmem:[%s11316_s1 + $0x68c] ss:$48 sps:$4 sm:$0xff]  }
 0x13b   :  { %2727 = vmatpush2.bf16.msra.mxu0 %v7564_v29  ;;  %v7612_v29 = vld [vmem:[%s11316_s1 + $0x88] ss:$48 sps:$4 sm:$0xff]  }
 0x13c   :  { %2770 = vmatpush2.bf16.msra.mxu1 %v7567_v30  ;;  %2728 = vmatprep.subr.bf16.mxu0 %v7572_v33  ;;  %v7615_v30 = vld [vmem:[%s11316_s1 + $0x688] ss:$48 sps:$4 sm:$0xff]   ;;  %v7620_v33 = vld [vmem:[%s11316_s1 + $0x2c] ss:$48 sps:$4 sm:$0xff]  }
 0x13d   :  { %2771 = vmatprep.subr.bf16.mxu1 %v7575_v34  ;;  %v7623_v34 = vld [vmem:[%s11316_s1 + $0x62c] ss:$48 sps:$4 sm:$0xff]  }
 0x13f   :  { %2729 = vmatpush2.bf16.msra.mxu0 %v7570_v35  ;;  %v7618_v35 = vld [vmem:[%s11316_s1 + $0x28] ss:$48 sps:$4 sm:$0xff]  }
 0x140   :  { %2772 = vmatpush2.bf16.msra.mxu1 %v7573_v36  ;;  %2784 = vmatprep.subr.bf16.mxu0 %v7578_v39  ;;  %v7621_v36 = vld [vmem:[%s11316_s1 + $0x628] ss:$48 sps:$4 sm:$0xff]   ;;  %v7626_v39 = vld [vmem:[%s11316_s1 + $0x5cc] ss:$48 sps:$4 sm:$0xff]  }
 0x141   :  { %2827 = vmatprep.subr.bf16.mxu1 %v7581_v40  ;;  %v7629_v40 = vld [vmem:[%s11316_s1 + $0xbcc] ss:$48 sps:$4 sm:$0xff]  }
 0x142   :  { %v2474_v47 = vpop.f32.mrf.mxu0  ;;  %2731 = vmatmul.mubr.bf16.vlgmr.msra.gmra.mxu0 %v8545_v13 }
 0x143   :  { %v2517_v48 = vpop.f32.mrf.mxu1  ;;  %2774 = vmatmul.mubr.bf16.vlgmr.msra.gmra.mxu1 %v8547_v14  ;;  %2785 = vmatpush1.bf16.msra.mxu0 %v7576_v41  ;;  %v7624_v41 = vld [vmem:[%s11316_s1 + $0x5c8] ss:$48 sps:$4 sm:$0xff]  }
 0x144   :  { %v2518_v50 = vadd.f32 %v2517_v48, %v2474_v47  ;;  %2828 = vmatpush1.bf16.msra.mxu1 %v7579_v42  ;;  %v2476_v53 = vpop.f32.mrf.mxu0  ;;  %2786 = vmatprep.subr.bf16.mxu0 %v7584_v45  ;;  %v7627_v42 = vld [vmem:[%s11316_s1 + $0xbc8] ss:$48 sps:$4 sm:$0xff]   ;;  %v7632_v45 = vld [vmem:[%s11316_s1 + $0x56c] ss:$48 sps:$4 sm:$0xff]  }
 0x145   :  { %v2519_v56 = vpop.f32.mrf.mxu1  ;;  %2829 = vmatprep.subr.bf16.mxu1 %v7587_v46  ;;  %2816 = vmatprep.mubr.bf16.mxu0 %v8476_v54  ;;  %v7635_v46 = vld [vmem:[%s11316_s1 + $0xb6c] ss:$48 sps:$4 sm:$0xff]   ;;  %v7630_v47 = vld [vmem:[%s11316_s1 + $0x568] ss:$48 sps:$4 sm:$0xff]  }
 0x146   :  { %v2520_v59 = vadd.f32 %v2519_v56, %v2476_v53  ;;  %2859 = vmatprep.mubr.bf16.mxu1 %v8478_v55  ;;  %v2478_v60 = vpop.f32.mrf.mxu0  ;;  %v7596_v55 = vld [vmem:[%s11316_s1 + $0x1ac] ss:$48 sps:$4 sm:$0xff]   ;;  %v2872_v4 = vrot.slane %v2518_v50, 7  ;;  %v7633_v48 = vld [vmem:[%s11316_s1 + $0xb68] ss:$48 sps:$4 sm:$0xff]  }
 0x147   :  { %v2521_v61 = vpop.f32.mrf.mxu1  ;;  %2787 = vmatpush1.bf16.msra.mxu0 %v7582_v51  ;;  %v7638_v50 = vld [vmem:[%s11316_s1 + $0x50c] ss:$48 sps:$4 sm:$0xff]   ;;  %v7639_v53 = vld [vmem:[%s11316_s1 + $0xb08] ss:$48 sps:$4 sm:$0xff]  }
 0x148   :  { %v2522_v63 = vadd.f32 %v2521_v61, %v2478_v60  ;;  %2830 = vmatpush1.bf16.msra.mxu1 %v7585_v52  ;;  %v2480_v2 = vpop.f32.mrf.mxu0  ;;  %2788 = vmatprep.subr.bf16.mxu0 %v7590_v57  ;;  %v2873_v7 = vrot.slane %v2520_v59, 7  ;;  %v7641_v51 = vld [vmem:[%s11316_s1 + $0xb0c] ss:$48 sps:$4 sm:$0xff]   ;;  %v7636_v52 = vld [vmem:[%s11316_s1 + $0x508] ss:$48 sps:$4 sm:$0xff]  }
 0x149   :  { %v2523_v54 = vpop.f32.mrf.mxu1  ;;  %2831 = vmatprep.subr.bf16.mxu1 %v7593_v58  ;;  %v7644_v56 = vld [vmem:[%s11316_s1 + $0x4ac] ss:$48 sps:$4 sm:$0xff]   ;;  %v7642_v58 = vld [vmem:[%s11316_s1 + $0x4a8] ss:$48 sps:$4 sm:$0xff]  }
 0x14a   :  { %v2876_v5 = vrot.slane %v2522_v63, 7  ;;  %v2524_v6 = vadd.f32 %v2523_v54, %v2480_v2  ;;  %v7647_v57 = vld [vmem:[%s11316_s1 + $0xaac] ss:$48 sps:$4 sm:$0xff]   ;;  %v7645_v59 = vld [vmem:[%s11316_s1 + $0xaa8] ss:$48 sps:$4 sm:$0xff]  }
 0x14b   :  { %2789 = vmatpush1.bf16.msra.mxu0 %v7588_v0  ;;  %v7650_v60 = vld [vmem:[%s11316_s1 + $0x44c] ss:$48 sps:$4 sm:$0xff]   ;;  %v7648_v63 = vld [vmem:[%s11316_s1 + $0x448] ss:$48 sps:$4 sm:$0xff]  }
 0x14c   :  { %v2877_v8 = vrot.slane %v2524_v6, 7  ;;  %2832 = vmatpush1.bf16.msra.mxu1 %v7591_v1  ;;  %v9413_v11 = vsel %vm2880_vm0, %v2876_v5, %v2872_v4  ;;  %v9417_v12 = vsel %vm2880_vm0, %v2872_v4, %v2876_v5  ;;  %2790 = vmatprep.subr.bf16.mxu0 %v7596_v55  ;;  %v7653_v61 = vld [vmem:[%s11316_s1 + $0xa4c] ss:$48 sps:$4 sm:$0xff]   ;;  %v7651_v0 = vld [vmem:[%s11316_s1 + $0xa48] ss:$48 sps:$4 sm:$0xff]  }
 0x14d   :  { %2833 = vmatprep.subr.bf16.mxu1 %v7599_v3  ;;  %v7656_v1 = vld [vmem:[%s11316_s1 + $0x3ec] ss:$48 sps:$4 sm:$0xff]   ;;  %v7654_v54 = vld [vmem:[%s11316_s1 + $0x3e8] ss:$48 sps:$4 sm:$0xff]  }
 0x14e   :  { %v9427_v17 = vsel %vm2880_vm0, %v2877_v8, %v2873_v7  ;;  %v9431_v18 = vsel %vm2880_vm0, %v2873_v7, %v2877_v8  ;;  %v7659_v2 = vld [vmem:[%s11316_s1 + $0x9ec] ss:$48 sps:$4 sm:$0xff]   ;;  %v7657_v55 = vld [vmem:[%s11316_s1 + $0x9e8] ss:$48 sps:$4 sm:$0xff]  }
 0x14f   :  { %2791 = vmatpush1.bf16.msra.mxu0 %v7594_v9  ;;  %v7662_v3 = vld [vmem:[%s11316_s1 + $0x38c] ss:$48 sps:$4 sm:$0xff]   ;;  %v7660_v5 = vld [vmem:[%s11316_s1 + $0x388] ss:$48 sps:$4 sm:$0xff]  }
 0x150   :  { %2834 = vmatpush1.bf16.msra.mxu1 %v7597_v10  ;;  %2792 = vmatprep.subr.bf16.mxu0 %v7602_v15  ;;  %v7665_v4 = vld [vmem:[%s11316_s1 + $0x98c] ss:$48 sps:$4 sm:$0xff]   ;;  %v7663_v6 = vld [vmem:[%s11316_s1 + $0x988] ss:$48 sps:$4 sm:$0xff]  }
 0x151   :  { %2835 = vmatprep.subr.bf16.mxu1 %v7605_v16  ;;  %v7668_v7 = vld [vmem:[%s11316_s1 + $0x32c] ss:$48 sps:$4 sm:$0xff]   ;;  %v7666_v9 = vld [vmem:[%s11316_s1 + $0x328] ss:$48 sps:$4 sm:$0xff]  }
 0x152   :  { %v7671_v8 = vld [vmem:[%s11316_s1 + $0x92c] ss:$48 sps:$4 sm:$0xff]   ;;  %v7669_v10 = vld [vmem:[%s11316_s1 + $0x928] ss:$48 sps:$4 sm:$0xff]   ;;  %s8265_s1 = smov 64  }
 0x153   :  { %2793 = vmatpush1.bf16.msra.mxu0 %v7600_v19 }
 0x154   :  { %2836 = vmatpush1.bf16.msra.mxu1 %v7603_v20  ;;  %2794 = vmatprep.subr.bf16.mxu0 %v7608_v21 }
 0x155   :  { %2837 = vmatprep.subr.bf16.mxu1 %v7611_v22 }
 0x157   :  { %2795 = vmatpush1.bf16.msra.mxu0 %v7606_v23  ;;  %v9573_v23 = vpop.permute.xlu0 %2891 }
 0x158   :  { %2838 = vmatpush1.bf16.msra.mxu1 %v7609_v24  ;;  %2796 = vmatprep.subr.bf16.mxu0 %v7614_v27 }
 0x159   :  { %2839 = vmatprep.subr.bf16.mxu1 %v7617_v28 }
 0x15b   :  { %2797 = vmatpush1.bf16.msra.mxu0 %v7612_v29 }
 0x15c   :  { %2840 = vmatpush1.bf16.msra.mxu1 %v7615_v30  ;;  %2798 = vmatprep.subr.bf16.mxu0 %v7620_v33  ;;  %v2901_v33 = vmul.f32 %v9573_v23, %v9413_v11 }
 0x15d   :  { %2841 = vmatprep.subr.bf16.mxu1 %v7623_v34 }
 0x15f   :  { %2799 = vmatpush1.bf16.msra.mxu0 %v7618_v35 }
 0x160   :  { %2842 = vmatpush1.bf16.msra.mxu1 %v7621_v36  ;;  %2800 = vmatprep.subr.bf16.mxu0 %v7626_v39  ;;  %v2902_v39 = vmul.f32 %v9573_v23, %v9427_v17  ;;  %v2436_v17 = vadd.f32 %v9349_v38, %v9347_v37 }
 0x161   :  { %2843 = vmatprep.subr.bf16.mxu1 %v7629_v40 }
 0x163   :  { %2801 = vmatpush2.bf16.msra.mxu0 %v7624_v41 }
 0x164   :  { %2844 = vmatpush2.bf16.msra.mxu1 %v7627_v42  ;;  %2802 = vmatprep.subr.bf16.mxu0 %v7632_v45 }
 0x165   :  { %2845 = vmatprep.subr.bf16.mxu1 %v7635_v46 }
 0x167   :  { %2803 = vmatpush2.bf16.msra.mxu0 %v7630_v47 }
 0x168   :  { %2846 = vmatpush2.bf16.msra.mxu1 %v7633_v48  ;;  %2804 = vmatprep.subr.bf16.mxu0 %v7638_v50 }
 0x169   :  { %2847 = vmatprep.subr.bf16.mxu1 %v7641_v51 }
 0x16b   :  { %2805 = vmatpush2.bf16.msra.mxu0 %v7636_v52 }
 0x16c   :  { %2848 = vmatpush2.bf16.msra.mxu1 %v7639_v53  ;;  %2806 = vmatprep.subr.bf16.mxu0 %v7644_v56  ;;  %v2432_v53 = vadd.f32 %v9317_v26, %v9315_v25  ;;  %v2874_v56 = vrot.slane %v2436_v17, 7 }
 0x16d   :  { %2849 = vmatprep.subr.bf16.mxu1 %v7647_v57 }
 0x16f   :  { %2807 = vmatpush2.bf16.msra.mxu0 %v7642_v58 }
 0x170   :  { %2850 = vmatpush2.bf16.msra.mxu1 %v7645_v59  ;;  %2808 = vmatprep.subr.bf16.mxu0 %v7650_v60  ;;  %v2870_v59 = vrot.slane %v2432_v53, 7  ;;  %v9601_v60 = vpop.permute.xlu1 %2934 }
 0x171   :  { %2851 = vmatprep.subr.bf16.mxu1 %v7653_v61 }
 0x172   :  { %v2885_v37 = vsel %vm2880_vm0, %v2874_v56, %v2870_v59  ;;  %v2881_v26 = vsel %vm2880_vm0, %v2870_v59, %v2874_v56 }
 0x173   :  { %2809 = vmatpush2.bf16.msra.mxu0 %v7648_v63 }
 0x174   :  { %2852 = vmatpush2.bf16.msra.mxu1 %v7651_v0  ;;  %2810 = vmatprep.subr.bf16.mxu0 %v7656_v1 }
 0x175   :  { %2853 = vmatprep.subr.bf16.mxu1 %v7659_v2 }
 0x177   :  { %2811 = vmatpush2.bf16.msra.mxu0 %v7654_v54 }
 0x178   :  { %2854 = vmatpush2.bf16.msra.mxu1 %v7657_v55  ;;  %2812 = vmatprep.subr.bf16.mxu0 %v7662_v3  ;;  %v2899_v55 = vmul.f32 %v9573_v23, %v2885_v37 }
 0x179   :  { %2855 = vmatprep.subr.bf16.mxu1 %v7665_v4 }
 0x17b   :  { %2813 = vmatpush2.bf16.msra.mxu0 %v7660_v5 }
 0x17c   :  { %2856 = vmatpush2.bf16.msra.mxu1 %v7663_v6  ;;  %2814 = vmatprep.subr.bf16.mxu0 %v7668_v7 }
 0x17d   :  { %2857 = vmatprep.subr.bf16.mxu1 %v7671_v8  ;;  %v9612_v8 = vpop.permute.xlu1 %2939 }
 0x17f   :  { %2815 = vmatpush2.bf16.msra.mxu0 %v7666_v9 }
 0x180   :  { %2858 = vmatpush2.bf16.msra.mxu1 %v7669_v10 }
 0x182   :  { %2817 = vmatmul.mubr.bf16.vlgmr.msra.gmra.mxu0 %v8545_v13  ;;  %v2560_v15 = vpop.f32.mrf.mxu0 }
 0x183   :  { %2860 = vmatmul.mubr.bf16.vlgmr.msra.gmra.mxu1 %v8547_v14  ;;  %v2603_v16 = vpop.f32.mrf.mxu1  ;;  %v9579_v14 = vpop.permute.xlu0 %2896 }
 0x184   :  { %v2562_v19 = vpop.f32.mrf.mxu0  ;;  %v2905_v46 = vmul.f32 %v9579_v14, %v9417_v12  ;;  %v2906_v51 = vmul.f32 %v9579_v14, %v9431_v18  ;;  %v2438_v12 = vadd.f32 %v9365_v44, %v9363_v43  ;;  %v2434_v18 = vadd.f32 %v9333_v32, %v9331_v31 }
 0x185   :  { %v2605_v20 = vpop.f32.mrf.mxu1  ;;  %v2604_v25 = vadd.f32 %v2603_v16, %v2560_v15  ;;  %v2903_v4 = vmul.f32 %v9579_v14, %v2881_v26 }
 0x186   :  { %v2564_v21 = vpop.f32.mrf.mxu0  ;;  %v2875_v0 = vrot.slane %v2438_v12, 7  ;;  %v2871_v54 = vrot.slane %v2434_v18, 7  ;;  %v2606_v10 = vadd.f32 %v2605_v20, %v2562_v19 }
 0x187   :  { %v2607_v22 = vpop.f32.mrf.mxu1  ;;  %v2907_v9 = vadd.f32 %v2899_v55, %v2604_v25 }
 0x188   :  { %v9575_v24 = vpop.f32.mrf.mxu0  ;;  %v2608_v3 = vadd.f32 %v2607_v22, %v2564_v21  ;;  %v2886_v15 = vsel %vm2880_vm0, %v2875_v0, %v2871_v54  ;;  %v2882_v16 = vsel %vm2880_vm0, %v2871_v54, %v2875_v0 }
 0x189   :  { %v2609_v27 = vpop.f32.mrf.mxu1  ;;  %v2900_v20 = vmul.f32 %v9573_v23, %v2886_v15 }
 0x1c2   :  { %v2646_v28 = vpop.f32.mrf.mxu0 }
 0x1c3   :  { %v2689_v29 = vpop.f32.mrf.mxu1 }
 0x1c4   :  { %v2690_v30 = vadd.f32 %v2689_v29, %v2646_v28  ;;  %v2648_v13 = vpop.f32.mrf.mxu0 }
 0x1c5   :  { %v2691_v34 = vpop.f32.mrf.mxu1 }
 0x1c6   :  { %v9581_v35 = vadd.f32 %v2901_v33, %v2690_v30  ;;  %v2692_v36 = vadd.f32 %v2691_v34, %v2648_v13  ;;  %v2650_v40 = vpop.f32.mrf.mxu0  ;;  %v2911_v30 = vadd.f32 %v2903_v4, %v2608_v3  ;;  %v2610_v33 = vadd.f32 %v2609_v27, %v9575_v24 }
 0x1c7   :  { %v2693_v41 = vpop.f32.mrf.mxu1  ;;  %v2904_v34 = vmul.f32 %v9579_v14, %v2882_v16 }
 0x1c8   :  { %v9585_v42 = vadd.f32 %v2902_v39, %v2692_v36  ;;  %v2694_v45 = vadd.f32 %v2693_v41, %v2650_v40  ;;  %v2652_v47 = vpop.f32.mrf.mxu0 }
 0x1c9   :  { %v2695_v11 = vpop.f32.mrf.mxu1 }
 0x1ca   :  { %v9589_v48 = vadd.f32 %v2905_v46, %v2694_v45  ;;  %v2696_v50 = vadd.f32 %v2695_v11, %v2652_v47  ;;  %v2908_v45 = vadd.f32 %v2900_v20, %v2606_v10  ;;  %v2912_v46 = vadd.f32 %v2904_v34, %v2610_v33 }
 0x1cc   :  { %v9593_v52 = vadd.f32 %v2906_v51, %v2696_v50 }
 0x202   :  { %v2732_v57 = vpop.f32.mrf.mxu0 }
 0x203   :  { %v2775_v58 = vpop.f32.mrf.mxu1 }
 0x204   :  { %v2734_v61 = vpop.f32.mrf.mxu0  ;;  %v2776_v38 = vadd.f32 %v2775_v58, %v2732_v57 }
 0x205   :  { %v2777_v63 = vpop.f32.mrf.mxu1 }
 0x206   :  { %v2736_v43 = vpop.f32.mrf.mxu0  ;;  %v2778_v1 = vadd.f32 %v2777_v63, %v2734_v61  ;;  %v2915_v5 = vrot.slane %v2776_v38, 1 }
 0x207   :  { %v2779_v44 = vpop.f32.mrf.mxu1 }
 0x208   :  { %v2780_v2 = vadd.f32 %v2779_v44, %v2736_v43  ;;  %v2738_v31 = vpop.f32.mrf.mxu0  ;;  %v2916_v21 = vrot.slane %v2778_v1, 1 }
 0x209   :  { %v2781_v32 = vpop.f32.mrf.mxu1 }
 0x20a   :  { %v2919_v6 = vrot.slane %v2780_v2, 1  ;;  %v2782_v7 = vadd.f32 %v2781_v32, %v2738_v31 }
 0x20c   :  { %v2924_v22 = vsel %vm2923_vm1, %v2915_v5, %v2919_v6  ;;  %v2928_v28 = vsel %vm2923_vm1, %v2919_v6, %v2915_v5  ;;  %v2920_v29 = vrot.slane %v2782_v7, 1  ;;  %v9682_v6 = vand.u32 127, %v2878_v49 }
 0x20d   :  { %v2946_v13 = vmul.f32 %v9612_v8, %v2928_v28  ;;  %v2942_v19 = vmul.f32 %v9601_v60, %v2924_v22 }
 0x20e   :  { %v2925_v36 = vsel %vm2923_vm1, %v2916_v21, %v2920_v29  ;;  %v2929_v39 = vsel %vm2923_vm1, %v2920_v29, %v2916_v21  ;;  %vm2976_vm2 = vcmp.lt.s32.totalorder %v9682_v6, 64 }
 0x20f   :  { %v9631_v40 = vadd.f32 %v2946_v13, %v2911_v30  ;;  %v9633_v41 = vadd.f32 %v2942_v19, %v2907_v9  ;;  %v2943_v24 = vmul.f32 %v9601_v60, %v2925_v36  ;;  %v2947_v27 = vmul.f32 %v9612_v8, %v2929_v39 }
 0x211   :  { %2960 = vrot.lane.b32.xlu1 %v9631_v40, %s8265_s1  ;;  %2958 = vrot.lane.b32.xlu0 %v9633_v41, %s8265_s1  ;;  %v9641_v47 = vadd.f32 %v2943_v24, %v2908_v45  ;;  %v9643_v11 = vadd.f32 %v2947_v27, %v2912_v46 }
 0x215   :  { %2962 = vrot.lane.b32.xlu0 %v9641_v47, %s8265_s1  ;;  %2964 = vrot.lane.b32.xlu1 %v9643_v11, %s8265_s1 }
 0x242   :  { %v2818_v50 = vpop.f32.mrf.mxu0 }
 0x243   :  { %v2861_v51 = vpop.f32.mrf.mxu1 }
 0x244   :  { %v2820_v17 = vpop.f32.mrf.mxu0  ;;  %v2862_v56 = vadd.f32 %v2861_v51, %v2818_v50 }
 0x245   :  { %v2863_v53 = vpop.f32.mrf.mxu1 }
 0x246   :  { %v2822_v12 = vpop.f32.mrf.mxu0  ;;  %v2864_v58 = vadd.f32 %v2863_v53, %v2820_v17  ;;  %v2917_v63 = vrot.slane %v2862_v56, 1 }
 0x247   :  { %v2865_v57 = vpop.f32.mrf.mxu1 }
 0x248   :  { %v2866_v59 = vadd.f32 %v2865_v57, %v2822_v12  ;;  %v2824_v18 = vpop.f32.mrf.mxu0  ;;  %v2918_v0 = vrot.slane %v2864_v58, 1 }
 0x249   :  { %v2867_v61 = vpop.f32.mrf.mxu1 }
 0x24a   :  { %v2921_v37 = vrot.slane %v2866_v59, 1  ;;  %v2868_v38 = vadd.f32 %v2867_v61, %v2824_v18 }
 0x24c   :  { %v2926_v25 = vsel %vm2923_vm1, %v2917_v63, %v2921_v37  ;;  %v2930_v26 = vsel %vm2923_vm1, %v2921_v37, %v2917_v63  ;;  %v2922_v43 = vrot.slane %v2868_v38, 1 }
 0x24d   :  { %v2944_v44 = vmul.f32 %v9601_v60, %v2926_v25  ;;  %v2948_v1 = vmul.f32 %v9612_v8, %v2930_v26 }
 0x24e   :  { %v2927_v2 = vsel %vm2923_vm1, %v2918_v0, %v2922_v43  ;;  %v2931_v54 = vsel %vm2923_vm1, %v2922_v43, %v2918_v0 }
 0x24f   :  { %v9660_v55 = vadd.f32 %v2944_v44, %v9581_v35  ;;  %v9663_v3 = vadd.f32 %v2948_v1, %v9589_v48  ;;  %v2945_v31 = vmul.f32 %v9601_v60, %v2927_v2  ;;  %v2949_v32 = vmul.f32 %v9612_v8, %v2931_v54 }
 0x251   :  { %2966 = vrot.lane.b32.xlu0 %v9660_v55, %s8265_s1  ;;  %2968 = vrot.lane.b32.xlu1 %v9663_v3, %s8265_s1  ;;  %v9672_v4 = vadd.f32 %v2945_v31, %v9585_v42  ;;  %v9675_v5 = vadd.f32 %v2949_v32, %v9593_v52 }
 0x255   :  { %2970 = vrot.lane.b32.xlu0 %v9672_v4, %s8265_s1  ;;  %2972 = vrot.lane.b32.xlu1 %v9675_v5, %s8265_s1 }
 0x283   :  { %v2961_v35 = vpop.permute.xlu1 %2960  ;;  %v2959_v48 = vpop.permute.xlu0 %2958 }
 0x287   :  { %v2963_v7 = vpop.permute.xlu0 %2962  ;;  %v2965_v9 = vpop.permute.xlu1 %2964 }
 0x288   :  { %v2981_v52 = vsel %vm2976_vm2, %v2959_v48, %v2963_v7  ;;  %v2982_v15 = vsel %vm2976_vm2, %v2961_v35, %v2965_v9 }
 0x289   :  { %v2986_v28 = vadd.f32 %v2981_v52, %v9641_v47  ;;  %v2990_v29 = vadd.f32 %v2982_v15, %v9643_v11 }
 0x2c3   :  { %v2967_v42 = vpop.permute.xlu0 %2966  ;;  %v2969_v10 = vpop.permute.xlu1 %2968 }
 0x2c4   :  { %v2979_v16 = vsel %vm2976_vm2, %v2963_v7, %v2967_v42  ;;  %v2980_v21 = vsel %vm2976_vm2, %v2965_v9, %v2969_v10  ;;  %v7674_v7 = vld [vmem:[%s11320_s2 + $0x2a4] ss:$48 sps:$4 sm:$0xff]  }
 0x2c5   :  { %v2987_v49 = vadd.f32 %v2979_v16, %v9660_v55  ;;  %v2991_v22 = vadd.f32 %v2980_v21, %v9663_v3  ;;  %5497 = vmatprep.subr.bf16.mxu0 %v7674_v7  ;;  %v7680_v16 = vld [vmem:[%s11320_s2 + $0x244] ss:$48 sps:$4 sm:$0xff]   ;;  %v7732_v7 = vld [vmem:[%s11320_s2 + $0x4e0] ss:$48 sps:$4 sm:$0xff]  }
 0x2c6   :  { %v7683_v21 = vld [vmem:[%s11320_s2 + $0x844] ss:$48 sps:$4 sm:$0xff]  }
 0x2c7   :  { %v2971_v30 = vpop.permute.xlu0 %2970  ;;  %v2973_v33 = vpop.permute.xlu1 %2972  ;;  %v2995_v45 = vadd.f32 %v2987_v49, %v2986_v28  ;;  %v2999_v46 = vadd.f32 %v2991_v22, %v2990_v29 }
 0x2c8   :  { %v2977_v13 = vsel %vm2976_vm2, %v2967_v42, %v2971_v30  ;;  %v2983_v19 = vsel %vm2976_vm2, %v2971_v30, %v2959_v48  ;;  %v2978_v20 = vsel %vm2976_vm2, %v2969_v10, %v2973_v33  ;;  %v2984_v34 = vsel %vm2976_vm2, %v2973_v33, %v2961_v35  ;;  %v7672_v35 = vld [vmem:[%s11320_s2 + $0x2a0] ss:$48 sps:$4 sm:$0xff]   ;;  %v7677_v10 = vld [vmem:[%s11320_s2 + $0x8a4] ss:$48 sps:$4 sm:$0xff]  }
 0x2c9   :  { %v2985_v36 = vadd.f32 %v2983_v19, %v9633_v41  ;;  %v2988_v39 = vadd.f32 %v2977_v13, %v9672_v4  ;;  %v2989_v24 = vadd.f32 %v2984_v34, %v9631_v40  ;;  %v2992_v27 = vadd.f32 %v2978_v20, %v9675_v5  ;;  %v7675_v42 = vld [vmem:[%s11320_s2 + $0x8a0] ss:$48 sps:$4 sm:$0xff]   ;;  %5540 = vmatprep.subr.bf16.mxu1 %v7677_v10  ;;  %v7743_v10 = vld [vmem:[%s11320_s2 + $0xa84] ss:$48 sps:$4 sm:$0xff]  }
 0x2ca   :  { %5498 = vmatpush1.bf16.msra.mxu0 %v7672_v35  ;;  %5541 = vmatpush1.bf16.msra.mxu1 %v7675_v42  ;;  %v7684_v20 = vld [vmem:[%s11320_s2 + $0x1e0] ss:$48 sps:$4 sm:$0xff]   ;;  %v7734_v35 = vld [vmem:[%s11320_s2 + $0x4e4] ss:$48 sps:$4 sm:$0xff]  }
 0x2cb   :  { %v2993_v50 = vadd.f32 %v2988_v39, %v2985_v36  ;;  %v2994_v51 = vadd.f32 %v2986_v28, %v2985_v36  ;;  %v2996_v17 = vadd.f32 %v2988_v39, %v2987_v49  ;;  %v2997_v53 = vadd.f32 %v2992_v27, %v2989_v24  ;;  %v7678_v28 = vld [vmem:[%s11320_s2 + $0x240] ss:$48 sps:$4 sm:$0xff]   ;;  %5499 = vmatprep.subr.bf16.mxu0 %v7680_v16  ;;  %v7740_v42 = vld [vmem:[%s11320_s2 + $0x484] ss:$48 sps:$4 sm:$0xff]  }
 0x2cc   :  { %v2998_v56 = vadd.f32 %v2990_v29, %v2989_v24  ;;  %v3000_v12 = vadd.f32 %v2992_v27, %v2991_v22  ;;  %v7681_v29 = vld [vmem:[%s11320_s2 + $0x840] ss:$48 sps:$4 sm:$0xff]   ;;  %5542 = vmatprep.subr.bf16.mxu1 %v7683_v21 }
 0x2cd   :  { %v3001_v57 = vadd.f32 %v2995_v45, %v2993_v50  ;;  %v3002_v58 = vadd.f32 %v2996_v17, %v2994_v51  ;;  %v3003_v59 = vadd.f32 %v2999_v46, %v2997_v53  ;;  %v7687_v34 = vld [vmem:[%s11320_s2 + $0x7e0] ss:$48 sps:$4 sm:$0xff]  }
 0x2ce   :  { %v3004_v18 = vadd.f32 %v3000_v12, %v2998_v56  ;;  %5500 = vmatpush1.bf16.msra.mxu0 %v7678_v28  ;;  %5543 = vmatpush1.bf16.msra.mxu1 %v7681_v29  ;;  %v7690_v45 = vld [vmem:[%s11320_s2 + $0x180] ss:$48 sps:$4 sm:$0xff]   ;;  %v7704_v56 = vld [vmem:[%s11320_s2 + $0xc4] ss:$48 sps:$4 sm:$0xff]  }
 0x2cf   :  { %v3005_v61 = vadd.f32 %v3003_v59, %v3001_v57  ;;  %v7693_v46 = vld [vmem:[%s11320_s2 + $0x780] ss:$48 sps:$4 sm:$0xff]   ;;  %v7707_v12 = vld [vmem:[%s11320_s2 + $0x6c4] ss:$48 sps:$4 sm:$0xff]  }
 0x2d0   :  { %v3012_v63 = vadd.f32 %v3004_v18, %v3002_v58  ;;  %v7696_v17 = vld [vmem:[%s11320_s2 + $0x120] ss:$48 sps:$4 sm:$0xff]   ;;  %v7710_v59 = vld [vmem:[%s11320_s2 + $0x64] ss:$48 sps:$4 sm:$0xff]  }
 0x2d1   :  { %v3006_v37 = vrot.slane %v3005_v61, 4  ;;  %v7699_v53 = vld [vmem:[%s11320_s2 + $0x720] ss:$48 sps:$4 sm:$0xff]   ;;  %v7713_v18 = vld [vmem:[%s11320_s2 + $0x664] ss:$48 sps:$4 sm:$0xff]  }
 0x2d2   :  { %v3013_v38 = vrot.slane %v3012_v63, 4  ;;  %v7702_v57 = vld [vmem:[%s11320_s2 + $0xc0] ss:$48 sps:$4 sm:$0xff]   ;;  %v7746_v28 = vld [vmem:[%s11320_s2 + $0x424] ss:$48 sps:$4 sm:$0xff]  }
 0x2d3   :  { %v3007_v0 = vadd.f32 %v3006_v37, %v3005_v61  ;;  %v7705_v58 = vld [vmem:[%s11320_s2 + $0x6c0] ss:$48 sps:$4 sm:$0xff]   ;;  %v7716_v37 = vld [vmem:[%s11320_s2 + $0x4] ss:$48 sps:$4 sm:$0xff]  }
 0x2d4   :  { %v3014_v25 = vadd.f32 %v3013_v38, %v3012_v63  ;;  %v7708_v61 = vld [vmem:[%s11320_s2 + $0x60] ss:$48 sps:$4 sm:$0xff]   ;;  %v7719_v38 = vld [vmem:[%s11320_s2 + $0x604] ss:$48 sps:$4 sm:$0xff]  }
 0x2d5   :  { %v3008_v26 = vrot.slane %v3007_v0, 2  ;;  %v7711_v63 = vld [vmem:[%s11320_s2 + $0x660] ss:$48 sps:$4 sm:$0xff]   ;;  %v7749_v29 = vld [vmem:[%s11320_s2 + $0xa24] ss:$48 sps:$4 sm:$0xff]  }
 0x2d6   :  { %v3015_v43 = vrot.slane %v3014_v25, 2  ;;  %v7738_v16 = vld [vmem:[%s11320_s2 + $0x480] ss:$48 sps:$4 sm:$0xff]  }
 0x2d7   :  { %v3009_v44 = vadd.f32 %v3008_v26, %v3007_v0  ;;  %v7714_v0 = vld [vmem:[%s11320_s2] ss:$48 sps:$4 sm:$0xff]   ;;  %v7722_v26 = vld [vmem:[%s11320_s2 + $0x5a4] ss:$48 sps:$4 sm:$0xff]  }
 0x2d8   :  { %v3016_v1 = vadd.f32 %v3015_v43, %v3014_v25  ;;  %v7717_v25 = vld [vmem:[%s11320_s2 + $0x600] ss:$48 sps:$4 sm:$0xff]   ;;  %v7725_v43 = vld [vmem:[%s11320_s2 + $0xba4] ss:$48 sps:$4 sm:$0xff]  }
 0x2d9   :  { %v3010_v2 = vrot.slane %v3009_v44, 1  ;;  %v7741_v21 = vld [vmem:[%s11320_s2 + $0xa80] ss:$48 sps:$4 sm:$0xff]  }
 0x2da   :  { %v3017_v54 = vrot.slane %v3016_v1, 1 }
 0x2db   :  { %v3011_v31 = vadd.f32 %v3010_v2, %v3009_v44  ;;  %v7720_v44 = vld [vmem:[%s11320_s2 + $0x5a0] ss:$48 sps:$4 sm:$0xff]   ;;  %v7728_v2 = vld [vmem:[%s11320_s2 + $0x544] ss:$48 sps:$4 sm:$0xff]  }
 0x2dc   :  { %v3018_v32 = vadd.f32 %v3017_v54, %v3016_v1  ;;  %v7723_v1 = vld [vmem:[%s11320_s2 + $0xba0] ss:$48 sps:$4 sm:$0xff]   ;;  %v7731_v54 = vld [vmem:[%s11320_s2 + $0xb44] ss:$48 sps:$4 sm:$0xff]  }
 0x2dd   :  { %v3019_v48 = vmul.f32 0.0078125, %v3011_v31  ;;  %v7726_v31 = vld [vmem:[%s11320_s2 + $0x540] ss:$48 sps:$4 sm:$0xff]  }
 0x2de   :  { %v3020_v9 = vmul.f32 0.0078125, %v3018_v32  ;;  %v7729_v32 = vld [vmem:[%s11320_s2 + $0xb40] ss:$48 sps:$4 sm:$0xff]  }
 0x2df   :  { %v9722_v52 = vsub.f32 %v9631_v40, %v3019_v48  ;;  %v9725_v15 = vsub.f32 %v9633_v41, %v3019_v48  ;;  %v9772_v13 = vsub.f32 %v9663_v3, %v3019_v48  ;;  %v9775_v19 = vsub.f32 %v9660_v55, %v3019_v48  ;;  %v7692_v55 = vld [vmem:[%s11320_s2 + $0x184] ss:$48 sps:$4 sm:$0xff]  }
 0x2e0   :  { %v9742_v41 = vsub.f32 %v9643_v11, %v3020_v9  ;;  %v9745_v22 = vsub.f32 %v9641_v47, %v3020_v9  ;;  %v7686_v47 = vld [vmem:[%s11320_s2 + $0x1e4] ss:$48 sps:$4 sm:$0xff]   ;;  %v9802_v24 = vsub.f32 %v9675_v5, %v3020_v9  ;;  %v9805_v27 = vsub.f32 %v9672_v4, %v3020_v9  ;;  %v7735_v9 = vld [vmem:[%s11320_s2 + $0xae0] ss:$48 sps:$4 sm:$0xff]  }
 0x2e1   :  { %v9735_v49 = vmul.f32 %v9722_v52, %v9722_v52  ;;  %v9739_v40 = vmul.f32 %v9725_v15, %v9725_v15  ;;  %v7689_v11 = vld [vmem:[%s11320_s2 + $0x7e4] ss:$48 sps:$4 sm:$0xff]   ;;  %5501 = vmatprep.subr.bf16.mxu0 %v7686_v47  ;;  %v9795_v36 = vmul.f32 %v9772_v13, %v9772_v13  ;;  %v9799_v39 = vmul.f32 %v9775_v19, %v9775_v19  ;;  %v7744_v47 = vld [vmem:[%s11320_s2 + $0x420] ss:$48 sps:$4 sm:$0xff]  }
 0x2e2   :  { %v9765_v30 = vmul.f32 %v9742_v41, %v9742_v41  ;;  %v9769_v33 = vmul.f32 %v9745_v22, %v9745_v22  ;;  %5544 = vmatprep.subr.bf16.mxu1 %v7689_v11  ;;  %v7695_v3 = vld [vmem:[%s11320_s2 + $0x784] ss:$48 sps:$4 sm:$0xff]   ;;  %5502 = vmatpush1.bf16.msra.mxu0 %v7684_v20  ;;  %v9825_v50 = vmul.f32 %v9802_v24, %v9802_v24  ;;  %v7747_v11 = vld [vmem:[%s11320_s2 + $0xa20] ss:$48 sps:$4 sm:$0xff]  }
 0x2e3   :  { %3039 = vrot.lane.b32.xlu1 %v9735_v49, %s8265_s1  ;;  %3037 = vrot.lane.b32.xlu0 %v9739_v40, %s8265_s1  ;;  %v7698_v4 = vld [vmem:[%s11320_s2 + $0x124] ss:$48 sps:$4 sm:$0xff]   ;;  %v9829_v51 = vmul.f32 %v9805_v27, %v9805_v27 }
 0x2e4   :  { %5545 = vmatpush1.bf16.msra.mxu1 %v7687_v34  ;;  %5503 = vmatprep.subr.bf16.mxu0 %v7692_v55  ;;  %v7701_v5 = vld [vmem:[%s11320_s2 + $0x724] ss:$48 sps:$4 sm:$0xff]   ;;  %v7750_v55 = vld [vmem:[%s11320_s2 + $0x3c0] ss:$48 sps:$4 sm:$0xff]  }
 0x2e5   :  { %5546 = vmatprep.subr.bf16.mxu1 %v7695_v3  ;;  %v7737_v48 = vld [vmem:[%s11320_s2 + $0xae4] ss:$48 sps:$4 sm:$0xff]   ;;  %v7753_v3 = vld [vmem:[%s11320_s2 + $0x9c0] ss:$48 sps:$4 sm:$0xff]  }
 0x2e6   :  { %5504 = vmatpush1.bf16.msra.mxu0 %v7690_v45  ;;  %v7752_v20 = vld [vmem:[%s11320_s2 + $0x3c4] ss:$48 sps:$4 sm:$0xff]  }
 0x2e7   :  { %3043 = vrot.lane.b32.xlu1 %v9765_v30, %s8265_s1  ;;  %3041 = vrot.lane.b32.xlu0 %v9769_v33, %s8265_s1  ;;  %v7755_v34 = vld [vmem:[%s11320_s2 + $0x9c4] ss:$48 sps:$4 sm:$0xff]  }
 0x2e8   :  { %5547 = vmatpush1.bf16.msra.mxu1 %v7693_v46  ;;  %5505 = vmatprep.subr.bf16.mxu0 %v7698_v4  ;;  %v7758_v45 = vld [vmem:[%s11320_s2 + $0x364] ss:$48 sps:$4 sm:$0xff]   ;;  %v7756_v4 = vld [vmem:[%s11320_s2 + $0x360] ss:$48 sps:$4 sm:$0xff]  }
 0x2e9   :  { %5548 = vmatprep.subr.bf16.mxu1 %v7701_v5  ;;  %v7761_v46 = vld [vmem:[%s11320_s2 + $0x964] ss:$48 sps:$4 sm:$0xff]   ;;  %v7759_v5 = vld [vmem:[%s11320_s2 + $0x960] ss:$48 sps:$4 sm:$0xff]  }
 0x2ea   :  { %5506 = vmatpush1.bf16.msra.mxu0 %v7696_v17  ;;  %v7764_v17 = vld [vmem:[%s11320_s2 + $0x304] ss:$48 sps:$4 sm:$0xff]  }
 0x2eb   :  { %3047 = vrot.lane.b32.xlu1 %v9795_v36, %s8265_s1  ;;  %3045 = vrot.lane.b32.xlu0 %v9799_v39, %s8265_s1 }
 0x2ec   :  { %5549 = vmatpush1.bf16.msra.mxu1 %v7699_v53  ;;  %5507 = vmatprep.subr.bf16.mxu0 %v7704_v56  ;;  %v7767_v53 = vld [vmem:[%s11320_s2 + $0x904] ss:$48 sps:$4 sm:$0xff]   ;;  %v7762_v56 = vld [vmem:[%s11320_s2 + $0x300] ss:$48 sps:$4 sm:$0xff]  }
 0x2ed   :  { %5550 = vmatprep.subr.bf16.mxu1 %v7707_v12  ;;  %v7765_v12 = vld [vmem:[%s11320_s2 + $0x900] ss:$48 sps:$4 sm:$0xff]  }
 0x2ee   :  { %5508 = vmatpush1.bf16.msra.mxu0 %v7702_v57  ;;  %v7770_v57 = vld [vmem:[%s11320_s2 + $0x2ac] ss:$48 sps:$4 sm:$0xff]  }
 0x2ef   :  { %3051 = vrot.lane.b32.xlu1 %v9825_v50, %s8265_s1  ;;  %3049 = vrot.lane.b32.xlu0 %v9829_v51, %s8265_s1 }
 0x2f0   :  { %5551 = vmatpush1.bf16.msra.mxu1 %v7705_v58  ;;  %5509 = vmatprep.subr.bf16.mxu0 %v7710_v59  ;;  %v7773_v58 = vld [vmem:[%s11320_s2 + $0x8ac] ss:$48 sps:$4 sm:$0xff]  }
 0x2f1   :  { %5552 = vmatprep.subr.bf16.mxu1 %v7713_v18 }
 0x2f2   :  { %5510 = vmatpush1.bf16.msra.mxu0 %v7708_v61 }
 0x2f3   :  { %5511 = vmatprep.subr.bf16.mxu0 %v7716_v37 }
 0x2f4   :  { %5553 = vmatpush1.bf16.msra.mxu1 %v7711_v63 }
 0x2f5   :  { %5554 = vmatprep.subr.bf16.mxu1 %v7719_v38 }
 0x2f6   :  { %5512 = vmatpush1.bf16.msra.mxu0 %v7714_v0 }
 0x2f7   :  { %5513 = vmatprep.subr.bf16.mxu0 %v7722_v26 }
 0x2f8   :  { %5555 = vmatpush1.bf16.msra.mxu1 %v7717_v25 }
 0x2f9   :  { %5556 = vmatprep.subr.bf16.mxu1 %v7725_v43 }
 0x2fa   :  { %5514 = vmatpush2.bf16.msra.mxu0 %v7720_v44 }
 0x2fb   :  { %5515 = vmatprep.subr.bf16.mxu0 %v7728_v2 }
 0x2fc   :  { %5557 = vmatpush2.bf16.msra.mxu1 %v7723_v1 }
 0x2fd   :  { %5558 = vmatprep.subr.bf16.mxu1 %v7731_v54 }
 0x2fe   :  { %5516 = vmatpush2.bf16.msra.mxu0 %v7726_v31 }
 0x2ff   :  { %5517 = vmatprep.subr.bf16.mxu0 %v7734_v35 }
 0x300   :  { %5559 = vmatpush2.bf16.msra.mxu1 %v7729_v32 }
 0x301   :  { %5560 = vmatprep.subr.bf16.mxu1 %v7737_v48 }
 0x302   :  { %5518 = vmatpush2.bf16.msra.mxu0 %v7732_v7 }
 0x303   :  { %5519 = vmatprep.subr.bf16.mxu0 %v7740_v42 }
 0x304   :  { %5561 = vmatpush2.bf16.msra.mxu1 %v7735_v9 }
 0x305   :  { %5562 = vmatprep.subr.bf16.mxu1 %v7743_v10 }
 0x306   :  { %5520 = vmatpush2.bf16.msra.mxu0 %v7738_v16 }
 0x307   :  { %5521 = vmatprep.subr.bf16.mxu0 %v7746_v28 }
 0x308   :  { %5563 = vmatpush2.bf16.msra.mxu1 %v7741_v21 }
 0x309   :  { %5564 = vmatprep.subr.bf16.mxu1 %v7749_v29 }
 0x30a   :  { %5522 = vmatpush2.bf16.msra.mxu0 %v7744_v47 }
 0x30b   :  { %5523 = vmatprep.subr.bf16.mxu0 %v7752_v20 }
 0x30c   :  { %5565 = vmatpush2.bf16.msra.mxu1 %v7747_v11 }
 0x30d   :  { %5566 = vmatprep.subr.bf16.mxu1 %v7755_v34 }
 0x30e   :  { %5524 = vmatpush2.bf16.msra.mxu0 %v7750_v55 }
 0x30f   :  { %5525 = vmatprep.subr.bf16.mxu0 %v7758_v45 }
 0x310   :  { %5567 = vmatpush2.bf16.msra.mxu1 %v7753_v3 }
 0x311   :  { %5568 = vmatprep.subr.bf16.mxu1 %v7761_v46 }
 0x312   :  { %5526 = vmatpush2.bf16.msra.mxu0 %v7756_v4 }
 0x313   :  { %5527 = vmatprep.subr.bf16.mxu0 %v7764_v17 }
 0x314   :  { %5569 = vmatpush2.bf16.msra.mxu1 %v7759_v5 }
 0x315   :  { %5570 = vmatprep.subr.bf16.mxu1 %v7767_v53 }
 0x316   :  { %5528 = vmatpush2.bf16.msra.mxu0 %v7762_v56 }
 0x317   :  { %5583 = vmatprep.subr.bf16.mxu0 %v7770_v57 }
 0x318   :  { %5571 = vmatpush2.bf16.msra.mxu1 %v7765_v12 }
 0x319   :  { %5626 = vmatprep.subr.bf16.mxu1 %v7773_v58 }
 0x355   :  { %v3040_v59 = vpop.permute.xlu1 %3039  ;;  %v3038_v18 = vpop.permute.xlu0 %3037 }
 0x359   :  { %v3044_v61 = vpop.permute.xlu1 %3043  ;;  %v3042_v63 = vpop.permute.xlu0 %3041 }
 0x35a   :  { %v3058_v0 = vsel %vm2976_vm2, %v3040_v59, %v3044_v61  ;;  %v3057_v25 = vsel %vm2976_vm2, %v3038_v18, %v3042_v63 }
 0x35b   :  { %v3066_v2 = vadd.f32 %v3058_v0, %v9765_v30  ;;  %v3062_v54 = vadd.f32 %v3057_v25, %v9769_v33 }
 0x35d   :  { %v3048_v37 = vpop.permute.xlu1 %3047  ;;  %v3046_v38 = vpop.permute.xlu0 %3045 }
 0x35e   :  { %v3056_v26 = vsel %vm2976_vm2, %v3044_v61, %v3048_v37  ;;  %v3055_v43 = vsel %vm2976_vm2, %v3042_v63, %v3046_v38 }
 0x35f   :  { %v3067_v44 = vadd.f32 %v3056_v26, %v9795_v36  ;;  %v3063_v1 = vadd.f32 %v3055_v43, %v9799_v39 }
 0x361   :  { %v3052_v31 = vpop.permute.xlu1 %3051  ;;  %v3050_v32 = vpop.permute.xlu0 %3049  ;;  %v3075_v42 = vadd.f32 %v3067_v44, %v3066_v2  ;;  %v3071_v10 = vadd.f32 %v3063_v1, %v3062_v54 }
 0x362   :  { %v3054_v35 = vsel %vm2976_vm2, %v3048_v37, %v3052_v31  ;;  %v3060_v48 = vsel %vm2976_vm2, %v3052_v31, %v3040_v59  ;;  %v3053_v7 = vsel %vm2976_vm2, %v3046_v38, %v3050_v32  ;;  %v3059_v36 = vsel %vm2976_vm2, %v3050_v32, %v3038_v18  ;;  %v49_v31 = vld [vmem:[%s11322_s4] sm:$0xf] }
 0x363   :  { %v3065_v39 = vadd.f32 %v3060_v48, %v9735_v49  ;;  %v3068_v30 = vadd.f32 %v3054_v35, %v9825_v50  ;;  %v3061_v33 = vadd.f32 %v3059_v36, %v9739_v40  ;;  %v3064_v9 = vadd.f32 %v3053_v7, %v9829_v51 }
 0x364   :  { %v8266_v37 = vmov 1966171168   ;;  %v10014_v32 = vsub.s32 1, %v9390_v62  ;;  %v10018_v48 = vsub.s32 3, %v9390_v62  ;;  %v10021_v7 = vsub.s32 0, %v9390_v62 }
 0x365   :  { %v3073_v16 = vadd.f32 %v3068_v30, %v3065_v39  ;;  %v3074_v21 = vadd.f32 %v3066_v2, %v3065_v39  ;;  %v3076_v28 = vadd.f32 %v3068_v30, %v3067_v44  ;;  %v3069_v29 = vadd.f32 %v3064_v9, %v3061_v33  ;;  %v48_v2 = vld [vmem:[%s11321_s3] sm:$0xf] }
 0x366   :  { %v3070_v47 = vadd.f32 %v3062_v54, %v3061_v33  ;;  %v3072_v11 = vadd.f32 %v3064_v9, %v3063_v1  ;;  %v3105_v38 = vunpack.c.l.s4 %v8266_v37  ;;  %v10024_v36 = vsub.s32 2, %v9390_v62  ;;  %v7777_v37 = vld [vmem:[%s11320_s2 + $0x848] ss:$48 sps:$4 sm:$0xff]  }
 0x367   :  { %v3079_v20 = vadd.f32 %v3075_v42, %v3073_v16  ;;  %v3080_v34 = vadd.f32 %v3076_v28, %v3074_v21  ;;  %v3077_v55 = vadd.f32 %v3071_v10, %v3069_v29  ;;  %v3158_v30 = vrot.slane %v49_v31, %v10014_v32 }
 0x368   :  { %v3078_v3 = vadd.f32 %v3072_v11, %v3070_v47  ;;  %v3106_v0 = vunpack.c.0.s8 %v3105_v38  ;;  %v3166_v33 = vrot.slane %v49_v31, %v10018_v48  ;;  %v3154_v21 = vrot.slane %v49_v31, %v10021_v7  ;;  %v7782_v38 = vld [vmem:[%s11320_s2 + $0x1ec] ss:$48 sps:$4 sm:$0xff]  }
 0x369   :  { %v3081_v45 = vadd.f32 %v3079_v20, %v3077_v55  ;;  %v3162_v28 = vrot.slane %v49_v31, %v10024_v36  ;;  %v7794_v31 = vld [vmem:[%s11320_s2 + $0x12c] ss:$48 sps:$4 sm:$0xff]  }
 0x36a   :  { %v3088_v49 = vadd.f32 %v3080_v34, %v3078_v3  ;;  %v10004_v26 = vsub.s32 %v3106_v0, %v9390_v62  ;;  %v7785_v0 = vld [vmem:[%s11320_s2 + $0x7ec] ss:$48 sps:$4 sm:$0xff]  }
 0x36b   :  { %v3082_v46 = vrot.slane %v3081_v45, 4 }
 0x36c   :  { %v3089_v50 = vrot.slane %v3088_v49, 4 }
 0x36d   :  { %v3083_v4 = vadd.f32 %v3082_v46, %v3081_v45 }
 0x36e   :  { %v3090_v40 = vadd.f32 %v3089_v50, %v3088_v49 }
 0x36f   :  { %v3084_v5 = vrot.slane %v3083_v4, 2 }
 0x370   :  { %v3091_v51 = vrot.slane %v3090_v40, 2 }
 0x371   :  { %v3085_v17 = vadd.f32 %v3084_v5, %v3083_v4 }
 0x372   :  { %v3092_v53 = vadd.f32 %v3091_v51, %v3090_v40 }
 0x373   :  { %v3086_v56 = vrot.slane %v3085_v17, 1 }
 0x374   :  { %v3093_v12 = vrot.slane %v3092_v53, 1 }
 0x375   :  { %v3087_v57 = vadd.f32 %v3086_v56, %v3085_v17 }
 0x376   :  { %v3094_v58 = vadd.f32 %v3093_v12, %v3092_v53 }
 0x377   :  { %v3095_v59 = vmul.f32 0.0078125, %v3087_v57 }
 0x378   :  { %v3096_v18 = vmul.f32 0.0078125, %v3094_v58 }
 0x379   :  { %v3097_v61 = vadd.f32 1e-05, %v3095_v59 }
 0x37a   :  { %v3098_v63 = vadd.f32 1e-05, %v3096_v18  ;;  %v7774_v18 = vld [vmem:[%s11320_s2 + $0x248] ss:$48 sps:$4 sm:$0xff]  }
 0x37b   :  { %8248 = vrsqrt.f32 %v3097_v61  ;;  %v7776_v61 = vld [vmem:[%s11320_s2 + $0x24c] ss:$48 sps:$4 sm:$0xff]  }
 0x37c   :  { %8250 = vrsqrt.f32 %v3098_v63  ;;  %v7779_v63 = vld [vmem:[%s11320_s2 + $0x84c] ss:$48 sps:$4 sm:$0xff]  }
 0x388   :  { %v8249_v25 = vpop.eup %8248 }
 0x389   :  { %v8251_v43 = vpop.eup %8250 }
 0x38a   :  { %v3103_v44 = vcombine.low %v8249_v25, %v8251_v43  ;;  %v7780_v25 = vld [vmem:[%s11320_s2 + $0x1e8] ss:$48 sps:$4 sm:$0xff]  }
 0x38b   :  { %v7783_v43 = vld [vmem:[%s11320_s2 + $0x7e8] ss:$48 sps:$4 sm:$0xff]  }
 0x38c   :  { %v3110_v1 = vrot.slane %v3103_v44, %v10004_v26  ;;  %v7788_v44 = vld [vmem:[%s11320_s2 + $0x18c] ss:$48 sps:$4 sm:$0xff]  }
 0x38e   :  { %v3111_v54 = vcombine.low %v3110_v1, %v3110_v1  ;;  %v7791_v1 = vld [vmem:[%s11320_s2 + $0x78c] ss:$48 sps:$4 sm:$0xff]  }
 0x390   :  { %v3118_v35 = vrot.slane %v3111_v54, %v10004_v26  ;;  %v7789_v54 = vld [vmem:[%s11320_s2 + $0x788] ss:$48 sps:$4 sm:$0xff]  }
 0x392   :  { %v3120_v39 = vmul.f32 %v3118_v35, %v48_v2  ;;  %v7786_v2 = vld [vmem:[%s11320_s2 + $0x188] ss:$48 sps:$4 sm:$0xff]   ;;  %v7797_v35 = vld [vmem:[%s11320_s2 + $0x72c] ss:$48 sps:$4 sm:$0xff]  }
 0x394   :  { %v3129_v9 = vrot.slane %v3120_v39, %v10014_v32  ;;  %v3137_v42 = vrot.slane %v3120_v39, %v10018_v48  ;;  %v3125_v10 = vrot.slane %v3120_v39, %v10021_v7  ;;  %v3133_v16 = vrot.slane %v3120_v39, %v10024_v36  ;;  %v7792_v39 = vld [vmem:[%s11320_s2 + $0x128] ss:$48 sps:$4 sm:$0xff]  }
 0x396   :  { %v3143_v29 = vmul.f32 %v3129_v9, %v9745_v22  ;;  %v3147_v47 = vmul.f32 %v3129_v9, %v9742_v41  ;;  %v3145_v11 = vmul.f32 %v3137_v42, %v9805_v27  ;;  %v3149_v20 = vmul.f32 %v3137_v42, %v9802_v24  ;;  %v7803_v9 = vld [vmem:[%s11320_s2 + $0x6cc] ss:$48 sps:$4 sm:$0xff]   ;;  %v7798_v42 = vld [vmem:[%s11320_s2 + $0xc8] ss:$48 sps:$4 sm:$0xff]  }
 0x397   :  { %v3142_v34 = vmul.f32 %v3125_v10, %v9725_v15  ;;  %v3146_v55 = vmul.f32 %v3125_v10, %v9722_v52  ;;  %v3144_v3 = vmul.f32 %v3133_v16, %v9775_v19  ;;  %v3148_v45 = vmul.f32 %v3133_v16, %v9772_v13  ;;  %v7768_v52 = vld [vmem:[%s11320_s2 + $0x2a8] ss:$48 sps:$4 sm:$0xff]   ;;  %v7806_v16 = vld [vmem:[%s11320_s2 + $0x6c] ss:$48 sps:$4 sm:$0xff]  }
 0x398   :  { %v3172_v49 = vadd.f32 %v3158_v30, %v3143_v29  ;;  %v3176_v46 = vadd.f32 %v3158_v30, %v3147_v47  ;;  %v3174_v50 = vadd.f32 %v3166_v33, %v3145_v11  ;;  %v3178_v4 = vadd.f32 %v3166_v33, %v3149_v20  ;;  %v7771_v15 = vld [vmem:[%s11320_s2 + $0x8a8] ss:$48 sps:$4 sm:$0xff]   ;;  %v7800_v33 = vld [vmem:[%s11320_s2 + $0xcc] ss:$48 sps:$4 sm:$0xff]  }
 0x399   :  { %v3171_v40 = vadd.f32 %v3154_v21, %v3142_v34  ;;  %v3175_v22 = vadd.f32 %v3154_v21, %v3146_v55  ;;  %v3173_v5 = vadd.f32 %v3162_v28, %v3144_v3  ;;  %v3177_v41 = vadd.f32 %v3162_v28, %v3148_v45  ;;  %v7795_v30 = vld [vmem:[%s11320_s2 + $0x728] ss:$48 sps:$4 sm:$0xff]   ;;  %v7809_v21 = vld [vmem:[%s11320_s2 + $0x66c] ss:$48 sps:$4 sm:$0xff]  }
 0x39a   :  { %v3180_v51 = vmax.f32 %v3172_v49, 0.0  ;;  %v3184_v27 = vmax.f32 %v3176_v46, 0.0  ;;  %v3182_v17 = vmax.f32 %v3174_v50, 0.0  ;;  %v3186_v24 = vmax.f32 %v3178_v4, 0.0  ;;  %v7801_v10 = vld [vmem:[%s11320_s2 + $0x6c8] ss:$48 sps:$4 sm:$0xff]  }
 0x39b   :  { %v3179_v13 = vmax.f32 %v3171_v40, 0.0  ;;  %v3183_v19 = vmax.f32 %v3175_v22, 0.0  ;;  %v3181_v53 = vmax.f32 %v3173_v5, 0.0  ;;  %v3185_v56 = vmax.f32 %v3177_v41, 0.0  ;;  %v7804_v28 = vld [vmem:[%s11320_s2 + $0x68] ss:$48 sps:$4 sm:$0xff]  }
 0x39c   :  { %v10048_v12 = vpack.c.bf16 %v3184_v27, %v3180_v51  ;;  %v10050_v57 = vpack.c.bf16 %v3186_v24, %v3182_v17  ;;  %v7807_v29 = vld [vmem:[%s11320_s2 + $0x668] ss:$48 sps:$4 sm:$0xff]   ;;  %v7812_v47 = vld [vmem:[%s11320_s2 + $0xc] ss:$48 sps:$4 sm:$0xff]  }
 0x39d   :  { %v10052_v58 = vpack.c.bf16 %v3183_v19, %v3179_v13  ;;  %v10054_v59 = vpack.c.bf16 %v3185_v56, %v3181_v53  ;;  %v7815_v11 = vld [vmem:[%s11320_s2 + $0x60c] ss:$48 sps:$4 sm:$0xff]   ;;  %v7810_v20 = vld [vmem:[%s11320_s2 + $0x8] ss:$48 sps:$4 sm:$0xff]  }
 0x39e   :  { %5529 = vmatprep.mubr.bf16.mxu0 %v10048_v12  ;;  %5572 = vmatprep.mubr.bf16.mxu1 %v10050_v57  ;;  %v7813_v34 = vld [vmem:[%s11320_s2 + $0x608] ss:$48 sps:$4 sm:$0xff]   ;;  %v7818_v55 = vld [vmem:[%s11320_s2 + $0x5ac] ss:$48 sps:$4 sm:$0xff]  }
 0x39f   :  { %5530 = vmatmul.mubr.bf16.vlgmr.msra.gmra.mxu0 %v10052_v58  ;;  %5573 = vmatmul.mubr.bf16.vlgmr.msra.gmra.mxu1 %v10054_v59  ;;  %v7821_v3 = vld [vmem:[%s11320_s2 + $0xbac] ss:$48 sps:$4 sm:$0xff]   ;;  %v7816_v45 = vld [vmem:[%s11320_s2 + $0x5a8] ss:$48 sps:$4 sm:$0xff]  }
 0x3a0   :  { %5584 = vmatpush1.bf16.msra.mxu0 %v7768_v52  ;;  %5627 = vmatpush1.bf16.msra.mxu1 %v7771_v15  ;;  %v7819_v49 = vld [vmem:[%s11320_s2 + $0xba8] ss:$48 sps:$4 sm:$0xff]   ;;  %v7824_v46 = vld [vmem:[%s11320_s2 + $0x54c] ss:$48 sps:$4 sm:$0xff]  }
 0x3a1   :  { %5615 = vmatprep.mubr.bf16.mxu0 %v10048_v12  ;;  %5658 = vmatprep.mubr.bf16.mxu1 %v10050_v57  ;;  %v7827_v50 = vld [vmem:[%s11320_s2 + $0xb4c] ss:$48 sps:$4 sm:$0xff]   ;;  %v7822_v4 = vld [vmem:[%s11320_s2 + $0x548] ss:$48 sps:$4 sm:$0xff]  }
 0x3a2   :  { %5585 = vmatprep.subr.bf16.mxu0 %v7776_v61  ;;  %5628 = vmatprep.subr.bf16.mxu1 %v7779_v63  ;;  %v7825_v40 = vld [vmem:[%s11320_s2 + $0xb48] ss:$48 sps:$4 sm:$0xff]   ;;  %v7830_v22 = vld [vmem:[%s11320_s2 + $0x4ec] ss:$48 sps:$4 sm:$0xff]  }
 0x3a3   :  { %v7833_v5 = vld [vmem:[%s11320_s2 + $0xaec] ss:$48 sps:$4 sm:$0xff]   ;;  %v7828_v41 = vld [vmem:[%s11320_s2 + $0x4e8] ss:$48 sps:$4 sm:$0xff]  }
 0x3a4   :  { %5586 = vmatpush1.bf16.msra.mxu0 %v7774_v18  ;;  %5629 = vmatpush1.bf16.msra.mxu1 %v7777_v37  ;;  %v7831_v51 = vld [vmem:[%s11320_s2 + $0xae8] ss:$48 sps:$4 sm:$0xff]   ;;  %v7836_v27 = vld [vmem:[%s11320_s2 + $0x48c] ss:$48 sps:$4 sm:$0xff]  }
 0x3a5   :  { %5587 = vmatprep.subr.bf16.mxu0 %v7782_v38  ;;  %5630 = vmatprep.subr.bf16.mxu1 %v7785_v0  ;;  %v7839_v17 = vld [vmem:[%s11320_s2 + $0xa8c] ss:$48 sps:$4 sm:$0xff]   ;;  %v7834_v24 = vld [vmem:[%s11320_s2 + $0x488] ss:$48 sps:$4 sm:$0xff]  }
 0x3a6   :  { %v7837_v52 = vld [vmem:[%s11320_s2 + $0xa88] ss:$48 sps:$4 sm:$0xff]   ;;  %v7842_v15 = vld [vmem:[%s11320_s2 + $0x42c] ss:$48 sps:$4 sm:$0xff]  }
 0x3a7   :  { %v7845_v13 = vld [vmem:[%s11320_s2 + $0xa2c] ss:$48 sps:$4 sm:$0xff]   ;;  %v7840_v19 = vld [vmem:[%s11320_s2 + $0x428] ss:$48 sps:$4 sm:$0xff]  }
 0x3a8   :  { %5588 = vmatpush1.bf16.msra.mxu0 %v7780_v25  ;;  %5631 = vmatpush1.bf16.msra.mxu1 %v7783_v43  ;;  %v7843_v53 = vld [vmem:[%s11320_s2 + $0xa28] ss:$48 sps:$4 sm:$0xff]   ;;  %v7848_v56 = vld [vmem:[%s11320_s2 + $0x3cc] ss:$48 sps:$4 sm:$0xff]  }
 0x3a9   :  { %5589 = vmatprep.subr.bf16.mxu0 %v7788_v44  ;;  %5632 = vmatprep.subr.bf16.mxu1 %v7791_v1  ;;  %v7851_v18 = vld [vmem:[%s11320_s2 + $0x9cc] ss:$48 sps:$4 sm:$0xff]   ;;  %v7846_v61 = vld [vmem:[%s11320_s2 + $0x3c8] ss:$48 sps:$4 sm:$0xff]  }
 0x3aa   :  { %v7849_v63 = vld [vmem:[%s11320_s2 + $0x9c8] ss:$48 sps:$4 sm:$0xff]   ;;  %v7854_v37 = vld [vmem:[%s11320_s2 + $0x36c] ss:$48 sps:$4 sm:$0xff]  }
 0x3ab   :  { %v7857_v38 = vld [vmem:[%s11320_s2 + $0x96c] ss:$48 sps:$4 sm:$0xff]   ;;  %v7852_v0 = vld [vmem:[%s11320_s2 + $0x368] ss:$48 sps:$4 sm:$0xff]  }
 0x3ac   :  { %5590 = vmatpush1.bf16.msra.mxu0 %v7786_v2  ;;  %5633 = vmatpush1.bf16.msra.mxu1 %v7789_v54  ;;  %v7855_v25 = vld [vmem:[%s11320_s2 + $0x968] ss:$48 sps:$4 sm:$0xff]   ;;  %v7860_v43 = vld [vmem:[%s11320_s2 + $0x30c] ss:$48 sps:$4 sm:$0xff]   ;;  %v7866_v54 = vld [vmem:[%s11320_s2 + $0x2b4] ss:$48 sps:$4 sm:$0xff]  }
 0x3ad   :  { %5591 = vmatprep.subr.bf16.mxu0 %v7794_v31  ;;  %5634 = vmatprep.subr.bf16.mxu1 %v7797_v35  ;;  %v7863_v44 = vld [vmem:[%s11320_s2 + $0x90c] ss:$48 sps:$4 sm:$0xff]   ;;  %v7858_v1 = vld [vmem:[%s11320_s2 + $0x308] ss:$48 sps:$4 sm:$0xff]   ;;  %v7869_v31 = vld [vmem:[%s11320_s2 + $0x8b4] ss:$48 sps:$4 sm:$0xff]  }
 0x3ae   :  { %v7861_v2 = vld [vmem:[%s11320_s2 + $0x908] ss:$48 sps:$4 sm:$0xff]   ;;  %v7864_v35 = vld [vmem:[%s11320_s2 + $0x2b0] ss:$48 sps:$4 sm:$0xff]  }
 0x3b0   :  { %5592 = vmatpush1.bf16.msra.mxu0 %v7792_v39  ;;  %5635 = vmatpush1.bf16.msra.mxu1 %v7795_v30  ;;  %v7867_v39 = vld [vmem:[%s11320_s2 + $0x8b0] ss:$48 sps:$4 sm:$0xff]   ;;  %v7872_v30 = vld [vmem:[%s11320_s2 + $0x254] ss:$48 sps:$4 sm:$0xff]  }
 0x3b1   :  { %5593 = vmatprep.subr.bf16.mxu0 %v7800_v33  ;;  %5636 = vmatprep.subr.bf16.mxu1 %v7803_v9  ;;  %v7875_v33 = vld [vmem:[%s11320_s2 + $0x854] ss:$48 sps:$4 sm:$0xff]   ;;  %v7870_v9 = vld [vmem:[%s11320_s2 + $0x250] ss:$48 sps:$4 sm:$0xff]  }
 0x3b4   :  { %5594 = vmatpush1.bf16.msra.mxu0 %v7798_v42  ;;  %5637 = vmatpush1.bf16.msra.mxu1 %v7801_v10  ;;  %v7873_v42 = vld [vmem:[%s11320_s2 + $0x850] ss:$48 sps:$4 sm:$0xff]   ;;  %v7878_v10 = vld [vmem:[%s11320_s2 + $0x1f4] ss:$48 sps:$4 sm:$0xff]  }
 0x3b5   :  { %5595 = vmatprep.subr.bf16.mxu0 %v7806_v16  ;;  %5638 = vmatprep.subr.bf16.mxu1 %v7809_v21  ;;  %v7881_v16 = vld [vmem:[%s11320_s2 + $0x7f4] ss:$48 sps:$4 sm:$0xff]   ;;  %v7876_v21 = vld [vmem:[%s11320_s2 + $0x1f0] ss:$48 sps:$4 sm:$0xff]  }
 0x3b8   :  { %5596 = vmatpush1.bf16.msra.mxu0 %v7804_v28  ;;  %5639 = vmatpush1.bf16.msra.mxu1 %v7807_v29  ;;  %v7879_v28 = vld [vmem:[%s11320_s2 + $0x7f0] ss:$48 sps:$4 sm:$0xff]   ;;  %v7884_v29 = vld [vmem:[%s11320_s2 + $0x194] ss:$48 sps:$4 sm:$0xff]  }
 0x3b9   :  { %5597 = vmatprep.subr.bf16.mxu0 %v7812_v47  ;;  %5640 = vmatprep.subr.bf16.mxu1 %v7815_v11  ;;  %v7887_v47 = vld [vmem:[%s11320_s2 + $0x794] ss:$48 sps:$4 sm:$0xff]   ;;  %v7882_v11 = vld [vmem:[%s11320_s2 + $0x190] ss:$48 sps:$4 sm:$0xff]  }
 0x3bc   :  { %5598 = vmatpush1.bf16.msra.mxu0 %v7810_v20  ;;  %5641 = vmatpush1.bf16.msra.mxu1 %v7813_v34  ;;  %v7885_v20 = vld [vmem:[%s11320_s2 + $0x790] ss:$48 sps:$4 sm:$0xff]   ;;  %v7890_v34 = vld [vmem:[%s11320_s2 + $0x134] ss:$48 sps:$4 sm:$0xff]  }
 0x3bd   :  { %5599 = vmatprep.subr.bf16.mxu0 %v7818_v55  ;;  %5642 = vmatprep.subr.bf16.mxu1 %v7821_v3  ;;  %v7893_v55 = vld [vmem:[%s11320_s2 + $0x734] ss:$48 sps:$4 sm:$0xff]   ;;  %v7888_v3 = vld [vmem:[%s11320_s2 + $0x130] ss:$48 sps:$4 sm:$0xff]  }
 0x3c0   :  { %5600 = vmatpush2.bf16.msra.mxu0 %v7816_v45  ;;  %5643 = vmatpush2.bf16.msra.mxu1 %v7819_v49  ;;  %v7891_v45 = vld [vmem:[%s11320_s2 + $0x730] ss:$48 sps:$4 sm:$0xff]   ;;  %v7896_v49 = vld [vmem:[%s11320_s2 + $0xd4] ss:$48 sps:$4 sm:$0xff]  }
 0x3c1   :  { %5601 = vmatprep.subr.bf16.mxu0 %v7824_v46  ;;  %5644 = vmatprep.subr.bf16.mxu1 %v7827_v50  ;;  %v7899_v46 = vld [vmem:[%s11320_s2 + $0x6d4] ss:$48 sps:$4 sm:$0xff]   ;;  %v7894_v50 = vld [vmem:[%s11320_s2 + $0xd0] ss:$48 sps:$4 sm:$0xff]  }
 0x3c4   :  { %5602 = vmatpush2.bf16.msra.mxu0 %v7822_v4  ;;  %5645 = vmatpush2.bf16.msra.mxu1 %v7825_v40  ;;  %v7897_v4 = vld [vmem:[%s11320_s2 + $0x6d0] ss:$48 sps:$4 sm:$0xff]   ;;  %v7902_v40 = vld [vmem:[%s11320_s2 + $0x74] ss:$48 sps:$4 sm:$0xff]  }
 0x3c5   :  { %5603 = vmatprep.subr.bf16.mxu0 %v7830_v22  ;;  %5646 = vmatprep.subr.bf16.mxu1 %v7833_v5  ;;  %v7905_v22 = vld [vmem:[%s11320_s2 + $0x674] ss:$48 sps:$4 sm:$0xff]   ;;  %v7900_v5 = vld [vmem:[%s11320_s2 + $0x70] ss:$48 sps:$4 sm:$0xff]  }
 0x3c8   :  { %5604 = vmatpush2.bf16.msra.mxu0 %v7828_v41  ;;  %5647 = vmatpush2.bf16.msra.mxu1 %v7831_v51  ;;  %v7903_v41 = vld [vmem:[%s11320_s2 + $0x670] ss:$48 sps:$4 sm:$0xff]   ;;  %v7908_v51 = vld [vmem:[%s11320_s2 + $0x14] ss:$48 sps:$4 sm:$0xff]  }
 0x3c9   :  { %5605 = vmatprep.subr.bf16.mxu0 %v7836_v27  ;;  %5648 = vmatprep.subr.bf16.mxu1 %v7839_v17  ;;  %v7911_v27 = vld [vmem:[%s11320_s2 + $0x614] ss:$48 sps:$4 sm:$0xff]   ;;  %v7906_v17 = vld [vmem:[%s11320_s2 + $0x10] ss:$48 sps:$4 sm:$0xff]  }
 0x3cc   :  { %5606 = vmatpush2.bf16.msra.mxu0 %v7834_v24  ;;  %5649 = vmatpush2.bf16.msra.mxu1 %v7837_v52  ;;  %v7909_v24 = vld [vmem:[%s11320_s2 + $0x610] ss:$48 sps:$4 sm:$0xff]   ;;  %v7914_v52 = vld [vmem:[%s11320_s2 + $0x5b4] ss:$48 sps:$4 sm:$0xff]  }
 0x3cd   :  { %5607 = vmatprep.subr.bf16.mxu0 %v7842_v15  ;;  %5650 = vmatprep.subr.bf16.mxu1 %v7845_v13  ;;  %v7917_v15 = vld [vmem:[%s11320_s2 + $0xbb4] ss:$48 sps:$4 sm:$0xff]   ;;  %v7912_v13 = vld [vmem:[%s11320_s2 + $0x5b0] ss:$48 sps:$4 sm:$0xff]  }
 0x3d0   :  { %5608 = vmatpush2.bf16.msra.mxu0 %v7840_v19  ;;  %5651 = vmatpush2.bf16.msra.mxu1 %v7843_v53  ;;  %v7915_v19 = vld [vmem:[%s11320_s2 + $0xbb0] ss:$48 sps:$4 sm:$0xff]   ;;  %v7920_v53 = vld [vmem:[%s11320_s2 + $0x554] ss:$48 sps:$4 sm:$0xff]  }
 0x3d1   :  { %5609 = vmatprep.subr.bf16.mxu0 %v7848_v56  ;;  %5652 = vmatprep.subr.bf16.mxu1 %v7851_v18  ;;  %v7923_v56 = vld [vmem:[%s11320_s2 + $0xb54] ss:$48 sps:$4 sm:$0xff]   ;;  %v7918_v18 = vld [vmem:[%s11320_s2 + $0x550] ss:$48 sps:$4 sm:$0xff]  }
 0x3d4   :  { %5610 = vmatpush2.bf16.msra.mxu0 %v7846_v61  ;;  %5653 = vmatpush2.bf16.msra.mxu1 %v7849_v63  ;;  %v7921_v61 = vld [vmem:[%s11320_s2 + $0xb50] ss:$48 sps:$4 sm:$0xff]   ;;  %v7926_v63 = vld [vmem:[%s11320_s2 + $0x4f4] ss:$48 sps:$4 sm:$0xff]  }
 0x3d5   :  { %5611 = vmatprep.subr.bf16.mxu0 %v7854_v37  ;;  %5654 = vmatprep.subr.bf16.mxu1 %v7857_v38  ;;  %v7929_v37 = vld [vmem:[%s11320_s2 + $0xaf4] ss:$48 sps:$4 sm:$0xff]   ;;  %v7924_v38 = vld [vmem:[%s11320_s2 + $0x4f0] ss:$48 sps:$4 sm:$0xff]  }
 0x3d8   :  { %5612 = vmatpush2.bf16.msra.mxu0 %v7852_v0  ;;  %5655 = vmatpush2.bf16.msra.mxu1 %v7855_v25  ;;  %v7927_v0 = vld [vmem:[%s11320_s2 + $0xaf0] ss:$48 sps:$4 sm:$0xff]   ;;  %v7932_v25 = vld [vmem:[%s11320_s2 + $0x494] ss:$48 sps:$4 sm:$0xff]  }
 0x3d9   :  { %5613 = vmatprep.subr.bf16.mxu0 %v7860_v43  ;;  %5656 = vmatprep.subr.bf16.mxu1 %v7863_v44  ;;  %v7935_v43 = vld [vmem:[%s11320_s2 + $0xa94] ss:$48 sps:$4 sm:$0xff]   ;;  %v7930_v44 = vld [vmem:[%s11320_s2 + $0x490] ss:$48 sps:$4 sm:$0xff]  }
 0x3dc   :  { %5614 = vmatpush2.bf16.msra.mxu0 %v7858_v1  ;;  %5657 = vmatpush2.bf16.msra.mxu1 %v7861_v2  ;;  %v7933_v1 = vld [vmem:[%s11320_s2 + $0xa90] ss:$48 sps:$4 sm:$0xff]   ;;  %v7938_v2 = vld [vmem:[%s11320_s2 + $0x434] ss:$48 sps:$4 sm:$0xff]  }
 0x3dd   :  { %5669 = vmatprep.subr.bf16.mxu0 %v7866_v54  ;;  %5712 = vmatprep.subr.bf16.mxu1 %v7869_v31  ;;  %v7941_v54 = vld [vmem:[%s11320_s2 + $0xa34] ss:$48 sps:$4 sm:$0xff]   ;;  %v7936_v31 = vld [vmem:[%s11320_s2 + $0x430] ss:$48 sps:$4 sm:$0xff]  }
 0x3df   :  { %5616 = vmatmul.mubr.bf16.vlgmr.msra.gmra.mxu0 %v10052_v58  ;;  %5659 = vmatmul.mubr.bf16.vlgmr.msra.gmra.mxu1 %v10054_v59 }
 0x3e0   :  { %5670 = vmatpush1.bf16.msra.mxu0 %v7864_v35  ;;  %5701 = vmatprep.mubr.bf16.mxu0 %v10048_v12  ;;  %v7939_v35 = vld [vmem:[%s11320_s2 + $0xa30] ss:$48 sps:$4 sm:$0xff]  }
 0x3e1   :  { %5713 = vmatpush1.bf16.msra.mxu1 %v7867_v39  ;;  %5744 = vmatprep.mubr.bf16.mxu1 %v10050_v57  ;;  %v7944_v39 = vld [vmem:[%s11320_s2 + $0x3d4] ss:$48 sps:$4 sm:$0xff]  }
 0x3e2   :  { %5671 = vmatprep.subr.bf16.mxu0 %v7872_v30  ;;  %5714 = vmatprep.subr.bf16.mxu1 %v7875_v33  ;;  %v7947_v30 = vld [vmem:[%s11320_s2 + $0x9d4] ss:$48 sps:$4 sm:$0xff]   ;;  %v7942_v33 = vld [vmem:[%s11320_s2 + $0x3d0] ss:$48 sps:$4 sm:$0xff]  }
 0x3e4   :  { %5672 = vmatpush1.bf16.msra.mxu0 %v7870_v9  ;;  %v7945_v9 = vld [vmem:[%s11320_s2 + $0x9d0] ss:$48 sps:$4 sm:$0xff]  }
 0x3e5   :  { %5715 = vmatpush1.bf16.msra.mxu1 %v7873_v42  ;;  %5673 = vmatprep.subr.bf16.mxu0 %v7878_v10  ;;  %v7950_v42 = vld [vmem:[%s11320_s2 + $0x374] ss:$48 sps:$4 sm:$0xff]  }
 0x3e6   :  { %5716 = vmatprep.subr.bf16.mxu1 %v7881_v16  ;;  %v7953_v10 = vld [vmem:[%s11320_s2 + $0x974] ss:$48 sps:$4 sm:$0xff]   ;;  %v7948_v16 = vld [vmem:[%s11320_s2 + $0x370] ss:$48 sps:$4 sm:$0xff]  }
 0x3e8   :  { %5674 = vmatpush1.bf16.msra.mxu0 %v7876_v21  ;;  %v7951_v21 = vld [vmem:[%s11320_s2 + $0x970] ss:$48 sps:$4 sm:$0xff]  }
 0x3e9   :  { %5717 = vmatpush1.bf16.msra.mxu1 %v7879_v28  ;;  %5675 = vmatprep.subr.bf16.mxu0 %v7884_v29  ;;  %v7956_v28 = vld [vmem:[%s11320_s2 + $0x314] ss:$48 sps:$4 sm:$0xff]  }
 0x3ea   :  { %5718 = vmatprep.subr.bf16.mxu1 %v7887_v47  ;;  %v7959_v29 = vld [vmem:[%s11320_s2 + $0x914] ss:$48 sps:$4 sm:$0xff]   ;;  %v7954_v47 = vld [vmem:[%s11320_s2 + $0x310] ss:$48 sps:$4 sm:$0xff]  }
 0x3ec   :  { %5676 = vmatpush1.bf16.msra.mxu0 %v7882_v11  ;;  %v7957_v11 = vld [vmem:[%s11320_s2 + $0x910] ss:$48 sps:$4 sm:$0xff]  }
 0x3ed   :  { %5719 = vmatpush1.bf16.msra.mxu1 %v7885_v20  ;;  %5677 = vmatprep.subr.bf16.mxu0 %v7890_v34  ;;  %v7962_v20 = vld [vmem:[%s11320_s2 + $0x2bc] ss:$48 sps:$4 sm:$0xff]  }
 0x3ee   :  { %5720 = vmatprep.subr.bf16.mxu1 %v7893_v55  ;;  %v7965_v34 = vld [vmem:[%s11320_s2 + $0x8bc] ss:$48 sps:$4 sm:$0xff]   ;;  %v7960_v55 = vld [vmem:[%s11320_s2 + $0x2b8] ss:$48 sps:$4 sm:$0xff]  }
 0x3f0   :  { %5678 = vmatpush1.bf16.msra.mxu0 %v7888_v3  ;;  %v7963_v3 = vld [vmem:[%s11320_s2 + $0x8b8] ss:$48 sps:$4 sm:$0xff]  }
 0x3f1   :  { %5721 = vmatpush1.bf16.msra.mxu1 %v7891_v45  ;;  %5679 = vmatprep.subr.bf16.mxu0 %v7896_v49  ;;  %v7968_v45 = vld [vmem:[%s11320_s2 + $0x25c] ss:$48 sps:$4 sm:$0xff]  }
 0x3f2   :  { %5722 = vmatprep.subr.bf16.mxu1 %v7899_v46  ;;  %v7971_v49 = vld [vmem:[%s11320_s2 + $0x85c] ss:$48 sps:$4 sm:$0xff]   ;;  %v7966_v46 = vld [vmem:[%s11320_s2 + $0x258] ss:$48 sps:$4 sm:$0xff]  }
 0x3f4   :  { %5680 = vmatpush1.bf16.msra.mxu0 %v7894_v50  ;;  %v7969_v50 = vld [vmem:[%s11320_s2 + $0x858] ss:$48 sps:$4 sm:$0xff]  }
 0x3f5   :  { %5723 = vmatpush1.bf16.msra.mxu1 %v7897_v4  ;;  %5681 = vmatprep.subr.bf16.mxu0 %v7902_v40  ;;  %v7974_v4 = vld [vmem:[%s11320_s2 + $0x1fc] ss:$48 sps:$4 sm:$0xff]  }
 0x3f6   :  { %5724 = vmatprep.subr.bf16.mxu1 %v7905_v22  ;;  %v7977_v40 = vld [vmem:[%s11320_s2 + $0x7fc] ss:$48 sps:$4 sm:$0xff]   ;;  %v7972_v22 = vld [vmem:[%s11320_s2 + $0x1f8] ss:$48 sps:$4 sm:$0xff]  }
 0x3f8   :  { %5682 = vmatpush1.bf16.msra.mxu0 %v7900_v5  ;;  %v7975_v5 = vld [vmem:[%s11320_s2 + $0x7f8] ss:$48 sps:$4 sm:$0xff]  }
 0x3f9   :  { %5725 = vmatpush1.bf16.msra.mxu1 %v7903_v41  ;;  %5683 = vmatprep.subr.bf16.mxu0 %v7908_v51  ;;  %v7980_v41 = vld [vmem:[%s11320_s2 + $0x19c] ss:$48 sps:$4 sm:$0xff]  }
 0x3fa   :  { %5726 = vmatprep.subr.bf16.mxu1 %v7911_v27  ;;  %v7983_v51 = vld [vmem:[%s11320_s2 + $0x79c] ss:$48 sps:$4 sm:$0xff]   ;;  %v7978_v27 = vld [vmem:[%s11320_s2 + $0x198] ss:$48 sps:$4 sm:$0xff]  }
 0x3fc   :  { %5684 = vmatpush1.bf16.msra.mxu0 %v7906_v17  ;;  %v7981_v17 = vld [vmem:[%s11320_s2 + $0x798] ss:$48 sps:$4 sm:$0xff]  }
 0x3fd   :  { %5727 = vmatpush1.bf16.msra.mxu1 %v7909_v24  ;;  %5685 = vmatprep.subr.bf16.mxu0 %v7914_v52  ;;  %v7986_v24 = vld [vmem:[%s11320_s2 + $0x13c] ss:$48 sps:$4 sm:$0xff]  }
 0x3fe   :  { %5728 = vmatprep.subr.bf16.mxu1 %v7917_v15  ;;  %v7989_v52 = vld [vmem:[%s11320_s2 + $0x73c] ss:$48 sps:$4 sm:$0xff]   ;;  %v7984_v15 = vld [vmem:[%s11320_s2 + $0x138] ss:$48 sps:$4 sm:$0xff]  }
 0x400   :  { %5686 = vmatpush2.bf16.msra.mxu0 %v7912_v13  ;;  %v7987_v13 = vld [vmem:[%s11320_s2 + $0x738] ss:$48 sps:$4 sm:$0xff]  }
 0x401   :  { %5729 = vmatpush2.bf16.msra.mxu1 %v7915_v19  ;;  %5687 = vmatprep.subr.bf16.mxu0 %v7920_v53  ;;  %v7992_v19 = vld [vmem:[%s11320_s2 + $0xdc] ss:$48 sps:$4 sm:$0xff]  }
 0x402   :  { %5730 = vmatprep.subr.bf16.mxu1 %v7923_v56  ;;  %v7995_v53 = vld [vmem:[%s11320_s2 + $0x6dc] ss:$48 sps:$4 sm:$0xff]   ;;  %v7990_v56 = vld [vmem:[%s11320_s2 + $0xd8] ss:$48 sps:$4 sm:$0xff]  }
 0x404   :  { %5688 = vmatpush2.bf16.msra.mxu0 %v7918_v18  ;;  %v7993_v18 = vld [vmem:[%s11320_s2 + $0x6d8] ss:$48 sps:$4 sm:$0xff]  }
 0x405   :  { %5731 = vmatpush2.bf16.msra.mxu1 %v7921_v61  ;;  %5689 = vmatprep.subr.bf16.mxu0 %v7926_v63  ;;  %v7998_v61 = vld [vmem:[%s11320_s2 + $0x7c] ss:$48 sps:$4 sm:$0xff]  }
 0x406   :  { %5732 = vmatprep.subr.bf16.mxu1 %v7929_v37  ;;  %v8001_v63 = vld [vmem:[%s11320_s2 + $0x67c] ss:$48 sps:$4 sm:$0xff]   ;;  %v7996_v37 = vld [vmem:[%s11320_s2 + $0x78] ss:$48 sps:$4 sm:$0xff]  }
 0x408   :  { %5690 = vmatpush2.bf16.msra.mxu0 %v7924_v38  ;;  %v7999_v38 = vld [vmem:[%s11320_s2 + $0x678] ss:$48 sps:$4 sm:$0xff]  }
 0x409   :  { %5733 = vmatpush2.bf16.msra.mxu1 %v7927_v0  ;;  %5691 = vmatprep.subr.bf16.mxu0 %v7932_v25  ;;  %v8004_v0 = vld [vmem:[%s11320_s2 + $0x1c] ss:$48 sps:$4 sm:$0xff]  }
 0x40a   :  { %5734 = vmatprep.subr.bf16.mxu1 %v7935_v43  ;;  %v8007_v25 = vld [vmem:[%s11320_s2 + $0x61c] ss:$48 sps:$4 sm:$0xff]   ;;  %v8002_v43 = vld [vmem:[%s11320_s2 + $0x18] ss:$48 sps:$4 sm:$0xff]  }
 0x40c   :  { %5692 = vmatpush2.bf16.msra.mxu0 %v7930_v44  ;;  %v8005_v44 = vld [vmem:[%s11320_s2 + $0x618] ss:$48 sps:$4 sm:$0xff]  }
 0x40d   :  { %5735 = vmatpush2.bf16.msra.mxu1 %v7933_v1  ;;  %5693 = vmatprep.subr.bf16.mxu0 %v7938_v2  ;;  %v8010_v1 = vld [vmem:[%s11320_s2 + $0x5bc] ss:$48 sps:$4 sm:$0xff]  }
 0x40e   :  { %5736 = vmatprep.subr.bf16.mxu1 %v7941_v54  ;;  %v8013_v2 = vld [vmem:[%s11320_s2 + $0xbbc] ss:$48 sps:$4 sm:$0xff]   ;;  %v8008_v54 = vld [vmem:[%s11320_s2 + $0x5b8] ss:$48 sps:$4 sm:$0xff]  }
 0x410   :  { %5694 = vmatpush2.bf16.msra.mxu0 %v7936_v31  ;;  %v8011_v31 = vld [vmem:[%s11320_s2 + $0xbb8] ss:$48 sps:$4 sm:$0xff]  }
 0x411   :  { %5737 = vmatpush2.bf16.msra.mxu1 %v7939_v35  ;;  %5695 = vmatprep.subr.bf16.mxu0 %v7944_v39  ;;  %v8016_v35 = vld [vmem:[%s11320_s2 + $0x55c] ss:$48 sps:$4 sm:$0xff]  }
 0x412   :  { %5738 = vmatprep.subr.bf16.mxu1 %v7947_v30  ;;  %v8019_v39 = vld [vmem:[%s11320_s2 + $0xb5c] ss:$48 sps:$4 sm:$0xff]   ;;  %v8014_v30 = vld [vmem:[%s11320_s2 + $0x558] ss:$48 sps:$4 sm:$0xff]  }
 0x414   :  { %5696 = vmatpush2.bf16.msra.mxu0 %v7942_v33  ;;  %v8017_v33 = vld [vmem:[%s11320_s2 + $0xb58] ss:$48 sps:$4 sm:$0xff]  }
 0x415   :  { %5739 = vmatpush2.bf16.msra.mxu1 %v7945_v9  ;;  %5697 = vmatprep.subr.bf16.mxu0 %v7950_v42  ;;  %v8022_v9 = vld [vmem:[%s11320_s2 + $0x4fc] ss:$48 sps:$4 sm:$0xff]  }
 0x416   :  { %5740 = vmatprep.subr.bf16.mxu1 %v7953_v10  ;;  %v8025_v42 = vld [vmem:[%s11320_s2 + $0xafc] ss:$48 sps:$4 sm:$0xff]   ;;  %v8020_v10 = vld [vmem:[%s11320_s2 + $0x4f8] ss:$48 sps:$4 sm:$0xff]  }
 0x418   :  { %5698 = vmatpush2.bf16.msra.mxu0 %v7948_v16  ;;  %v8023_v16 = vld [vmem:[%s11320_s2 + $0xaf8] ss:$48 sps:$4 sm:$0xff]  }
 0x419   :  { %5741 = vmatpush2.bf16.msra.mxu1 %v7951_v21  ;;  %5699 = vmatprep.subr.bf16.mxu0 %v7956_v28  ;;  %v8028_v21 = vld [vmem:[%s11320_s2 + $0x49c] ss:$48 sps:$4 sm:$0xff]  }
 0x41a   :  { %5742 = vmatprep.subr.bf16.mxu1 %v7959_v29  ;;  %v8031_v28 = vld [vmem:[%s11320_s2 + $0xa9c] ss:$48 sps:$4 sm:$0xff]   ;;  %v8026_v29 = vld [vmem:[%s11320_s2 + $0x498] ss:$48 sps:$4 sm:$0xff]  }
 0x41c   :  { %5700 = vmatpush2.bf16.msra.mxu0 %v7954_v47  ;;  %v8029_v47 = vld [vmem:[%s11320_s2 + $0xa98] ss:$48 sps:$4 sm:$0xff]  }
 0x41d   :  { %5743 = vmatpush2.bf16.msra.mxu1 %v7957_v11  ;;  %5755 = vmatprep.subr.bf16.mxu0 %v7962_v20  ;;  %v8034_v11 = vld [vmem:[%s11320_s2 + $0x43c] ss:$48 sps:$4 sm:$0xff]  }
 0x41e   :  { %5798 = vmatprep.subr.bf16.mxu1 %v7965_v34  ;;  %v8037_v20 = vld [vmem:[%s11320_s2 + $0xa3c] ss:$48 sps:$4 sm:$0xff]   ;;  %v8032_v34 = vld [vmem:[%s11320_s2 + $0x438] ss:$48 sps:$4 sm:$0xff]  }
 0x41f   :  { %5702 = vmatmul.mubr.bf16.vlgmr.msra.gmra.mxu0 %v10052_v58 }
 0x420   :  { %5745 = vmatmul.mubr.bf16.vlgmr.msra.gmra.mxu1 %v10054_v59  ;;  %5756 = vmatpush1.bf16.msra.mxu0 %v7960_v55  ;;  %v8035_v55 = vld [vmem:[%s11320_s2 + $0xa38] ss:$48 sps:$4 sm:$0xff]  }
 0x421   :  { %5787 = vmatprep.mubr.bf16.mxu0 %v10048_v12  ;;  %5799 = vmatpush1.bf16.msra.mxu1 %v7963_v3  ;;  %v8040_v3 = vld [vmem:[%s11320_s2 + $0x3dc] ss:$48 sps:$4 sm:$0xff]  }
 0x422   :  { %5830 = vmatprep.mubr.bf16.mxu1 %v10050_v57  ;;  %5757 = vmatprep.subr.bf16.mxu0 %v7968_v45  ;;  %v8043_v45 = vld [vmem:[%s11320_s2 + $0x9dc] ss:$48 sps:$4 sm:$0xff]  }
 0x423   :  { %5800 = vmatprep.subr.bf16.mxu1 %v7971_v49  ;;  %v8038_v49 = vld [vmem:[%s11320_s2 + $0x3d8] ss:$48 sps:$4 sm:$0xff]  }
 0x424   :  { %5758 = vmatpush1.bf16.msra.mxu0 %v7966_v46  ;;  %v8041_v46 = vld [vmem:[%s11320_s2 + $0x9d8] ss:$48 sps:$4 sm:$0xff]  }
 0x425   :  { %5801 = vmatpush1.bf16.msra.mxu1 %v7969_v50  ;;  %5759 = vmatprep.subr.bf16.mxu0 %v7974_v4  ;;  %v8046_v50 = vld [vmem:[%s11320_s2 + $0x37c] ss:$48 sps:$4 sm:$0xff]  }
 0x426   :  { %5802 = vmatprep.subr.bf16.mxu1 %v7977_v40  ;;  %v8049_v4 = vld [vmem:[%s11320_s2 + $0x97c] ss:$48 sps:$4 sm:$0xff]   ;;  %v8044_v40 = vld [vmem:[%s11320_s2 + $0x378] ss:$48 sps:$4 sm:$0xff]  }
 0x428   :  { %5760 = vmatpush1.bf16.msra.mxu0 %v7972_v22  ;;  %v8047_v22 = vld [vmem:[%s11320_s2 + $0x978] ss:$48 sps:$4 sm:$0xff]  }
 0x429   :  { %5803 = vmatpush1.bf16.msra.mxu1 %v7975_v5  ;;  %5761 = vmatprep.subr.bf16.mxu0 %v7980_v41  ;;  %v8052_v5 = vld [vmem:[%s11320_s2 + $0x31c] ss:$48 sps:$4 sm:$0xff]  }
 0x42a   :  { %5804 = vmatprep.subr.bf16.mxu1 %v7983_v51  ;;  %v8055_v41 = vld [vmem:[%s11320_s2 + $0x91c] ss:$48 sps:$4 sm:$0xff]   ;;  %v8050_v51 = vld [vmem:[%s11320_s2 + $0x318] ss:$48 sps:$4 sm:$0xff]  }
 0x42c   :  { %5762 = vmatpush1.bf16.msra.mxu0 %v7978_v27  ;;  %v8053_v27 = vld [vmem:[%s11320_s2 + $0x918] ss:$48 sps:$4 sm:$0xff]  }
 0x42d   :  { %5805 = vmatpush1.bf16.msra.mxu1 %v7981_v17  ;;  %5763 = vmatprep.subr.bf16.mxu0 %v7986_v24  ;;  %v8058_v17 = vld [vmem:[%s11320_s2 + $0x2c4] ss:$48 sps:$4 sm:$0xff]  }
 0x42e   :  { %5806 = vmatprep.subr.bf16.mxu1 %v7989_v52  ;;  %v8061_v24 = vld [vmem:[%s11320_s2 + $0x8c4] ss:$48 sps:$4 sm:$0xff]   ;;  %v8056_v52 = vld [vmem:[%s11320_s2 + $0x2c0] ss:$48 sps:$4 sm:$0xff]  }
 0x430   :  { %5764 = vmatpush1.bf16.msra.mxu0 %v7984_v15  ;;  %v8059_v15 = vld [vmem:[%s11320_s2 + $0x8c0] ss:$48 sps:$4 sm:$0xff]  }
 0x431   :  { %5807 = vmatpush1.bf16.msra.mxu1 %v7987_v13  ;;  %5765 = vmatprep.subr.bf16.mxu0 %v7992_v19  ;;  %v8064_v13 = vld [vmem:[%s11320_s2 + $0x264] ss:$48 sps:$4 sm:$0xff]  }
 0x432   :  { %5808 = vmatprep.subr.bf16.mxu1 %v7995_v53  ;;  %v8067_v19 = vld [vmem:[%s11320_s2 + $0x864] ss:$48 sps:$4 sm:$0xff]   ;;  %v8062_v53 = vld [vmem:[%s11320_s2 + $0x260] ss:$48 sps:$4 sm:$0xff]  }
 0x434   :  { %5766 = vmatpush1.bf16.msra.mxu0 %v7990_v56  ;;  %v8065_v56 = vld [vmem:[%s11320_s2 + $0x860] ss:$48 sps:$4 sm:$0xff]  }
 0x435   :  { %5809 = vmatpush1.bf16.msra.mxu1 %v7993_v18  ;;  %5767 = vmatprep.subr.bf16.mxu0 %v7998_v61  ;;  %v8070_v18 = vld [vmem:[%s11320_s2 + $0x204] ss:$48 sps:$4 sm:$0xff]  }
 0x436   :  { %5810 = vmatprep.subr.bf16.mxu1 %v8001_v63  ;;  %v8073_v61 = vld [vmem:[%s11320_s2 + $0x804] ss:$48 sps:$4 sm:$0xff]   ;;  %v8068_v63 = vld [vmem:[%s11320_s2 + $0x200] ss:$48 sps:$4 sm:$0xff]  }
 0x438   :  { %5768 = vmatpush1.bf16.msra.mxu0 %v7996_v37  ;;  %v8071_v37 = vld [vmem:[%s11320_s2 + $0x800] ss:$48 sps:$4 sm:$0xff]  }
 0x439   :  { %5811 = vmatpush1.bf16.msra.mxu1 %v7999_v38  ;;  %5769 = vmatprep.subr.bf16.mxu0 %v8004_v0  ;;  %v8076_v38 = vld [vmem:[%s11320_s2 + $0x1a4] ss:$48 sps:$4 sm:$0xff]  }
 0x43a   :  { %5812 = vmatprep.subr.bf16.mxu1 %v8007_v25  ;;  %v8079_v0 = vld [vmem:[%s11320_s2 + $0x7a4] ss:$48 sps:$4 sm:$0xff]   ;;  %v8074_v25 = vld [vmem:[%s11320_s2 + $0x1a0] ss:$48 sps:$4 sm:$0xff]  }
 0x43c   :  { %5770 = vmatpush1.bf16.msra.mxu0 %v8002_v43  ;;  %v8077_v43 = vld [vmem:[%s11320_s2 + $0x7a0] ss:$48 sps:$4 sm:$0xff]  }
 0x43d   :  { %5813 = vmatpush1.bf16.msra.mxu1 %v8005_v44  ;;  %5771 = vmatprep.subr.bf16.mxu0 %v8010_v1  ;;  %v8082_v44 = vld [vmem:[%s11320_s2 + $0x144] ss:$48 sps:$4 sm:$0xff]  }
 0x43e   :  { %5814 = vmatprep.subr.bf16.mxu1 %v8013_v2  ;;  %v8085_v1 = vld [vmem:[%s11320_s2 + $0x744] ss:$48 sps:$4 sm:$0xff]   ;;  %v8080_v2 = vld [vmem:[%s11320_s2 + $0x140] ss:$48 sps:$4 sm:$0xff]  }
 0x440   :  { %5772 = vmatpush2.bf16.msra.mxu0 %v8008_v54  ;;  %v8083_v54 = vld [vmem:[%s11320_s2 + $0x740] ss:$48 sps:$4 sm:$0xff]  }
 0x441   :  { %5815 = vmatpush2.bf16.msra.mxu1 %v8011_v31  ;;  %5773 = vmatprep.subr.bf16.mxu0 %v8016_v35  ;;  %v8088_v31 = vld [vmem:[%s11320_s2 + $0xe4] ss:$48 sps:$4 sm:$0xff]  }
 0x442   :  { %5816 = vmatprep.subr.bf16.mxu1 %v8019_v39  ;;  %v8091_v35 = vld [vmem:[%s11320_s2 + $0x6e4] ss:$48 sps:$4 sm:$0xff]   ;;  %v8086_v39 = vld [vmem:[%s11320_s2 + $0xe0] ss:$48 sps:$4 sm:$0xff]  }
 0x444   :  { %5774 = vmatpush2.bf16.msra.mxu0 %v8014_v30  ;;  %v8089_v30 = vld [vmem:[%s11320_s2 + $0x6e0] ss:$48 sps:$4 sm:$0xff]  }
 0x445   :  { %5817 = vmatpush2.bf16.msra.mxu1 %v8017_v33  ;;  %5775 = vmatprep.subr.bf16.mxu0 %v8022_v9  ;;  %v8094_v33 = vld [vmem:[%s11320_s2 + $0x84] ss:$48 sps:$4 sm:$0xff]  }
 0x446   :  { %5818 = vmatprep.subr.bf16.mxu1 %v8025_v42  ;;  %v8097_v9 = vld [vmem:[%s11320_s2 + $0x684] ss:$48 sps:$4 sm:$0xff]   ;;  %v8092_v42 = vld [vmem:[%s11320_s2 + $0x80] ss:$48 sps:$4 sm:$0xff]  }
 0x448   :  { %5776 = vmatpush2.bf16.msra.mxu0 %v8020_v10  ;;  %v8095_v10 = vld [vmem:[%s11320_s2 + $0x680] ss:$48 sps:$4 sm:$0xff]  }
 0x449   :  { %5819 = vmatpush2.bf16.msra.mxu1 %v8023_v16  ;;  %5777 = vmatprep.subr.bf16.mxu0 %v8028_v21  ;;  %v8100_v16 = vld [vmem:[%s11320_s2 + $0x24] ss:$48 sps:$4 sm:$0xff]  }
 0x44a   :  { %5820 = vmatprep.subr.bf16.mxu1 %v8031_v28  ;;  %v8103_v21 = vld [vmem:[%s11320_s2 + $0x624] ss:$48 sps:$4 sm:$0xff]   ;;  %v8098_v28 = vld [vmem:[%s11320_s2 + $0x20] ss:$48 sps:$4 sm:$0xff]  }
 0x44c   :  { %5778 = vmatpush2.bf16.msra.mxu0 %v8026_v29  ;;  %v8101_v29 = vld [vmem:[%s11320_s2 + $0x620] ss:$48 sps:$4 sm:$0xff]  }
 0x44d   :  { %5821 = vmatpush2.bf16.msra.mxu1 %v8029_v47  ;;  %5779 = vmatprep.subr.bf16.mxu0 %v8034_v11  ;;  %v8106_v47 = vld [vmem:[%s11320_s2 + $0x5c4] ss:$48 sps:$4 sm:$0xff]  }
 0x44e   :  { %5822 = vmatprep.subr.bf16.mxu1 %v8037_v20  ;;  %v8109_v11 = vld [vmem:[%s11320_s2 + $0xbc4] ss:$48 sps:$4 sm:$0xff]   ;;  %v8104_v20 = vld [vmem:[%s11320_s2 + $0x5c0] ss:$48 sps:$4 sm:$0xff]  }
 0x450   :  { %5780 = vmatpush2.bf16.msra.mxu0 %v8032_v34  ;;  %v8107_v34 = vld [vmem:[%s11320_s2 + $0xbc0] ss:$48 sps:$4 sm:$0xff]  }
 0x451   :  { %5823 = vmatpush2.bf16.msra.mxu1 %v8035_v55  ;;  %5781 = vmatprep.subr.bf16.mxu0 %v8040_v3  ;;  %v8112_v55 = vld [vmem:[%s11320_s2 + $0x564] ss:$48 sps:$4 sm:$0xff]  }
 0x452   :  { %5824 = vmatprep.subr.bf16.mxu1 %v8043_v45  ;;  %v8115_v3 = vld [vmem:[%s11320_s2 + $0xb64] ss:$48 sps:$4 sm:$0xff]   ;;  %v8110_v45 = vld [vmem:[%s11320_s2 + $0x560] ss:$48 sps:$4 sm:$0xff]  }
 0x454   :  { %5782 = vmatpush2.bf16.msra.mxu0 %v8038_v49  ;;  %v8113_v49 = vld [vmem:[%s11320_s2 + $0xb60] ss:$48 sps:$4 sm:$0xff]  }
 0x455   :  { %5825 = vmatpush2.bf16.msra.mxu1 %v8041_v46  ;;  %5783 = vmatprep.subr.bf16.mxu0 %v8046_v50  ;;  %v8118_v46 = vld [vmem:[%s11320_s2 + $0x504] ss:$48 sps:$4 sm:$0xff]  }
 0x456   :  { %5826 = vmatprep.subr.bf16.mxu1 %v8049_v4  ;;  %v8121_v50 = vld [vmem:[%s11320_s2 + $0xb04] ss:$48 sps:$4 sm:$0xff]   ;;  %v8116_v4 = vld [vmem:[%s11320_s2 + $0x500] ss:$48 sps:$4 sm:$0xff]  }
 0x458   :  { %5784 = vmatpush2.bf16.msra.mxu0 %v8044_v40  ;;  %v8119_v40 = vld [vmem:[%s11320_s2 + $0xb00] ss:$48 sps:$4 sm:$0xff]  }
 0x459   :  { %5827 = vmatpush2.bf16.msra.mxu1 %v8047_v22  ;;  %5785 = vmatprep.subr.bf16.mxu0 %v8052_v5  ;;  %v8124_v22 = vld [vmem:[%s11320_s2 + $0x4a4] ss:$48 sps:$4 sm:$0xff]  }
 0x45a   :  { %5828 = vmatprep.subr.bf16.mxu1 %v8055_v41  ;;  %v8127_v5 = vld [vmem:[%s11320_s2 + $0xaa4] ss:$48 sps:$4 sm:$0xff]   ;;  %v8122_v41 = vld [vmem:[%s11320_s2 + $0x4a0] ss:$48 sps:$4 sm:$0xff]  }
 0x45c   :  { %5786 = vmatpush2.bf16.msra.mxu0 %v8050_v51  ;;  %v8125_v51 = vld [vmem:[%s11320_s2 + $0xaa0] ss:$48 sps:$4 sm:$0xff]  }
 0x45d   :  { %5829 = vmatpush2.bf16.msra.mxu1 %v8053_v27  ;;  %5841 = vmatprep.subr.bf16.mxu0 %v8058_v17  ;;  %v8130_v27 = vld [vmem:[%s11320_s2 + $0x444] ss:$48 sps:$4 sm:$0xff]  }
 0x45e   :  { %5884 = vmatprep.subr.bf16.mxu1 %v8061_v24  ;;  %v8133_v17 = vld [vmem:[%s11320_s2 + $0xa44] ss:$48 sps:$4 sm:$0xff]   ;;  %v8128_v24 = vld [vmem:[%s11320_s2 + $0x440] ss:$48 sps:$4 sm:$0xff]  }
 0x45f   :  { %5788 = vmatmul.mubr.bf16.vlgmr.msra.gmra.mxu0 %v10052_v58 }
 0x460   :  { %5831 = vmatmul.mubr.bf16.vlgmr.msra.gmra.mxu1 %v10054_v59  ;;  %5842 = vmatpush1.bf16.msra.mxu0 %v8056_v52  ;;  %v8131_v52 = vld [vmem:[%s11320_s2 + $0xa40] ss:$48 sps:$4 sm:$0xff]  }
 0x461   :  { %5873 = vmatprep.mubr.bf16.mxu0 %v10048_v12  ;;  %5885 = vmatpush1.bf16.msra.mxu1 %v8059_v15  ;;  %v8136_v15 = vld [vmem:[%s11320_s2 + $0x3e4] ss:$48 sps:$4 sm:$0xff]  }
 0x462   :  { %5916 = vmatprep.mubr.bf16.mxu1 %v10050_v57  ;;  %5843 = vmatprep.subr.bf16.mxu0 %v8064_v13  ;;  %v8139_v13 = vld [vmem:[%s11320_s2 + $0x9e4] ss:$48 sps:$4 sm:$0xff]  }
 0x463   :  { %5886 = vmatprep.subr.bf16.mxu1 %v8067_v19  ;;  %v8134_v19 = vld [vmem:[%s11320_s2 + $0x3e0] ss:$48 sps:$4 sm:$0xff]  }
 0x464   :  { %5844 = vmatpush1.bf16.msra.mxu0 %v8062_v53  ;;  %v10803_v53 = vpop.f32.mrf.mxu0 }
 0x465   :  { %5887 = vmatpush1.bf16.msra.mxu1 %v8065_v56  ;;  %5845 = vmatprep.subr.bf16.mxu0 %v8070_v18  ;;  %v10805_v56 = vpop.f32.mrf.mxu1  ;;  %v8137_v18 = vld [vmem:[%s11320_s2 + $0x9e0] ss:$48 sps:$4 sm:$0xff]  }
 0x466   :  { %5888 = vmatprep.subr.bf16.mxu1 %v8073_v61  ;;  %v8142_v61 = vld [vmem:[%s11320_s2 + $0x384] ss:$48 sps:$4 sm:$0xff]  }
 0x468   :  { %5846 = vmatpush1.bf16.msra.mxu0 %v8068_v63  ;;  %v8145_v63 = vld [vmem:[%s11320_s2 + $0x984] ss:$48 sps:$4 sm:$0xff]  }
 0x469   :  { %5889 = vmatpush1.bf16.msra.mxu1 %v8071_v37  ;;  %5847 = vmatprep.subr.bf16.mxu0 %v8076_v38  ;;  %v8140_v37 = vld [vmem:[%s11320_s2 + $0x380] ss:$48 sps:$4 sm:$0xff]   ;;  %v10819_v38 = vpop.f32.mrf.mxu0 }
 0x46a   :  { %5890 = vmatprep.subr.bf16.mxu1 %v8079_v0  ;;  %v10821_v0 = vpop.f32.mrf.mxu1 }
 0x46c   :  { %5848 = vmatpush1.bf16.msra.mxu0 %v8074_v25  ;;  %v8143_v25 = vld [vmem:[%s11320_s2 + $0x980] ss:$48 sps:$4 sm:$0xff]  }
 0x46d   :  { %5891 = vmatpush1.bf16.msra.mxu1 %v8077_v43  ;;  %5849 = vmatprep.subr.bf16.mxu0 %v8082_v44  ;;  %v8148_v43 = vld [vmem:[%s11320_s2 + $0x324] ss:$48 sps:$4 sm:$0xff]  }
 0x46e   :  { %5892 = vmatprep.subr.bf16.mxu1 %v8085_v1  ;;  %v8151_v44 = vld [vmem:[%s11320_s2 + $0x924] ss:$48 sps:$4 sm:$0xff]   ;;  %v8146_v1 = vld [vmem:[%s11320_s2 + $0x320] ss:$48 sps:$4 sm:$0xff]  }
 0x470   :  { %5850 = vmatpush1.bf16.msra.mxu0 %v8080_v2  ;;  %v10835_v2 = vpop.f32.mrf.mxu0 }
 0x471   :  { %5893 = vmatpush1.bf16.msra.mxu1 %v8083_v54  ;;  %5851 = vmatprep.subr.bf16.mxu0 %v8088_v31  ;;  %v10837_v54 = vpop.f32.mrf.mxu1  ;;  %v8149_v31 = vld [vmem:[%s11320_s2 + $0x920] ss:$48 sps:$4 sm:$0xff]  }
 0x472   :  { %5894 = vmatprep.subr.bf16.mxu1 %v8091_v35  ;;  %v8154_v35 = vld [vmem:[%s11320_s2 + $0x2cc] ss:$48 sps:$4 sm:$0xff]  }
 0x474   :  { %5852 = vmatpush1.bf16.msra.mxu0 %v8086_v39  ;;  %v8157_v39 = vld [vmem:[%s11320_s2 + $0x8cc] ss:$48 sps:$4 sm:$0xff]  }
 0x475   :  { %5895 = vmatpush1.bf16.msra.mxu1 %v8089_v30  ;;  %5853 = vmatprep.subr.bf16.mxu0 %v8094_v33  ;;  %v8152_v30 = vld [vmem:[%s11320_s2 + $0x2c8] ss:$48 sps:$4 sm:$0xff]   ;;  %v10851_v33 = vpop.f32.mrf.mxu0 }
 0x476   :  { %5896 = vmatprep.subr.bf16.mxu1 %v8097_v9  ;;  %v10853_v9 = vpop.f32.mrf.mxu1 }
 0x478   :  { %5854 = vmatpush1.bf16.msra.mxu0 %v8092_v42  ;;  %v8155_v42 = vld [vmem:[%s11320_s2 + $0x8c8] ss:$48 sps:$4 sm:$0xff]  }
 0x479   :  { %5897 = vmatpush1.bf16.msra.mxu1 %v8095_v10  ;;  %5855 = vmatprep.subr.bf16.mxu0 %v8100_v16  ;;  %v8160_v10 = vld [vmem:[%s11320_s2 + $0x26c] ss:$48 sps:$4 sm:$0xff]  }
 0x47a   :  { %5898 = vmatprep.subr.bf16.mxu1 %v8103_v21 }
 0x47c   :  { %5856 = vmatpush1.bf16.msra.mxu0 %v8098_v28  ;;  %v8163_v28 = vld [vmem:[%s11320_s2 + $0x86c] ss:$48 sps:$4 sm:$0xff]  }
 0x47d   :  { %5899 = vmatpush1.bf16.msra.mxu1 %v8101_v29  ;;  %5857 = vmatprep.subr.bf16.mxu0 %v8106_v47  ;;  %v8158_v47 = vld [vmem:[%s11320_s2 + $0x268] ss:$48 sps:$4 sm:$0xff]  }
 0x47e   :  { %5900 = vmatprep.subr.bf16.mxu1 %v8109_v11 }
 0x480   :  { %5858 = vmatpush2.bf16.msra.mxu0 %v8104_v20 }
 0x481   :  { %5901 = vmatpush2.bf16.msra.mxu1 %v8107_v34  ;;  %5859 = vmatprep.subr.bf16.mxu0 %v8112_v55  ;;  %v8161_v34 = vld [vmem:[%s11320_s2 + $0x868] ss:$48 sps:$4 sm:$0xff]   ;;  %v8166_v55 = vld [vmem:[%s11320_s2 + $0x20c] ss:$48 sps:$4 sm:$0xff]  }
 0x482   :  { %5902 = vmatprep.subr.bf16.mxu1 %v8115_v3 }
 0x484   :  { %5860 = vmatpush2.bf16.msra.mxu0 %v8110_v45  ;;  %v8169_v45 = vld [vmem:[%s11320_s2 + $0x80c] ss:$48 sps:$4 sm:$0xff]  }
 0x485   :  { %5903 = vmatpush2.bf16.msra.mxu1 %v8113_v49  ;;  %5861 = vmatprep.subr.bf16.mxu0 %v8118_v46 }
 0x486   :  { %5904 = vmatprep.subr.bf16.mxu1 %v8121_v50  ;;  %v8164_v50 = vld [vmem:[%s11320_s2 + $0x208] ss:$48 sps:$4 sm:$0xff]  }
 0x488   :  { %5862 = vmatpush2.bf16.msra.mxu0 %v8116_v4 }
 0x489   :  { %5905 = vmatpush2.bf16.msra.mxu1 %v8119_v40  ;;  %5863 = vmatprep.subr.bf16.mxu0 %v8124_v22  ;;  %v8172_v22 = vld [vmem:[%s11320_s2 + $0x1ac] ss:$48 sps:$4 sm:$0xff]  }
 0x48a   :  { %5906 = vmatprep.subr.bf16.mxu1 %v8127_v5 }
 0x48c   :  { %5864 = vmatpush2.bf16.msra.mxu0 %v8122_v41 }
 0x48d   :  { %5907 = vmatpush2.bf16.msra.mxu1 %v8125_v51  ;;  %5865 = vmatprep.subr.bf16.mxu0 %v8130_v27  ;;  %v8175_v27 = vld [vmem:[%s11320_s2 + $0x7ac] ss:$48 sps:$4 sm:$0xff]  }
 0x48e   :  { %5908 = vmatprep.subr.bf16.mxu1 %v8133_v17 }
 0x490   :  { %5866 = vmatpush2.bf16.msra.mxu0 %v8128_v24 }
 0x491   :  { %5909 = vmatpush2.bf16.msra.mxu1 %v8131_v52  ;;  %5867 = vmatprep.subr.bf16.mxu0 %v8136_v15  ;;  %v8170_v52 = vld [vmem:[%s11320_s2 + $0x1a8] ss:$48 sps:$4 sm:$0xff]  }
 0x492   :  { %5910 = vmatprep.subr.bf16.mxu1 %v8139_v13 }
 0x494   :  { %5868 = vmatpush2.bf16.msra.mxu0 %v8134_v19  ;;  %v8173_v19 = vld [vmem:[%s11320_s2 + $0x7a8] ss:$48 sps:$4 sm:$0xff]  }
 0x495   :  { %5911 = vmatpush2.bf16.msra.mxu1 %v8137_v18  ;;  %5869 = vmatprep.subr.bf16.mxu0 %v8142_v61  ;;  %v8178_v18 = vld [vmem:[%s11320_s2 + $0x14c] ss:$48 sps:$4 sm:$0xff]  }
 0x496   :  { %5912 = vmatprep.subr.bf16.mxu1 %v8145_v63  ;;  %v8181_v61 = vld [vmem:[%s11320_s2 + $0x74c] ss:$48 sps:$4 sm:$0xff]  }
 0x498   :  { %5870 = vmatpush2.bf16.msra.mxu0 %v8140_v37 }
 0x499   :  { %5913 = vmatpush2.bf16.msra.mxu1 %v8143_v25  ;;  %5871 = vmatprep.subr.bf16.mxu0 %v8148_v43  ;;  %v8176_v25 = vld [vmem:[%s11320_s2 + $0x148] ss:$48 sps:$4 sm:$0xff]  }
 0x49a   :  { %5914 = vmatprep.subr.bf16.mxu1 %v8151_v44  ;;  %v8179_v43 = vld [vmem:[%s11320_s2 + $0x748] ss:$48 sps:$4 sm:$0xff]   ;;  %v8184_v44 = vld [vmem:[%s11320_s2 + $0xec] ss:$48 sps:$4 sm:$0xff]  }
 0x49c   :  { %5872 = vmatpush2.bf16.msra.mxu0 %v8146_v1  ;;  %v8187_v1 = vld [vmem:[%s11320_s2 + $0x6ec] ss:$48 sps:$4 sm:$0xff]  }
 0x49d   :  { %5915 = vmatpush2.bf16.msra.mxu1 %v8149_v31  ;;  %5927 = vmatprep.subr.bf16.mxu0 %v8154_v35  ;;  %v8182_v31 = vld [vmem:[%s11320_s2 + $0xe8] ss:$48 sps:$4 sm:$0xff]  }
 0x49e   :  { %5970 = vmatprep.subr.bf16.mxu1 %v8157_v39  ;;  %v8185_v35 = vld [vmem:[%s11320_s2 + $0x6e8] ss:$48 sps:$4 sm:$0xff]   ;;  %v8190_v39 = vld [vmem:[%s11320_s2 + $0x8c] ss:$48 sps:$4 sm:$0xff]  }
 0x49f   :  { %v5617_v16 = vpop.f32.mrf.mxu0  ;;  %v5660_v21 = vpop.f32.mrf.mxu1  ;;  %5874 = vmatmul.mubr.bf16.vlgmr.msra.gmra.mxu0 %v10052_v58 }
 0x4a0   :  { %v5661_v29 = vadd.f32 %v5660_v21, %v5617_v16  ;;  %5917 = vmatmul.mubr.bf16.vlgmr.msra.gmra.mxu1 %v10054_v59  ;;  %5928 = vmatpush1.bf16.msra.mxu0 %v8152_v30  ;;  %v8193_v30 = vld [vmem:[%s11320_s2 + $0x68c] ss:$48 sps:$4 sm:$0xff]  }
 0x4a1   :  { %5959 = vmatprep.mubr.bf16.mxu0 %v10048_v12  ;;  %5971 = vmatpush1.bf16.msra.mxu1 %v8155_v42  ;;  %v5619_v11 = vpop.f32.mrf.mxu0  ;;  %v5662_v20 = vpop.f32.mrf.mxu1  ;;  %v8188_v42 = vld [vmem:[%s11320_s2 + $0x88] ss:$48 sps:$4 sm:$0xff]   ;;  %v8196_v16 = vld [vmem:[%s11320_s2 + $0x2c] ss:$48 sps:$4 sm:$0xff]  }
 0x4a2   :  { %6002 = vmatprep.mubr.bf16.mxu1 %v10050_v57  ;;  %v5663_v3 = vadd.f32 %v5662_v20, %v5619_v11  ;;  %5929 = vmatprep.subr.bf16.mxu0 %v8160_v10  ;;  %v8167_v57 = vld [vmem:[%s11320_s2 + $0x808] ss:$48 sps:$4 sm:$0xff]   ;;  %v6015_v5 = vrot.slane %v5661_v29, 7  ;;  %v8199_v21 = vld [vmem:[%s11320_s2 + $0x62c] ss:$48 sps:$4 sm:$0xff]  }
 0x4a3   :  { %v5621_v12 = vpop.f32.mrf.mxu0  ;;  %v5664_v49 = vpop.f32.mrf.mxu1  ;;  %5972 = vmatprep.subr.bf16.mxu1 %v8163_v28  ;;  %v8191_v10 = vld [vmem:[%s11320_s2 + $0x688] ss:$48 sps:$4 sm:$0xff]   ;;  %v8205_v11 = vld [vmem:[%s11320_s2 + $0xbcc] ss:$48 sps:$4 sm:$0xff]  }
 0x4a4   :  { %v5665_v46 = vadd.f32 %v5664_v49, %v5621_v12  ;;  %5930 = vmatpush1.bf16.msra.mxu0 %v8158_v47  ;;  %v6016_v17 = vrot.slane %v5663_v3, 7  ;;  %v8194_v28 = vld [vmem:[%s11320_s2 + $0x28] ss:$48 sps:$4 sm:$0xff]   ;;  %v8202_v47 = vld [vmem:[%s11320_s2 + $0x5cc] ss:$48 sps:$4 sm:$0xff]  }
 0x4a5   :  { %5973 = vmatpush1.bf16.msra.mxu1 %v8161_v34  ;;  %v5623_v4 = vpop.f32.mrf.mxu0  ;;  %v5666_v40 = vpop.f32.mrf.mxu1  ;;  %5931 = vmatprep.subr.bf16.mxu0 %v8166_v55  ;;  %v8197_v29 = vld [vmem:[%s11320_s2 + $0x628] ss:$48 sps:$4 sm:$0xff]   ;;  %v8208_v55 = vld [vmem:[%s11320_s2 + $0x56c] ss:$48 sps:$4 sm:$0xff]  }
 0x4a6   :  { %v6019_v41 = vrot.slane %v5665_v46, 7  ;;  %v5667_v51 = vadd.f32 %v5666_v40, %v5623_v4  ;;  %5974 = vmatprep.subr.bf16.mxu1 %v8169_v45  ;;  %v8200_v20 = vld [vmem:[%s11320_s2 + $0x5c8] ss:$48 sps:$4 sm:$0xff]   ;;  %v8211_v3 = vld [vmem:[%s11320_s2 + $0xb6c] ss:$48 sps:$4 sm:$0xff]  }
 0x4a7   :  { %v8203_v34 = vld [vmem:[%s11320_s2 + $0xbc8] ss:$48 sps:$4 sm:$0xff]   ;;  %v8214_v49 = vld [vmem:[%s11320_s2 + $0x50c] ss:$48 sps:$4 sm:$0xff]  }
 0x4a8   :  { %v6020_v24 = vrot.slane %v5667_v51, 7  ;;  %5932 = vmatpush1.bf16.msra.mxu0 %v8164_v50  ;;  %v10897_v15 = vsel %vm2880_vm0, %v6019_v41, %v6015_v5  ;;  %v10901_v13 = vsel %vm2880_vm0, %v6015_v5, %v6019_v41  ;;  %v8206_v45 = vld [vmem:[%s11320_s2 + $0x568] ss:$48 sps:$4 sm:$0xff]   ;;  %v8217_v46 = vld [vmem:[%s11320_s2 + $0xb0c] ss:$48 sps:$4 sm:$0xff]  }
 0x4a9   :  { %5975 = vmatpush1.bf16.msra.mxu1 %v8167_v57  ;;  %5933 = vmatprep.subr.bf16.mxu0 %v8172_v22  ;;  %v8209_v12 = vld [vmem:[%s11320_s2 + $0xb68] ss:$48 sps:$4 sm:$0xff]   ;;  %v8220_v40 = vld [vmem:[%s11320_s2 + $0x4ac] ss:$48 sps:$4 sm:$0xff]  }
 0x4aa   :  { %5976 = vmatprep.subr.bf16.mxu1 %v8175_v27  ;;  %v10914_v63 = vsel %vm2880_vm0, %v6020_v24, %v6016_v17  ;;  %v10918_v37 = vsel %vm2880_vm0, %v6016_v17, %v6020_v24  ;;  %v8212_v50 = vld [vmem:[%s11320_s2 + $0x508] ss:$48 sps:$4 sm:$0xff]   ;;  %v8223_v57 = vld [vmem:[%s11320_s2 + $0xaac] ss:$48 sps:$4 sm:$0xff]  }
 0x4ab   :  { %v8215_v4 = vld [vmem:[%s11320_s2 + $0xb08] ss:$48 sps:$4 sm:$0xff]   ;;  %v8226_v41 = vld [vmem:[%s11320_s2 + $0x44c] ss:$48 sps:$4 sm:$0xff]  }
 0x4ac   :  { %5934 = vmatpush1.bf16.msra.mxu0 %v8170_v52  ;;  %v8218_v22 = vld [vmem:[%s11320_s2 + $0x4a8] ss:$48 sps:$4 sm:$0xff]   ;;  %v8229_v51 = vld [vmem:[%s11320_s2 + $0xa4c] ss:$48 sps:$4 sm:$0xff]  }
 0x4ad   :  { %5977 = vmatpush1.bf16.msra.mxu1 %v8173_v19  ;;  %5935 = vmatprep.subr.bf16.mxu0 %v8178_v18  ;;  %v8221_v5 = vld [vmem:[%s11320_s2 + $0xaa8] ss:$48 sps:$4 sm:$0xff]   ;;  %v8232_v24 = vld [vmem:[%s11320_s2 + $0x3ec] ss:$48 sps:$4 sm:$0xff]  }
 0x4ae   :  { %5978 = vmatprep.subr.bf16.mxu1 %v8181_v61  ;;  %v8224_v27 = vld [vmem:[%s11320_s2 + $0x448] ss:$48 sps:$4 sm:$0xff]   ;;  %v8235_v52 = vld [vmem:[%s11320_s2 + $0x9ec] ss:$48 sps:$4 sm:$0xff]  }
 0x4af   :  { %v8227_v17 = vld [vmem:[%s11320_s2 + $0xa48] ss:$48 sps:$4 sm:$0xff]   ;;  %v8238_v61 = vld [vmem:[%s11320_s2 + $0x38c] ss:$48 sps:$4 sm:$0xff]  }
 0x4b0   :  { %5936 = vmatpush1.bf16.msra.mxu0 %v8176_v25  ;;  %v8230_v19 = vld [vmem:[%s11320_s2 + $0x3e8] ss:$48 sps:$4 sm:$0xff]   ;;  %v8241_v25 = vld [vmem:[%s11320_s2 + $0x98c] ss:$48 sps:$4 sm:$0xff]  }
 0x4b1   :  { %5979 = vmatpush1.bf16.msra.mxu1 %v8179_v43  ;;  %5937 = vmatprep.subr.bf16.mxu0 %v8184_v44  ;;  %v8233_v18 = vld [vmem:[%s11320_s2 + $0x9e8] ss:$48 sps:$4 sm:$0xff]  }
 0x4b2   :  { %5980 = vmatprep.subr.bf16.mxu1 %v8187_v1  ;;  %v8236_v43 = vld [vmem:[%s11320_s2 + $0x388] ss:$48 sps:$4 sm:$0xff]   ;;  %v8244_v1 = vld [vmem:[%s11320_s2 + $0x32c] ss:$48 sps:$4 sm:$0xff]  }
 0x4b3   :  { %v8239_v44 = vld [vmem:[%s11320_s2 + $0x988] ss:$48 sps:$4 sm:$0xff]  }
 0x4b4   :  { %5938 = vmatpush1.bf16.msra.mxu0 %v8182_v31  ;;  %v8247_v31 = vld [vmem:[%s11320_s2 + $0x92c] ss:$48 sps:$4 sm:$0xff]  }
 0x4b5   :  { %5981 = vmatpush1.bf16.msra.mxu1 %v8185_v35  ;;  %5939 = vmatprep.subr.bf16.mxu0 %v8190_v39  ;;  %v8242_v35 = vld [vmem:[%s11320_s2 + $0x328] ss:$48 sps:$4 sm:$0xff]  }
 0x4b6   :  { %5982 = vmatprep.subr.bf16.mxu1 %v8193_v30  ;;  %v8245_v39 = vld [vmem:[%s11320_s2 + $0x928] ss:$48 sps:$4 sm:$0xff]  }
 0x4b8   :  { %5940 = vmatpush1.bf16.msra.mxu0 %v8188_v42 }
 0x4b9   :  { %5983 = vmatpush1.bf16.msra.mxu1 %v8191_v10  ;;  %5941 = vmatprep.subr.bf16.mxu0 %v8196_v16 }
 0x4ba   :  { %5984 = vmatprep.subr.bf16.mxu1 %v8199_v21 }
 0x4bc   :  { %5942 = vmatpush1.bf16.msra.mxu0 %v8194_v28 }
 0x4bd   :  { %5985 = vmatpush1.bf16.msra.mxu1 %v8197_v29  ;;  %5943 = vmatprep.subr.bf16.mxu0 %v8202_v47 }
 0x4be   :  { %5986 = vmatprep.subr.bf16.mxu1 %v8205_v11 }
 0x4c0   :  { %5944 = vmatpush2.bf16.msra.mxu0 %v8200_v20 }
 0x4c1   :  { %5987 = vmatpush2.bf16.msra.mxu1 %v8203_v34  ;;  %5945 = vmatprep.subr.bf16.mxu0 %v8208_v55  ;;  %v6031_v55 = vmul.f32 %v10897_v15, %v9573_v23 }
 0x4c2   :  { %5988 = vmatprep.subr.bf16.mxu1 %v8211_v3 }
 0x4c4   :  { %5946 = vmatpush2.bf16.msra.mxu0 %v8206_v45 }
 0x4c5   :  { %5989 = vmatpush2.bf16.msra.mxu1 %v8209_v12  ;;  %5947 = vmatprep.subr.bf16.mxu0 %v8214_v49 }
 0x4c6   :  { %5990 = vmatprep.subr.bf16.mxu1 %v8217_v46 }
 0x4c8   :  { %5948 = vmatpush2.bf16.msra.mxu0 %v8212_v50 }
 0x4c9   :  { %5991 = vmatpush2.bf16.msra.mxu1 %v8215_v4  ;;  %5949 = vmatprep.subr.bf16.mxu0 %v8220_v40  ;;  %v6035_v40 = vmul.f32 %v10901_v13, %v9579_v14  ;;  %v5581_v13 = vadd.f32 %v10853_v9, %v10851_v33 }
 0x4ca   :  { %5992 = vmatprep.subr.bf16.mxu1 %v8223_v57 }
 0x4cc   :  { %5950 = vmatpush2.bf16.msra.mxu0 %v8218_v22 }
 0x4cd   :  { %5993 = vmatpush2.bf16.msra.mxu1 %v8221_v5  ;;  %5951 = vmatprep.subr.bf16.mxu0 %v8226_v41  ;;  %v6036_v41 = vmul.f32 %v10918_v37, %v9579_v14 }
 0x4ce   :  { %5994 = vmatprep.subr.bf16.mxu1 %v8229_v51 }
 0x4d0   :  { %5952 = vmatpush2.bf16.msra.mxu0 %v8224_v27  ;;  %v5575_v27 = vadd.f32 %v10805_v56, %v10803_v53 }
 0x4d1   :  { %5995 = vmatpush2.bf16.msra.mxu1 %v8227_v17  ;;  %5953 = vmatprep.subr.bf16.mxu0 %v8232_v24 }
 0x4d2   :  { %5996 = vmatprep.subr.bf16.mxu1 %v8235_v52 }
 0x4d4   :  { %5954 = vmatpush2.bf16.msra.mxu0 %v8230_v19  ;;  %v6013_v19 = vrot.slane %v5575_v27, 7 }
 0x4d5   :  { %5997 = vmatpush2.bf16.msra.mxu1 %v8233_v18  ;;  %5955 = vmatprep.subr.bf16.mxu0 %v8238_v61  ;;  %v5577_v61 = vadd.f32 %v10821_v0, %v10819_v38 }
 0x4d6   :  { %5998 = vmatprep.subr.bf16.mxu1 %v8241_v25 }
 0x4d8   :  { %5956 = vmatpush2.bf16.msra.mxu0 %v8236_v43 }
 0x4d9   :  { %5999 = vmatpush2.bf16.msra.mxu1 %v8239_v44  ;;  %5957 = vmatprep.subr.bf16.mxu0 %v8244_v1 }
 0x4da   :  { %6000 = vmatprep.subr.bf16.mxu1 %v8247_v31  ;;  %v6014_v31 = vrot.slane %v5577_v61, 7 }
 0x4dc   :  { %5958 = vmatpush2.bf16.msra.mxu0 %v8242_v35 }
 0x4dd   :  { %6001 = vmatpush2.bf16.msra.mxu1 %v8245_v39 }
 0x4df   :  { %5960 = vmatmul.mubr.bf16.vlgmr.msra.gmra.mxu0 %v10052_v58  ;;  %v5703_v30 = vpop.f32.mrf.mxu0 }
 0x4e0   :  { %6003 = vmatmul.mubr.bf16.vlgmr.msra.gmra.mxu1 %v10054_v59  ;;  %v5746_v42 = vpop.f32.mrf.mxu1  ;;  %v6032_v59 = vmul.f32 %v10914_v63, %v9573_v23  ;;  %v5579_v63 = vadd.f32 %v10837_v54, %v10835_v2  ;;  %v6018_v54 = vrot.slane %v5581_v13, 7 }
 0x4e1   :  { %v5705_v10 = vpop.f32.mrf.mxu0  ;;  %v5747_v44 = vadd.f32 %v5746_v42, %v5703_v30 }
 0x4e2   :  { %v5748_v16 = vpop.f32.mrf.mxu1  ;;  %v6017_v17 = vrot.slane %v5579_v63, 7  ;;  %v6026_v30 = vsel %vm2880_vm0, %v6018_v54, %v6014_v31  ;;  %v6022_v42 = vsel %vm2880_vm0, %v6014_v31, %v6018_v54 }
 0x4e3   :  { %v5707_v21 = vpop.f32.mrf.mxu0 }
 0x4e4   :  { %v5750_v28 = vpop.f32.mrf.mxu1  ;;  %v6025_v25 = vsel %vm2880_vm0, %v6017_v17, %v6013_v19  ;;  %v6021_v53 = vsel %vm2880_vm0, %v6013_v19, %v6017_v17 }
 0x4e5   :  { %v5709_v29 = vpop.f32.mrf.mxu0  ;;  %v6029_v35 = vmul.f32 %v6025_v25, %v9573_v23  ;;  %v5751_v39 = vadd.f32 %v5750_v28, %v5707_v21  ;;  %v6033_v0 = vmul.f32 %v6021_v53, %v9579_v14 }
 0x4e6   :  { %v5752_v47 = vpop.f32.mrf.mxu1 }
 0x51f   :  { %v5789_v11 = vpop.f32.mrf.mxu0 }
 0x520   :  { %v5832_v20 = vpop.f32.mrf.mxu1 }
 0x521   :  { %v5833_v34 = vadd.f32 %v5832_v20, %v5789_v11  ;;  %v5791_v3 = vpop.f32.mrf.mxu0 }
 0x522   :  { %v5834_v45 = vpop.f32.mrf.mxu1 }
 0x523   :  { %v11062_v12 = vadd.f32 %v6031_v55, %v5833_v34  ;;  %v5835_v58 = vadd.f32 %v5834_v45, %v5791_v3  ;;  %v5793_v49 = vpop.f32.mrf.mxu0  ;;  %v6037_v55 = vadd.f32 %v6029_v35, %v5747_v44  ;;  %v5749_v3 = vadd.f32 %v5748_v16, %v5705_v10 }
 0x524   :  { %v5836_v46 = vpop.f32.mrf.mxu1  ;;  %v6030_v16 = vmul.f32 %v6026_v30, %v9573_v23 }
 0x525   :  { %v11066_v50 = vadd.f32 %v6032_v59, %v5835_v58  ;;  %v5837_v4 = vadd.f32 %v5836_v46, %v5793_v49  ;;  %v5795_v57 = vpop.f32.mrf.mxu0  ;;  %v6041_v59 = vadd.f32 %v6033_v0, %v5751_v39  ;;  %v5753_v49 = vadd.f32 %v5752_v47, %v5709_v29 }
 0x526   :  { %v5838_v22 = vpop.f32.mrf.mxu1 }
 0x527   :  { %v11070_v5 = vadd.f32 %v6035_v40, %v5837_v4  ;;  %v5839_v15 = vadd.f32 %v5838_v22, %v5795_v57  ;;  %v6034_v4 = vmul.f32 %v6022_v42, %v9579_v14 }
 0x529   :  { %v11074_v51 = vadd.f32 %v6036_v41, %v5839_v15  ;;  %v6038_v41 = vadd.f32 %v6030_v16, %v5749_v3  ;;  %v6042_v63 = vadd.f32 %v6034_v4, %v5753_v49 }
 0x55f   :  { %v5875_v24 = vpop.f32.mrf.mxu0 }
 0x560   :  { %v5918_v52 = vpop.f32.mrf.mxu1 }
 0x561   :  { %v5877_v18 = vpop.f32.mrf.mxu0  ;;  %v5919_v43 = vadd.f32 %v5918_v52, %v5875_v24 }
 0x562   :  { %v5920_v37 = vpop.f32.mrf.mxu1 }
 0x563   :  { %v5879_v2 = vpop.f32.mrf.mxu0  ;;  %v5921_v1 = vadd.f32 %v5920_v37, %v5877_v18  ;;  %v6045_v11 = vrot.slane %v5919_v43, 1 }
 0x564   :  { %v5922_v56 = vpop.f32.mrf.mxu1 }
 0x565   :  { %v5923_v33 = vadd.f32 %v5922_v56, %v5879_v2  ;;  %v5881_v9 = vpop.f32.mrf.mxu0  ;;  %v6046_v45 = vrot.slane %v5921_v1, 1 }
 0x566   :  { %v5924_v38 = vpop.f32.mrf.mxu1 }
 0x567   :  { %v6049_v20 = vrot.slane %v5923_v33, 1  ;;  %v5925_v34 = vadd.f32 %v5924_v38, %v5881_v9 }
 0x569   :  { %v6053_v58 = vsel %vm2923_vm1, %v6045_v11, %v6049_v20  ;;  %v6057_v21 = vsel %vm2923_vm1, %v6049_v20, %v6045_v11  ;;  %v6050_v28 = vrot.slane %v5925_v34, 1 }
 0x56a   :  { %v6065_v46 = vmul.f32 %v6057_v21, %v9612_v8  ;;  %v6061_v10 = vmul.f32 %v6053_v58, %v9601_v60 }
 0x56b   :  { %v6054_v40 = vsel %vm2923_vm1, %v6046_v45, %v6050_v28  ;;  %v6058_v57 = vsel %vm2923_vm1, %v6050_v28, %v6046_v45 }
 0x56c   :  { %v11106_v22 = vadd.f32 %v6065_v46, %v6041_v59  ;;  %v11108_v15 = vadd.f32 %v6061_v10, %v6037_v55  ;;  %v6062_v29 = vmul.f32 %v6054_v40, %v9601_v60  ;;  %v6066_v47 = vmul.f32 %v6058_v57, %v9612_v8 }
 0x56e   :  { %6079 = vrot.lane.b32.xlu1 %v11106_v22, %s8265_s1  ;;  %6077 = vrot.lane.b32.xlu0 %v11108_v15, %s8265_s1  ;;  %v11116_v23 = vadd.f32 %v6062_v29, %v6038_v41  ;;  %v11118_v14 = vadd.f32 %v6066_v47, %v6042_v63 }
 0x572   :  { %6081 = vrot.lane.b32.xlu0 %v11116_v23, %s8265_s1  ;;  %6083 = vrot.lane.b32.xlu1 %v11118_v14, %s8265_s1 }
 0x59f   :  { %v5961_v27 = vpop.f32.mrf.mxu0 }
 0x5a0   :  { %v6004_v17 = vpop.f32.mrf.mxu1 }
 0x5a1   :  { %v5963_v24 = vpop.f32.mrf.mxu0  ;;  %v6005_v52 = vadd.f32 %v6004_v17, %v5961_v27 }
 0x5a2   :  { %v6006_v13 = vpop.f32.mrf.mxu1 }
 0x5a3   :  { %v5965_v19 = vpop.f32.mrf.mxu0  ;;  %v6007_v61 = vadd.f32 %v6006_v13, %v5963_v24  ;;  %v6047_v2 = vrot.slane %v6005_v52, 1 }
 0x5a4   :  { %v6008_v18 = vpop.f32.mrf.mxu1 }
 0x5a5   :  { %v6009_v37 = vadd.f32 %v6008_v18, %v5965_v19  ;;  %v5967_v25 = vpop.f32.mrf.mxu0  ;;  %v6048_v53 = vrot.slane %v6007_v61, 1 }
 0x5a6   :  { %v6010_v43 = vpop.f32.mrf.mxu1 }
 0x5a7   :  { %v6051_v54 = vrot.slane %v6009_v37, 1  ;;  %v6011_v44 = vadd.f32 %v6010_v43, %v5967_v25 }
 0x5a9   :  { %v6055_v56 = vsel %vm2923_vm1, %v6047_v2, %v6051_v54  ;;  %v6059_v1 = vsel %vm2923_vm1, %v6051_v54, %v6047_v2  ;;  %v6052_v33 = vrot.slane %v6011_v44, 1 }
 0x5aa   :  { %v6063_v9 = vmul.f32 %v6055_v56, %v9601_v60  ;;  %v6067_v31 = vmul.f32 %v6059_v1, %v9612_v8 }
 0x5ab   :  { %v6056_v35 = vsel %vm2923_vm1, %v6048_v53, %v6052_v33  ;;  %v6060_v39 = vsel %vm2923_vm1, %v6052_v33, %v6048_v53 }
 0x5ac   :  { %v11135_v38 = vadd.f32 %v6063_v9, %v11062_v12  ;;  %v11138_v0 = vadd.f32 %v6067_v31, %v11070_v5  ;;  %v6064_v11 = vmul.f32 %v6056_v35, %v9601_v60  ;;  %v6068_v20 = vmul.f32 %v6060_v39, %v9612_v8 }
 0x5ae   :  { %6085 = vrot.lane.b32.xlu0 %v11135_v38, %s8265_s1  ;;  %6087 = vrot.lane.b32.xlu1 %v11138_v0, %s8265_s1  ;;  %v11147_v34 = vadd.f32 %v6064_v11, %v11066_v50  ;;  %v11150_v62 = vadd.f32 %v6068_v20, %v11074_v51 }
 0x5b2   :  { %6089 = vrot.lane.b32.xlu0 %v11147_v34, %s8265_s1  ;;  %6091 = vrot.lane.b32.xlu1 %v11150_v62, %s8265_s1 }
 0x5e0   :  { %v6080_v60 = vpop.permute.xlu1 %6079  ;;  %v6078_v8 = vpop.permute.xlu0 %6077 }
 0x5e4   :  { %v6082_v12 = vpop.permute.xlu0 %6081  ;;  %v6084_v5 = vpop.permute.xlu1 %6083 }
 0x5e5   :  { %v6097_v30 = vsel %vm2976_vm2, %v6078_v8, %v6082_v12  ;;  %v6098_v50 = vsel %vm2976_vm2, %v6080_v60, %v6084_v5 }
 0x5e6   :  { %v6102_v21 = vadd.f32 %v6097_v30, %v11116_v23  ;;  %v6106_v28 = vadd.f32 %v6098_v50, %v11118_v14 }
 0x620   :  { %v6086_v55 = vpop.permute.xlu0 %6085  ;;  %v6088_v3 = vpop.permute.xlu1 %6087 }
 0x621   :  { %v6095_v51 = vsel %vm2976_vm2, %v6082_v12, %v6086_v55  ;;  %v6096_v42 = vsel %vm2976_vm2, %v6084_v5, %v6088_v3 }
 0x622   :  { %v6103_v45 = vadd.f32 %v6095_v51, %v11135_v38  ;;  %v6107_v58 = vadd.f32 %v6096_v42, %v11138_v0 }
 0x624   :  { %v6090_v59 = vpop.permute.xlu0 %6089  ;;  %v6092_v49 = vpop.permute.xlu1 %6091  ;;  %v6111_v41 = vadd.f32 %v6103_v45, %v6102_v21  ;;  %v6115_v63 = vadd.f32 %v6107_v58, %v6106_v28 }
 0x625   :  { %v6093_v46 = vsel %vm2976_vm2, %v6086_v55, %v6090_v59  ;;  %v6099_v10 = vsel %vm2976_vm2, %v6090_v59, %v6078_v8  ;;  %v6094_v16 = vsel %vm2976_vm2, %v6088_v3, %v6092_v49  ;;  %v6100_v4 = vsel %vm2976_vm2, %v6092_v49, %v6080_v60 }
 0x626   :  { %v6101_v40 = vadd.f32 %v6099_v10, %v11108_v15  ;;  %v6104_v57 = vadd.f32 %v6093_v46, %v11147_v34  ;;  %v6105_v29 = vadd.f32 %v6100_v4, %v11106_v22  ;;  %v6108_v47 = vadd.f32 %v6094_v16, %v11150_v62 }
 0x628   :  { %v6109_v27 = vadd.f32 %v6104_v57, %v6101_v40  ;;  %v6110_v17 = vadd.f32 %v6102_v21, %v6101_v40  ;;  %v6112_v24 = vadd.f32 %v6104_v57, %v6103_v45  ;;  %v6113_v13 = vadd.f32 %v6108_v47, %v6105_v29 }
 0x629   :  { %v6114_v52 = vadd.f32 %v6106_v28, %v6105_v29  ;;  %v6116_v19 = vadd.f32 %v6108_v47, %v6107_v58 }
 0x62a   :  { %v6117_v18 = vadd.f32 %v6111_v41, %v6109_v27  ;;  %v6118_v61 = vadd.f32 %v6112_v24, %v6110_v17  ;;  %v6119_v37 = vadd.f32 %v6115_v63, %v6113_v13 }
 0x62b   :  { %v6120_v25 = vadd.f32 %v6116_v19, %v6114_v52 }
 0x62c   :  { %v6121_v43 = vadd.f32 %v6119_v37, %v6117_v18 }
 0x62d   :  { %v6128_v2 = vadd.f32 %v6120_v25, %v6118_v61 }
 0x62e   :  { %v6122_v54 = vrot.slane %v6121_v43, 4 }
 0x62f   :  { %v6129_v44 = vrot.slane %v6128_v2, 4 }
 0x630   :  { %v6123_v53 = vadd.f32 %v6122_v54, %v6121_v43 }
 0x631   :  { %v6130_v56 = vadd.f32 %v6129_v44, %v6128_v2 }
 0x632   :  { %v6124_v1 = vrot.slane %v6123_v53, 2 }
 0x633   :  { %v6131_v33 = vrot.slane %v6130_v56, 2 }
 0x634   :  { %v6125_v9 = vadd.f32 %v6124_v1, %v6123_v53 }
 0x635   :  { %v6132_v31 = vadd.f32 %v6131_v33, %v6130_v56 }
 0x636   :  { %v6126_v35 = vrot.slane %v6125_v9, 1 }
 0x637   :  { %v6133_v39 = vrot.slane %v6132_v31, 1 }
 0x638   :  { %v6127_v11 = vadd.f32 %v6126_v35, %v6125_v9 }
 0x639   :  { %v6134_v20 = vadd.f32 %v6133_v39, %v6132_v31 }
 0x63a   :  { %v6135_v60 = vmul.f32 0.0078125, %v6127_v11 }
 0x63b   :  { %v6136_v8 = vmul.f32 0.0078125, %v6134_v20 }
 0x63c   :  { %v11181_v12 = vsub.f32 %v11106_v22, %v6135_v60  ;;  %v11184_v5 = vsub.f32 %v11108_v15, %v6135_v60  ;;  %v11203_v51 = vsub.f32 %v11138_v0, %v6135_v60  ;;  %v11206_v42 = vsub.f32 %v11135_v38, %v6135_v60 }
 0x63d   :  { %v11191_v30 = vsub.f32 %v11118_v14, %v6136_v8  ;;  %v11194_v50 = vsub.f32 %v11116_v23, %v6136_v8  ;;  %v11215_v45 = vsub.f32 %v11150_v62, %v6136_v8  ;;  %v11218_v58 = vsub.f32 %v11147_v34, %v6136_v8 }
 0x63e   :  { %v6149_v55 = vmul.f32 %v11181_v12, %v11181_v12  ;;  %v6145_v3 = vmul.f32 %v11184_v5, %v11184_v5  ;;  %v6151_v23 = vmul.f32 %v11203_v51, %v11203_v51  ;;  %v6147_v14 = vmul.f32 %v11206_v42, %v11206_v42 }
 0x63f   :  { %v6150_v22 = vmul.f32 %v11191_v30, %v11191_v30  ;;  %v6146_v15 = vmul.f32 %v11194_v50, %v11194_v50  ;;  %v6152_v38 = vmul.f32 %v11215_v45, %v11215_v45  ;;  %v6148_v0 = vmul.f32 %v11218_v58, %v11218_v58 }
 0x640   :  { %6155 = vrot.lane.b32.xlu1 %v6149_v55, %s8265_s1  ;;  %6153 = vrot.lane.b32.xlu0 %v6145_v3, %s8265_s1 }
 0x644   :  { %6159 = vrot.lane.b32.xlu1 %v6150_v22, %s8265_s1  ;;  %6157 = vrot.lane.b32.xlu0 %v6146_v15, %s8265_s1 }
 0x648   :  { %6163 = vrot.lane.b32.xlu1 %v6151_v23, %s8265_s1  ;;  %6161 = vrot.lane.b32.xlu0 %v6147_v14, %s8265_s1 }
 0x64c   :  { %6167 = vrot.lane.b32.xlu1 %v6152_v38, %s8265_s1  ;;  %6165 = vrot.lane.b32.xlu0 %v6148_v0, %s8265_s1 }
 0x6b2   :  { %v6156_v21 = vpop.permute.xlu1 %6155  ;;  %v6154_v62 = vpop.permute.xlu0 %6153 }
 0x6b6   :  { %v6160_v28 = vpop.permute.xlu1 %6159  ;;  %v6158_v59 = vpop.permute.xlu0 %6157 }
 0x6b7   :  { %v6174_v46 = vsel %vm2976_vm2, %v6156_v21, %v6160_v28  ;;  %v6173_v10 = vsel %vm2976_vm2, %v6154_v62, %v6158_v59 }
 0x6b8   :  { %v6182_v29 = vadd.f32 %v6174_v46, %v6150_v22  ;;  %v6178_v47 = vadd.f32 %v6173_v10, %v6146_v15 }
 0x6ba   :  { %v6164_v34 = vpop.permute.xlu1 %6163  ;;  %v6162_v49 = vpop.permute.xlu0 %6161 }
 0x6bb   :  { %v6172_v16 = vsel %vm2976_vm2, %v6160_v28, %v6164_v34  ;;  %v6171_v4 = vsel %vm2976_vm2, %v6158_v59, %v6162_v49 }
 0x6bc   :  { %v6183_v40 = vadd.f32 %v6172_v16, %v6151_v23  ;;  %v6179_v57 = vadd.f32 %v6171_v4, %v6147_v14  ;;  %v3191_v16 = vld [vmem:[%s11323_s5] sm:$0xf] }
 0x6bd   :  { %v3192_v4 = vld [vmem:[%s11324_s6] sm:$0xf] }
 0x6be   :  { %v6168_v41 = vpop.permute.xlu1 %6167  ;;  %v6166_v63 = vpop.permute.xlu0 %6165  ;;  %v6191_v37 = vadd.f32 %v6183_v40, %v6182_v29  ;;  %v6187_v25 = vadd.f32 %v6179_v57, %v6178_v47 }
 0x6bf   :  { %v6170_v27 = vsel %vm2976_vm2, %v6164_v34, %v6168_v41  ;;  %v6176_v17 = vsel %vm2976_vm2, %v6168_v41, %v6156_v21  ;;  %v6169_v24 = vsel %vm2976_vm2, %v6162_v49, %v6166_v63  ;;  %v6175_v13 = vsel %vm2976_vm2, %v6166_v63, %v6154_v62 }
 0x6c0   :  { %v6181_v52 = vadd.f32 %v6176_v17, %v6149_v55  ;;  %v6184_v19 = vadd.f32 %v6170_v27, %v6152_v38  ;;  %v6177_v18 = vadd.f32 %v6175_v13, %v6145_v3  ;;  %v6180_v61 = vadd.f32 %v6169_v24, %v6148_v0 }
 0x6c1   :  { %v6270_v41 = vrot.slane %v3192_v4, %v10021_v7  ;;  %v6278_v63 = vrot.slane %v3192_v4, %v10024_v36 }
 0x6c2   :  { %v6189_v43 = vadd.f32 %v6184_v19, %v6181_v52  ;;  %v6190_v2 = vadd.f32 %v6182_v29, %v6181_v52  ;;  %v6192_v54 = vadd.f32 %v6184_v19, %v6183_v40  ;;  %v6185_v44 = vadd.f32 %v6180_v61, %v6177_v18 }
 0x6c3   :  { %v6186_v53 = vadd.f32 %v6178_v47, %v6177_v18  ;;  %v6188_v56 = vadd.f32 %v6180_v61, %v6179_v57  ;;  %v6274_v29 = vrot.slane %v3192_v4, %v10014_v32  ;;  %v6282_v47 = vrot.slane %v3192_v4, %v10018_v48 }
 0x6c4   :  { %v6195_v1 = vadd.f32 %v6191_v37, %v6189_v43  ;;  %v6196_v33 = vadd.f32 %v6192_v54, %v6190_v2  ;;  %v6193_v9 = vadd.f32 %v6187_v25, %v6185_v44  ;;  %v8259_v44 = vld [vmem:[%s11317_s0 + $0x18] sm:$0xff] }
 0x6c5   :  { %v6194_v31 = vadd.f32 %v6188_v56, %v6186_v53  ;;  %v8260_v56 = vld [vmem:[%s11317_s0 + $0x20] sm:$0xff] }
 0x6c6   :  { %v6197_v35 = vadd.f32 %v6195_v1, %v6193_v9 }
 0x6c7   :  { %v6204_v39 = vadd.f32 %v6196_v33, %v6194_v31  ;;  %v8261_v33 = vld [vmem:[%s11317_s0 + $0x28] sm:$0xff]  ;;  %v8262_v31 = vld [vmem:[%s11317_s0 + $0x30] sm:$0xff] }
 0x6c8   :  { %v6198_v6 = vrot.slane %v6197_v35, 4 }
 0x6c9   :  { %v6205_v11 = vrot.slane %v6204_v39, 4 }
 0x6ca   :  { %v6199_v20 = vadd.f32 %v6198_v6, %v6197_v35 }
 0x6cb   :  { %v6206_v60 = vadd.f32 %v6205_v11, %v6204_v39  ;;  %v8263_v39 = vld [vmem:[%s11317_s0 + $0x38] sm:$0xff] }
 0x6cc   :  { %v6200_v8 = vrot.slane %v6199_v20, 2 }
 0x6cd   :  { %v6207_v55 = vrot.slane %v6206_v60, 2 }
 0x6ce   :  { %v6201_v3 = vadd.f32 %v6200_v8, %v6199_v20 }
 0x6cf   :  { %v6208_v22 = vadd.f32 %v6207_v55, %v6206_v60 }
 0x6d0   :  { %v6202_v15 = vrot.slane %v6201_v3, 1 }
 0x6d1   :  { %v6209_v23 = vrot.slane %v6208_v22, 1 }
 0x6d2   :  { %v6203_v14 = vadd.f32 %v6202_v15, %v6201_v3 }
 0x6d3   :  { %v6210_v38 = vadd.f32 %v6209_v23, %v6208_v22 }
 0x6d4   :  { %v6211_v0 = vmul.f32 0.0078125, %v6203_v14 }
 0x6d5   :  { %v6212_v21 = vmul.f32 0.0078125, %v6210_v38 }
 0x6d6   :  { %v6213_v62 = vadd.f32 1e-05, %v6211_v0 }
 0x6d7   :  { %v6214_v28 = vadd.f32 1e-05, %v6212_v21 }
 0x6d8   :  { %8252 = vrsqrt.f32 %v6213_v62 }
 0x6d9   :  { %8254 = vrsqrt.f32 %v6214_v28 }
 0x6e5   :  { %v8253_v59 = vpop.eup %8252 }
 0x6e6   :  { %v8255_v34 = vpop.eup %8254 }
 0x6e7   :  { %v6219_v49 = vcombine.low %v8253_v59, %v8255_v34 }
 0x6e9   :  { %v6226_v46 = vrot.slane %v6219_v49, %v10004_v26 }
 0x6eb   :  { %v6227_v10 = vcombine.low %v6226_v46, %v6226_v46 }
 0x6ed   :  { %v6234_v40 = vrot.slane %v6227_v10, %v10004_v26 }
 0x6ef   :  { %v6236_v57 = vmul.f32 %v6234_v40, %v3191_v16 }
 0x6f1   :  { %v6241_v27 = vrot.slane %v6236_v57, %v10021_v7  ;;  %v6245_v17 = vrot.slane %v6236_v57, %v10014_v32  ;;  %v6249_v24 = vrot.slane %v6236_v57, %v10024_v36  ;;  %v6253_v13 = vrot.slane %v6236_v57, %v10018_v48 }
 0x6f3   :  { %v6258_v52 = vmul.f32 %v6241_v27, %v11184_v5  ;;  %v6259_v26 = vmul.f32 %v6245_v17, %v11194_v50  ;;  %v6260_v19 = vmul.f32 %v6249_v24, %v11206_v42  ;;  %v6261_v18 = vmul.f32 %v6253_v13, %v11218_v58  ;;  %v8256_v42 = vld [vmem:[%s11317_s0] sm:$0xff] }
 0x6f4   :  { %v6262_v61 = vmul.f32 %v6241_v27, %v11181_v12  ;;  %v6263_v37 = vmul.f32 %v6245_v17, %v11191_v30  ;;  %v6264_v7 = vmul.f32 %v6249_v24, %v11203_v51  ;;  %v6265_v32 = vmul.f32 %v6253_v13, %v11215_v45  ;;  %v8257_v12 = vld [vmem:[%s11317_s0 + $0x8] sm:$0xff]  ;;  %v8258_v51 = vld [vmem:[%s11317_s0 + $0x10] sm:$0xff] }
 0x6f5   :  { %v6287_v25 = vadd.f32 %v6270_v41, %v6258_v52  ;;  %v6288_v36 = vadd.f32 %v6274_v29, %v6259_v26  ;;  %v6289_v43 = vadd.f32 %v6278_v63, %v6260_v19  ;;  %v6290_v48 = vadd.f32 %v6282_v47, %v6261_v18 }
 0x6f6   :  { %v6291_v2 = vadd.f32 %v6270_v41, %v6262_v61  ;;  %v6292_v5 = vadd.f32 %v6274_v29, %v6263_v37  ;;  %v6293_v54 = vadd.f32 %v6278_v63, %v6264_v7  ;;  %v6294_v50 = vadd.f32 %v6282_v47, %v6265_v32 }
 0x6f7   :  { %v6295_v58 = vadd.f32 %v8256_v42, %v6287_v25  ;;  %v6296_v30 = vadd.f32 %v8257_v12, %v6288_v36  ;;  %v6297_v45 = vadd.f32 %v8258_v51, %v6289_v43  ;;  %v6298_v53 = vadd.f32 %v8259_v44, %v6290_v48 }
 0x6f8   :  { %v6299_v1 = vadd.f32 %v8260_v56, %v6291_v2  ;;  %v6300_v9 = vadd.f32 %v8261_v33, %v6292_v5  ;;  %v6301_v35 = vadd.f32 %v8262_v31, %v6293_v54  ;;  %v6302_v6 = vadd.f32 %v8263_v39, %v6294_v50 }
 0x6f9   :  { %v6303_v11 = vmax.f32 %v6295_v58, 0.0  ;;  %v6304_v20 = vmax.f32 %v6296_v30, 0.0  ;;  %v6305_v60 = vmax.f32 %v6297_v45, 0.0  ;;  %v6306_v8 = vmax.f32 %v6298_v53, 0.0 }
 0x6fa   :  { %v6307_v55 = vmax.f32 %v6299_v1, 0.0  ;;  %v6308_v3 = vmax.f32 %v6300_v9, 0.0  ;;  %v6309_v22 = vmax.f32 %v6301_v35, 0.0  ;;  %v6310_v15 = vmax.f32 %v6302_v6, 0.0 }
 0x6fb   :  { %6311 = vst [vmem:[%s11325_s9] sm:$0xff] %v6303_v11  ;;  %6312 = vst [vmem:[%s11325_s9 + $0x8] sm:$0xff] %v6304_v20 }
 0x6fc   :  { %6313 = vst [vmem:[%s11325_s9 + $0x10] sm:$0xff] %v6305_v60  ;;  %6314 = vst [vmem:[%s11325_s9 + $0x18] sm:$0xff] %v6306_v8 }
 0x6fd   :  { %6315 = vst [vmem:[%s11325_s9 + $0x20] sm:$0xff] %v6307_v55  ;;  %6316 = vst [vmem:[%s11325_s9 + $0x28] sm:$0xff] %v6308_v3 }
 0x6fe   :  { %6317 = vst [vmem:[%s11325_s9 + $0x30] sm:$0xff] %v6309_v22  ;;  %6318 = vst [vmem:[%s11325_s9 + $0x38] sm:$0xff] %v6310_v15 }

</bundles_post_ra>
